<compile_context>
chip_gen: v6e
topology: v6e:2x2x1
jax: 0.10.0
libtpu: 0.0.40
codegen_flags: <defaults>
</compile_context>

<pallas_src>
import math
from functools import partial

import jax
import jax.numpy as jnp
from jax import lax
from jax.experimental import pallas as pl
from jax.experimental.pallas import tpu as pltpu

_LN_EPS = 1e-5  # PyTorch nn.LayerNorm default


def _pick_tile(n, candidates, min_steps=1):
    """Largest candidate dividing n that still leaves >= min_steps grid steps."""
    best = None
    for c in sorted(candidates, reverse=True):
        if c <= n and n % c == 0:
            if best is None:
                best = c
            if n // c >= min_steps:
                return c
    return best if best is not None else n


def _resident_spec(shape, single_buffer):
    """BlockSpec for a constant-index (weight-like) operand.

    With single_buffer=True we request 1-deep buffering (the block index never
    changes, so double-buffering only wastes VMEM).  Falls back to the default
    spec if this JAX build does not accept pipeline_mode.
    """
    idx = lambda *_: (0,) * len(shape)
    if single_buffer:
        try:
            return pl.BlockSpec(shape, idx, pipeline_mode=pl.Buffered(1))
        except Exception:  # pragma: no cover - construction-time fallback
            pass
    return pl.BlockSpec(shape, idx)


# ------------------- fused Q/K/V/Sigma projection -------------------------- #

def _qkv_sigma_kernel(x_ref, wq_ref, wk_ref, wv_ref, ws_ref,
                      q_ref, k_ref, v_ref, s_ref, *, n_splits, dk):
    x = x_ref[0].astype(jnp.bfloat16)                       # (tm, H)
    # Sigma: lane-dense padded output (no masked partial stores).
    s_ref[0] = jnp.dot(x, ws_ref[...], preferred_element_type=jnp.float32)
    # Q/K/V emitted head-major; per-head dots keep the live slab at (tm, dk)
    # and every store is a whole output block (no concat, no lane sub-slices).
    for h in range(n_splits):
        cols = slice(h * dk, (h + 1) * dk)                   # static slice
        q_ref[0, h] = jnp.dot(x, wq_ref[:, cols],
                              preferred_element_type=jnp.float32
                              ).astype(q_ref.dtype)
        k_ref[0, h] = jnp.dot(x, wk_ref[:, cols],
                              preferred_element_type=jnp.float32
                              ).astype(k_ref.dtype)
        v_ref[0, h] = jnp.dot(x, wv_ref[:, cols],
                              preferred_element_type=jnp.float32
                              ).astype(v_ref.dtype)


def qkv_sigma_proj(x, wq, wk, wv, ws_pad, *, n_splits, dk, tm, single_buffer):
    B, L, H = x.shape
    s_pad = ws_pad.shape[1]
    head_out = pl.BlockSpec((1, n_splits, tm, dk), lambda b, i: (b, 0, i, 0))
    kernel = partial(_qkv_sigma_kernel, n_splits=n_splits, dk=dk)
    return pl.pallas_call(
        kernel,
        grid=(B, L // tm),
        in_specs=[pl.BlockSpec((1, tm, H), lambda b, i: (b, i, 0)),
                  _resident_spec((H, H), single_buffer),
                  _resident_spec((H, H), single_buffer),
                  _resident_spec((H, H), single_buffer),
                  _resident_spec((H, s_pad), single_buffer)],
        out_specs=(head_out, head_out, head_out,
                   pl.BlockSpec((1, tm, s_pad), lambda b, i: (b, i, 0))),
        out_shape=(jax.ShapeDtypeStruct((B, n_splits, L, dk), jnp.bfloat16),
                   jax.ShapeDtypeStruct((B, n_splits, L, dk), jnp.bfloat16),
                   jax.ShapeDtypeStruct((B, n_splits, L, dk), jnp.bfloat16),
                   jax.ShapeDtypeStruct((B, L, s_pad), jnp.float32)),
        compiler_params=pltpu.CompilerParams(
            dimension_semantics=("parallel", "parallel")),
    )(x, wq, wk, wv, ws_pad)


# ----------------------- anomaly attention --------------------------------- #

def _anomaly_attention_kernel(sig_ref, q_ref, k_ref, v_ref,
                              prior_ref, series_ref, out_ref,
                              *, tq, kv_len, dk, s_pad):
    h = pl.program_id(1)            # head index (grid axis)
    q0 = pl.program_id(2) * tq      # query-tile row offset

    # ---- prior association: Gaussian kernel over |i-j| with per-row sigma.
    # The 1/(sqrt(2*pi)*sigma) prefactor cancels exactly in the row
    # normalisation, so it is dropped (mathematically identical).
    sig = sig_ref[0]                                           # (tq, s_pad) f32
    lane = lax.broadcasted_iota(jnp.int32, (tq, s_pad), 1)
    sig_h = jnp.sum(jnp.where(lane == h, sig, 0.0), axis=-1, keepdims=True)
    ri = lax.broadcasted_iota(jnp.int32, (tq, kv_len), 0) + q0
    ci = lax.broadcasted_iota(jnp.int32, (tq, kv_len), 1)
    d = (ri - ci).astype(jnp.float32)
    nd = -0.5 * d * d                                          # -|i-j|^2 / 2
    kw = jnp.exp(nd * pl.reciprocal(sig_h * sig_h))
    prior_ref[0, 0] = kw * pl.reciprocal(jnp.sum(kw, axis=-1, keepdims=True))

    # ---- series association: softmax(Q K^T / sqrt(dk)) over keys.
    # TODO(synk): optional attention-mask path (masked_fill -inf) not
    # implemented; the EncoderBlock is exercised with mask=None.
    qh = q_ref[0, 0]                                           # (tq, dk) bf16
    kh = k_ref[0, 0]                                           # (L,  dk) bf16
    s = lax.dot_general(qh, kh, (((1,), (1,)), ((), ())),
                        preferred_element_type=jnp.float32)
    s = s * (1.0 / math.sqrt(dk))
    e = jnp.exp(s - jnp.max(s, axis=-1, keepdims=True))
    series = e * pl.reciprocal(jnp.sum(e, axis=-1, keepdims=True))
    series_ref[0, 0] = series

    # ---- per-head context, stored directly (no concat, no extra liveness).
    out_ref[0, 0] = jnp.dot(series.astype(jnp.bfloat16), v_ref[0, 0],
                            preferred_element_type=jnp.float32
                            ).astype(out_ref.dtype)


def anomaly_attention(sig, q_hm, k_hm, v_hm, *, n_splits, dk, tq):
    B, _, L, _ = q_hm.shape
    s_pad = sig.shape[-1]
    kernel = partial(_anomaly_attention_kernel,
                     tq=tq, kv_len=L, dk=dk, s_pad=s_pad)
    return pl.pallas_call(
        kernel,
        grid=(B, n_splits, L // tq),
        in_specs=[
            pl.BlockSpec((1, tq, s_pad), lambda b, h, qi: (b, qi, 0)),
            pl.BlockSpec((1, 1, tq, dk), lambda b, h, qi: (b, h, qi, 0)),
            pl.BlockSpec((1, 1, L, dk), lambda b, h, qi: (b, h, 0, 0)),
            pl.BlockSpec((1, 1, L, dk), lambda b, h, qi: (b, h, 0, 0)),
        ],
        out_specs=(
            pl.BlockSpec((1, 1, tq, L), lambda b, h, qi: (h, b, qi, 0)),
            pl.BlockSpec((1, 1, tq, L), lambda b, h, qi: (h, b, qi, 0)),
            pl.BlockSpec((1, 1, tq, dk), lambda b, h, qi: (b, h, qi, 0)),
        ),
        out_shape=(
            jax.ShapeDtypeStruct((n_splits, B, L, L), jnp.float32),
            jax.ShapeDtypeStruct((n_splits, B, L, L), jnp.float32),
            jax.ShapeDtypeStruct((B, n_splits, L, dk), jnp.bfloat16),
        ),
        compiler_params=pltpu.CompilerParams(
            dimension_semantics=("parallel", "parallel", "parallel")),
    )(sig, q_hm, k_hm, v_hm)


# ---- fused: w_o proj + residual + LN1 + FFN (4H-tiled) + residual + LN2 ---- #

def _dense_block_kernel(attn_ref, wo_ref, x_ref, ln1g_ref, ln1b_ref,
                        fw1_ref, fb1_ref, fw2_ref, fb2_ref,
                        ln2g_ref, ln2b_ref, o_ref, *, n_splits, dk, tk4):
    h4 = fb1_ref.shape[1]

    # output projection: cat(heads, -1) @ w_o  ==  sum_h head_h @ w_o[h*dk:...]
    proj = jnp.dot(attn_ref[0, 0], wo_ref[0:dk, :],
                   preferred_element_type=jnp.float32)
    for h in range(1, n_splits):
        rows = slice(h * dk, (h + 1) * dk)                    # static slice
        proj = proj + jnp.dot(attn_ref[0, h], wo_ref[rows, :],
                              preferred_element_type=jnp.float32)

    # residual + LayerNorm 1 (attn_dropout is identity in eval).
    r1 = proj + x_ref[0]
    mu1 = jnp.mean(r1, axis=-1, keepdims=True)
    var1 = jnp.mean(jnp.square(r1 - mu1), axis=-1, keepdims=True)
    z = (r1 - mu1) * lax.rsqrt(var1 + _LN_EPS) * ln1g_ref[...] + ln1b_ref[...]

    # FFN tiled over the 4H axis: never materialise a (tm, 4H) intermediate.
    zb = z.astype(jnp.bfloat16)

    def ffn_block(kb):
        cols = slice(kb * tk4, (kb + 1) * tk4)                # static slice
        hblk = jnp.dot(zb, fw1_ref[:, cols],
                       preferred_element_type=jnp.float32) + fb1_ref[:, cols]
        hblk = jnp.maximum(hblk, 0.0)          # ReLU (use_leaky_relu=False)
        return jnp.dot(hblk.astype(jnp.bfloat16), fw2_ref[cols, :],
                       preferred_element_type=jnp.float32)

    acc = ffn_block(0)
    for kb in range(1, h4 // tk4):
        acc = acc + ffn_block(kb)

    # residual + LayerNorm 2 (fc_dropout is identity in eval).
    r2 = acc + fb2_ref[...] + z
    mu2 = jnp.mean(r2, axis=-1, keepdims=True)
    var2 = jnp.mean(jnp.square(r2 - mu2), axis=-1, keepdims=True)
    o_ref[0] = (r2 - mu2) * lax.rsqrt(var2 + _LN_EPS) * ln2g_ref[...] + ln2b_ref[...]


def out_ffn_fused(attn_hm, wo, x, ln1_g, ln1_b, w1, b1, w2, b2, ln2_g, ln2_b,
                  *, n_splits, dk, tm, tk4, single_buffer):
    B, L, H = x.shape
    H4 = w1.shape[1]
    row = pl.BlockSpec((1, tm, H), lambda b, i: (b, i, 0))
    kernel = partial(_dense_block_kernel, n_splits=n_splits, dk=dk, tk4=tk4)
    return pl.pallas_call(
        kernel,
        grid=(B, L // tm),
        in_specs=[pl.BlockSpec((1, n_splits, tm, dk), lambda b, i: (b, 0, i, 0)),
                  _resident_spec((H, H), single_buffer),
                  row,
                  _resident_spec((1, H), single_buffer),
                  _resident_spec((1, H), single_buffer),
                  _resident_spec((H, H4), single_buffer),
                  _resident_spec((1, H4), single_buffer),
                  _resident_spec((H4, H), single_buffer),
                  _resident_spec((1, H), single_buffer),
                  _resident_spec((1, H), single_buffer),
                  _resident_spec((1, H), single_buffer)],
        out_specs=row,
        out_shape=jax.ShapeDtypeStruct((B, L, H), jnp.float32),
        compiler_params=pltpu.CompilerParams(
            dimension_semantics=("parallel", "parallel")),
    )(attn_hm, wo, x, ln1_g.reshape(1, H), ln1_b.reshape(1, H),
      w1, b1.reshape(1, H4), w2, b2.reshape(1, H),
      ln2_g.reshape(1, H), ln2_b.reshape(1, H))


# --------------------------- forward wrapper -------------------------------- #

def encoder_block_forward(x, params, n_splits, single_buffer_weights=True):
    B, L, H = x.shape
    assert H % n_splits == 0
    dk = H // n_splits
    s_pad = max(128, ((n_splits + 127) // 128) * 128)   # lane-dense sigma slab

    bf16 = jnp.bfloat16
    wq = params["w_q"].astype(bf16)
    wk = params["w_k"].astype(bf16)
    wv = params["w_v"].astype(bf16)
    wo = params["w_o"].astype(bf16)
    w1 = params["w_fc1"].astype(bf16)
    w2 = params["w_fc2"].astype(bf16)
    ws_pad = jnp.zeros((H, s_pad), bf16).at[:, :n_splits].set(
        params["w_sigma"].astype(bf16))

    # Row tiles: biggest divisor from the candidate list, preferring >=2 grid
    # steps so pipelining / megacore sharding stay effective.
    # TODO(synk): make candidates generation-dependent (tq up to 256 on
    # v5e/v6e's 128 MiB VMEM, <=128 on v7x) and raise vmem_limit_bytes when
    # the larger tiles are selected.
    tm = _pick_tile(L, (256, 128, 64, 32, 16, 8), min_steps=2)
    tq = _pick_tile(L, (128, 64, 32, 16, 8), min_steps=2)
    tk4 = _pick_tile(4 * H, (512, 256, 128), min_steps=2)

    q_hm, k_hm, v_hm, sig = qkv_sigma_proj(
        x, wq, wk, wv, ws_pad, n_splits=n_splits, dk=dk, tm=tm,
        single_buffer=single_buffer_weights)

    prior4, series4, attn_hm = anomaly_attention(
        sig, q_hm, k_hm, v_hm, n_splits=n_splits, dk=dk, tq=tq)

    # (n_splits, B, L, L) -> (n_splits*B, L, L): contiguous, free reshape,
    # matches torch split(dim=-1) + cat(dim=0) head ordering.
    prior = prior4.reshape(n_splits * B, L, L)
    series = series4.reshape(n_splits * B, L, L)

    enc = out_ffn_fused(
        attn_hm, wo, x, params["ln1_g"], params["ln1_b"],
        w1, params["b_fc1"], w2, params["b_fc2"],
        params["ln2_g"], params["ln2_b"],
        n_splits=n_splits, dk=dk, tm=tm, tk4=tk4,
        single_buffer=single_buffer_weights)
    return prior, series, enc


def init_params(key, hidden_size, n_splits):
    ks = jax.random.split(key, 7)
    scale = 1.0 / math.sqrt(hidden_size)
    return {
        # MultiHead linears: bias=False (matches the PyTorch module)
        "w_sigma": jax.random.normal(ks[0], (hidden_size, n_splits),
                                     jnp.float32) * scale,
        "w_q": jax.random.normal(ks[1], (hidden_size, hidden_size),
                                 jnp.float32) * scale,
        "w_k": jax.random.normal(ks[2], (hidden_size, hidden_size),
                                 jnp.float32) * scale,
        "w_v": jax.random.normal(ks[3], (hidden_size, hidden_size),
                                 jnp.float32) * scale,
        "w_o": jax.random.normal(ks[4], (hidden_size, hidden_size),
                                 jnp.float32) * scale,
        # fc Sequential Linears: bias=True (PyTorch default)
        "w_fc1": jax.random.normal(ks[5], (hidden_size, 4 * hidden_size),
                                   jnp.float32) * scale,
        "b_fc1": jnp.zeros((4 * hidden_size,), jnp.float32),
        "w_fc2": jax.random.normal(ks[6], (4 * hidden_size, hidden_size),
                                   jnp.float32) * (scale * 0.5),
        "b_fc2": jnp.zeros((hidden_size,), jnp.float32),
        "ln1_g": jnp.ones((hidden_size,), jnp.float32),
        "ln1_b": jnp.zeros((hidden_size,), jnp.float32),
        "ln2_g": jnp.ones((hidden_size,), jnp.float32),
        "ln2_b": jnp.zeros((hidden_size,), jnp.float32),
    }


if __name__ == "__main__":
    B, L, H, n_splits = 2, 8, 32, 4
    key = jax.random.PRNGKey(0)
    k_x, k_p = jax.random.split(key)
    x = jax.random.normal(k_x, (B, L, H), jnp.float32)
    params = init_params(k_p, H, n_splits)

    try:
        fwd = jax.jit(partial(encoder_block_forward, n_splits=n_splits,
                              single_buffer_weights=True))
        prior, series, enc = fwd(x, params)
        jax.block_until_ready((prior, series, enc))
    except Exception:
        # Fallback: this JAX build rejected single-buffered weight BlockSpecs;
        # rerun with default double-buffering (functionally identical).
        fwd = jax.jit(partial(encoder_block_forward, n_splits=n_splits,
                              single_buffer_weights=False))
        prior, series, enc = fwd(x, params)
        jax.block_until_ready((prior, series, enc))

    assert prior.shape == (n_splits * B, L, L)
    assert series.shape == (n_splits * B, L, L)
    assert enc.shape == (B, L, H)
    assert bool(jnp.isfinite(prior).all())
    assert bool(jnp.isfinite(series).all())
    assert bool(jnp.isfinite(enc).all())
    print("KERNEL_OK")
</pallas_src>

<mosaic_0001>
module attributes {stable_mosaic.version = 11 : i64} {
  func.func @_qkv_sigma_kernel(%arg0: i32, %arg1: i32, %arg2: memref<1x8x32xf32, #tpu.memory_space<vmem>>, %arg3: memref<32x32xbf16, #tpu.memory_space<vmem>>, %arg4: memref<32x32xbf16, #tpu.memory_space<vmem>>, %arg5: memref<32x32xbf16, #tpu.memory_space<vmem>>, %arg6: memref<32x128xbf16, #tpu.memory_space<vmem>>, %arg7: memref<1x4x8x8xbf16, #tpu.memory_space<vmem>>, %arg8: memref<1x4x8x8xbf16, #tpu.memory_space<vmem>>, %arg9: memref<1x4x8x8xbf16, #tpu.memory_space<vmem>>, %arg10: memref<1x8x128xf32, #tpu.memory_space<vmem>>) attributes {dimension_semantics = [#tpu.dimension_semantics<parallel>, #tpu.dimension_semantics<parallel>], iteration_bounds = array<i64: 2, 1>, scalar_prefetch = 0 : i64, scratch_operands = 0 : i64, tpu.core_type = #tpu.core_type<tc>, window_params = [{transform_indices = @transform_0, window_bounds = array<i64: 1, 8, 32>}, {pipeline_mode = #tpu.pipeline_mode<synchronous>, transform_indices = @transform_1, window_bounds = array<i64: 32, 32>}, {pipeline_mode = #tpu.pipeline_mode<synchronous>, transform_indices = @transform_2, window_bounds = array<i64: 32, 32>}, {pipeline_mode = #tpu.pipeline_mode<synchronous>, transform_indices = @transform_3, window_bounds = array<i64: 32, 32>}, {pipeline_mode = #tpu.pipeline_mode<synchronous>, transform_indices = @transform_4, window_bounds = array<i64: 32, 128>}, {transform_indices = @transform_5, window_bounds = array<i64: 1, 4, 8, 8>}, {transform_indices = @transform_6, window_bounds = array<i64: 1, 4, 8, 8>}, {transform_indices = @transform_7, window_bounds = array<i64: 1, 4, 8, 8>}, {transform_indices = @transform_8, window_bounds = array<i64: 1, 8, 128>}]} {
    %c0 = arith.constant 0 : index
    %c0_0 = arith.constant 0 : index
    %c0_1 = arith.constant 0 : index
    %0 = vector.load %arg2[%c0, %c0_0, %c0_1] : memref<1x8x32xf32, #tpu.memory_space<vmem>>, vector<1x8x32xf32>
    %1 = vector.shape_cast %0 : vector<1x8x32xf32> to vector<8x32xf32>
    %2 = arith.truncf %1 : vector<8x32xf32> to vector<8x32xbf16>
    %c0_2 = arith.constant 0 : index
    %c0_3 = arith.constant 0 : index
    %3 = vector.load %arg6[%c0_2, %c0_3] : memref<32x128xbf16, #tpu.memory_space<vmem>>, vector<32x128xbf16>
    %cst = arith.constant dense<0.000000e+00> : vector<8x128xf32>
    %4 = tpu.matmul %2, %3, %cst {dimension_numbers = #tpu.dot_dimension_numbers<[1], [0], [0], [1], [0, 0, 1, 1], [], []>} : vector<8x32xbf16>, vector<32x128xbf16>, vector<8x128xf32> -> vector<8x128xf32>
    %c0_4 = arith.constant 0 : index
    %c0_5 = arith.constant 0 : index
    %c0_6 = arith.constant 0 : index
    %5 = vector.load %arg10[%c0_4, %c0_5, %c0_6] : memref<1x8x128xf32, #tpu.memory_space<vmem>>, vector<1x8x128xf32>
    %6 = vector.shape_cast %5 : vector<1x8x128xf32> to vector<8x128xf32>
    %7 = vector.shape_cast %4 : vector<8x128xf32> to vector<1x8x128xf32>
    tpu.vector_store %arg10[%c0_4, %c0_5, %c0_6], %7 {strides = array<i32>} : memref<1x8x128xf32, #tpu.memory_space<vmem>>, vector<1x8x128xf32>,
    %c0_7 = arith.constant 0 : index
    %c0_8 = arith.constant 0 : index
    %8 = vector.load %arg3[%c0_7, %c0_8] : memref<32x32xbf16, #tpu.memory_space<vmem>>, vector<32x8xbf16>
    %cst_9 = arith.constant dense<0.000000e+00> : vector<8x8xf32>
    %9 = tpu.matmul %2, %8, %cst_9 {dimension_numbers = #tpu.dot_dimension_numbers<[1], [0], [0], [1], [0, 0, 1, 1], [], []>} : vector<8x32xbf16>, vector<32x8xbf16>, vector<8x8xf32> -> vector<8x8xf32>
    %10 = arith.truncf %9 : vector<8x8xf32> to vector<8x8xbf16>
    %c0_10 = arith.constant 0 : index
    %c0_11 = arith.constant 0 : index
    %c0_12 = arith.constant 0 : index
    %c0_13 = arith.constant 0 : index
    %11 = vector.load %arg7[%c0_10, %c0_11, %c0_12, %c0_13] : memref<1x4x8x8xbf16, #tpu.memory_space<vmem>>, vector<1x1x8x8xbf16>
    %12 = vector.shape_cast %11 : vector<1x1x8x8xbf16> to vector<8x8xbf16>
    %13 = vector.shape_cast %10 : vector<8x8xbf16> to vector<1x1x8x8xbf16>
    tpu.vector_store %arg7[%c0_10, %c0_11, %c0_12, %c0_13], %13 {strides = array<i32>} : memref<1x4x8x8xbf16, #tpu.memory_space<vmem>>, vector<1x1x8x8xbf16>,
    %c0_14 = arith.constant 0 : index
    %c0_15 = arith.constant 0 : index
    %14 = vector.load %arg4[%c0_14, %c0_15] : memref<32x32xbf16, #tpu.memory_space<vmem>>, vector<32x8xbf16>
    %cst_16 = arith.constant dense<0.000000e+00> : vector<8x8xf32>
    %15 = tpu.matmul %2, %14, %cst_16 {dimension_numbers = #tpu.dot_dimension_numbers<[1], [0], [0], [1], [0, 0, 1, 1], [], []>} : vector<8x32xbf16>, vector<32x8xbf16>, vector<8x8xf32> -> vector<8x8xf32>
    %16 = arith.truncf %15 : vector<8x8xf32> to vector<8x8xbf16>
    %c0_17 = arith.constant 0 : index
    %c0_18 = arith.constant 0 : index
    %c0_19 = arith.constant 0 : index
    %c0_20 = arith.constant 0 : index
    %17 = vector.load %arg8[%c0_17, %c0_18, %c0_19, %c0_20] : memref<1x4x8x8xbf16, #tpu.memory_space<vmem>>, vector<1x1x8x8xbf16>
    %18 = vector.shape_cast %17 : vector<1x1x8x8xbf16> to vector<8x8xbf16>
    %19 = vector.shape_cast %16 : vector<8x8xbf16> to vector<1x1x8x8xbf16>
    tpu.vector_store %arg8[%c0_17, %c0_18, %c0_19, %c0_20], %19 {strides = array<i32>} : memref<1x4x8x8xbf16, #tpu.memory_space<vmem>>, vector<1x1x8x8xbf16>,
    %c0_21 = arith.constant 0 : index
    %c0_22 = arith.constant 0 : index
    %20 = vector.load %arg5[%c0_21, %c0_22] : memref<32x32xbf16, #tpu.memory_space<vmem>>, vector<32x8xbf16>
    %cst_23 = arith.constant dense<0.000000e+00> : vector<8x8xf32>
    %21 = tpu.matmul %2, %20, %cst_23 {dimension_numbers = #tpu.dot_dimension_numbers<[1], [0], [0], [1], [0, 0, 1, 1], [], []>} : vector<8x32xbf16>, vector<32x8xbf16>, vector<8x8xf32> -> vector<8x8xf32>
    %22 = arith.truncf %21 : vector<8x8xf32> to vector<8x8xbf16>
    %c0_24 = arith.constant 0 : index
    %c0_25 = arith.constant 0 : index
    %c0_26 = arith.constant 0 : index
    %c0_27 = arith.constant 0 : index
    %23 = vector.load %arg9[%c0_24, %c0_25, %c0_26, %c0_27] : memref<1x4x8x8xbf16, #tpu.memory_space<vmem>>, vector<1x1x8x8xbf16>
    %24 = vector.shape_cast %23 : vector<1x1x8x8xbf16> to vector<8x8xbf16>
    %25 = vector.shape_cast %22 : vector<8x8xbf16> to vector<1x1x8x8xbf16>
    tpu.vector_store %arg9[%c0_24, %c0_25, %c0_26, %c0_27], %25 {strides = array<i32>} : memref<1x4x8x8xbf16, #tpu.memory_space<vmem>>, vector<1x1x8x8xbf16>,
    %c0_28 = arith.constant 0 : index
    %c8 = arith.constant 8 : index
    %26 = vector.load %arg3[%c0_28, %c8] : memref<32x32xbf16, #tpu.memory_space<vmem>>, vector<32x8xbf16>
    %cst_29 = arith.constant dense<0.000000e+00> : vector<8x8xf32>
    %27 = tpu.matmul %2, %26, %cst_29 {dimension_numbers = #tpu.dot_dimension_numbers<[1], [0], [0], [1], [0, 0, 1, 1], [], []>} : vector<8x32xbf16>, vector<32x8xbf16>, vector<8x8xf32> -> vector<8x8xf32>
    %28 = arith.truncf %27 : vector<8x8xf32> to vector<8x8xbf16>
    %c0_30 = arith.constant 0 : index
    %c1 = arith.constant 1 : index
    %c0_31 = arith.constant 0 : index
    %c0_32 = arith.constant 0 : index
    %29 = vector.load %arg7[%c0_30, %c1, %c0_31, %c0_32] : memref<1x4x8x8xbf16, #tpu.memory_space<vmem>>, vector<1x1x8x8xbf16>
    %30 = vector.shape_cast %29 : vector<1x1x8x8xbf16> to vector<8x8xbf16>
    %31 = vector.shape_cast %28 : vector<8x8xbf16> to vector<1x1x8x8xbf16>
    tpu.vector_store %arg7[%c0_30, %c1, %c0_31, %c0_32], %31 {strides = array<i32>} : memref<1x4x8x8xbf16, #tpu.memory_space<vmem>>, vector<1x1x8x8xbf16>,
    %c0_33 = arith.constant 0 : index
    %c8_34 = arith.constant 8 : index
    %32 = vector.load %arg4[%c0_33, %c8_34] : memref<32x32xbf16, #tpu.memory_space<vmem>>, vector<32x8xbf16>
    %cst_35 = arith.constant dense<0.000000e+00> : vector<8x8xf32>
    %33 = tpu.matmul %2, %32, %cst_35 {dimension_numbers = #tpu.dot_dimension_numbers<[1], [0], [0], [1], [0, 0, 1, 1], [], []>} : vector<8x32xbf16>, vector<32x8xbf16>, vector<8x8xf32> -> vector<8x8xf32>
    %34 = arith.truncf %33 : vector<8x8xf32> to vector<8x8xbf16>
    %c0_36 = arith.constant 0 : index
    %c1_37 = arith.constant 1 : index
    %c0_38 = arith.constant 0 : index
    %c0_39 = arith.constant 0 : index
    %35 = vector.load %arg8[%c0_36, %c1_37, %c0_38, %c0_39] : memref<1x4x8x8xbf16, #tpu.memory_space<vmem>>, vector<1x1x8x8xbf16>
    %36 = vector.shape_cast %35 : vector<1x1x8x8xbf16> to vector<8x8xbf16>
    %37 = vector.shape_cast %34 : vector<8x8xbf16> to vector<1x1x8x8xbf16>
    tpu.vector_store %arg8[%c0_36, %c1_37, %c0_38, %c0_39], %37 {strides = array<i32>} : memref<1x4x8x8xbf16, #tpu.memory_space<vmem>>, vector<1x1x8x8xbf16>,
    %c0_40 = arith.constant 0 : index
    %c8_41 = arith.constant 8 : index
    %38 = vector.load %arg5[%c0_40, %c8_41] : memref<32x32xbf16, #tpu.memory_space<vmem>>, vector<32x8xbf16>
    %cst_42 = arith.constant dense<0.000000e+00> : vector<8x8xf32>
    %39 = tpu.matmul %2, %38, %cst_42 {dimension_numbers = #tpu.dot_dimension_numbers<[1], [0], [0], [1], [0, 0, 1, 1], [], []>} : vector<8x32xbf16>, vector<32x8xbf16>, vector<8x8xf32> -> vector<8x8xf32>
    %40 = arith.truncf %39 : vector<8x8xf32> to vector<8x8xbf16>
    %c0_43 = arith.constant 0 : index
    %c1_44 = arith.constant 1 : index
    %c0_45 = arith.constant 0 : index
    %c0_46 = arith.constant 0 : index
    %41 = vector.load %arg9[%c0_43, %c1_44, %c0_45, %c0_46] : memref<1x4x8x8xbf16, #tpu.memory_space<vmem>>, vector<1x1x8x8xbf16>
    %42 = vector.shape_cast %41 : vector<1x1x8x8xbf16> to vector<8x8xbf16>
    %43 = vector.shape_cast %40 : vector<8x8xbf16> to vector<1x1x8x8xbf16>
    tpu.vector_store %arg9[%c0_43, %c1_44, %c0_45, %c0_46], %43 {strides = array<i32>} : memref<1x4x8x8xbf16, #tpu.memory_space<vmem>>, vector<1x1x8x8xbf16>,
    %c0_47 = arith.constant 0 : index
    %c16 = arith.constant 16 : index
    %44 = vector.load %arg3[%c0_47, %c16] : memref<32x32xbf16, #tpu.memory_space<vmem>>, vector<32x8xbf16>
    %cst_48 = arith.constant dense<0.000000e+00> : vector<8x8xf32>
    %45 = tpu.matmul %2, %44, %cst_48 {dimension_numbers = #tpu.dot_dimension_numbers<[1], [0], [0], [1], [0, 0, 1, 1], [], []>} : vector<8x32xbf16>, vector<32x8xbf16>, vector<8x8xf32> -> vector<8x8xf32>
    %46 = arith.truncf %45 : vector<8x8xf32> to vector<8x8xbf16>
    %c0_49 = arith.constant 0 : index
    %c2 = arith.constant 2 : index
    %c0_50 = arith.constant 0 : index
    %c0_51 = arith.constant 0 : index
    %47 = vector.load %arg7[%c0_49, %c2, %c0_50, %c0_51] : memref<1x4x8x8xbf16, #tpu.memory_space<vmem>>, vector<1x1x8x8xbf16>
    %48 = vector.shape_cast %47 : vector<1x1x8x8xbf16> to vector<8x8xbf16>
    %49 = vector.shape_cast %46 : vector<8x8xbf16> to vector<1x1x8x8xbf16>
    tpu.vector_store %arg7[%c0_49, %c2, %c0_50, %c0_51], %49 {strides = array<i32>} : memref<1x4x8x8xbf16, #tpu.memory_space<vmem>>, vector<1x1x8x8xbf16>,
    %c0_52 = arith.constant 0 : index
    %c16_53 = arith.constant 16 : index
    %50 = vector.load %arg4[%c0_52, %c16_53] : memref<32x32xbf16, #tpu.memory_space<vmem>>, vector<32x8xbf16>
    %cst_54 = arith.constant dense<0.000000e+00> : vector<8x8xf32>
    %51 = tpu.matmul %2, %50, %cst_54 {dimension_numbers = #tpu.dot_dimension_numbers<[1], [0], [0], [1], [0, 0, 1, 1], [], []>} : vector<8x32xbf16>, vector<32x8xbf16>, vector<8x8xf32> -> vector<8x8xf32>
    %52 = arith.truncf %51 : vector<8x8xf32> to vector<8x8xbf16>
    %c0_55 = arith.constant 0 : index
    %c2_56 = arith.constant 2 : index
    %c0_57 = arith.constant 0 : index
    %c0_58 = arith.constant 0 : index
    %53 = vector.load %arg8[%c0_55, %c2_56, %c0_57, %c0_58] : memref<1x4x8x8xbf16, #tpu.memory_space<vmem>>, vector<1x1x8x8xbf16>
    %54 = vector.shape_cast %53 : vector<1x1x8x8xbf16> to vector<8x8xbf16>
    %55 = vector.shape_cast %52 : vector<8x8xbf16> to vector<1x1x8x8xbf16>
    tpu.vector_store %arg8[%c0_55, %c2_56, %c0_57, %c0_58], %55 {strides = array<i32>} : memref<1x4x8x8xbf16, #tpu.memory_space<vmem>>, vector<1x1x8x8xbf16>,
    %c0_59 = arith.constant 0 : index
    %c16_60 = arith.constant 16 : index
    %56 = vector.load %arg5[%c0_59, %c16_60] : memref<32x32xbf16, #tpu.memory_space<vmem>>, vector<32x8xbf16>
    %cst_61 = arith.constant dense<0.000000e+00> : vector<8x8xf32>
    %57 = tpu.matmul %2, %56, %cst_61 {dimension_numbers = #tpu.dot_dimension_numbers<[1], [0], [0], [1], [0, 0, 1, 1], [], []>} : vector<8x32xbf16>, vector<32x8xbf16>, vector<8x8xf32> -> vector<8x8xf32>
    %58 = arith.truncf %57 : vector<8x8xf32> to vector<8x8xbf16>
    %c0_62 = arith.constant 0 : index
    %c2_63 = arith.constant 2 : index
    %c0_64 = arith.constant 0 : index
    %c0_65 = arith.constant 0 : index
    %59 = vector.load %arg9[%c0_62, %c2_63, %c0_64, %c0_65] : memref<1x4x8x8xbf16, #tpu.memory_space<vmem>>, vector<1x1x8x8xbf16>
    %60 = vector.shape_cast %59 : vector<1x1x8x8xbf16> to vector<8x8xbf16>
    %61 = vector.shape_cast %58 : vector<8x8xbf16> to vector<1x1x8x8xbf16>
    tpu.vector_store %arg9[%c0_62, %c2_63, %c0_64, %c0_65], %61 {strides = array<i32>} : memref<1x4x8x8xbf16, #tpu.memory_space<vmem>>, vector<1x1x8x8xbf16>,
    %c0_66 = arith.constant 0 : index
    %c24 = arith.constant 24 : index
    %62 = vector.load %arg3[%c0_66, %c24] : memref<32x32xbf16, #tpu.memory_space<vmem>>, vector<32x8xbf16>
    %cst_67 = arith.constant dense<0.000000e+00> : vector<8x8xf32>
    %63 = tpu.matmul %2, %62, %cst_67 {dimension_numbers = #tpu.dot_dimension_numbers<[1], [0], [0], [1], [0, 0, 1, 1], [], []>} : vector<8x32xbf16>, vector<32x8xbf16>, vector<8x8xf32> -> vector<8x8xf32>
    %64 = arith.truncf %63 : vector<8x8xf32> to vector<8x8xbf16>
    %c0_68 = arith.constant 0 : index
    %c3 = arith.constant 3 : index
    %c0_69 = arith.constant 0 : index
    %c0_70 = arith.constant 0 : index
    %65 = vector.load %arg7[%c0_68, %c3, %c0_69, %c0_70] : memref<1x4x8x8xbf16, #tpu.memory_space<vmem>>, vector<1x1x8x8xbf16>
    %66 = vector.shape_cast %65 : vector<1x1x8x8xbf16> to vector<8x8xbf16>
    %67 = vector.shape_cast %64 : vector<8x8xbf16> to vector<1x1x8x8xbf16>
    tpu.vector_store %arg7[%c0_68, %c3, %c0_69, %c0_70], %67 {strides = array<i32>} : memref<1x4x8x8xbf16, #tpu.memory_space<vmem>>, vector<1x1x8x8xbf16>,
    %c0_71 = arith.constant 0 : index
    %c24_72 = arith.constant 24 : index
    %68 = vector.load %arg4[%c0_71, %c24_72] : memref<32x32xbf16, #tpu.memory_space<vmem>>, vector<32x8xbf16>
    %cst_73 = arith.constant dense<0.000000e+00> : vector<8x8xf32>
    %69 = tpu.matmul %2, %68, %cst_73 {dimension_numbers = #tpu.dot_dimension_numbers<[1], [0], [0], [1], [0, 0, 1, 1], [], []>} : vector<8x32xbf16>, vector<32x8xbf16>, vector<8x8xf32> -> vector<8x8xf32>
    %70 = arith.truncf %69 : vector<8x8xf32> to vector<8x8xbf16>
    %c0_74 = arith.constant 0 : index
    %c3_75 = arith.constant 3 : index
    %c0_76 = arith.constant 0 : index
    %c0_77 = arith.constant 0 : index
    %71 = vector.load %arg8[%c0_74, %c3_75, %c0_76, %c0_77] : memref<1x4x8x8xbf16, #tpu.memory_space<vmem>>, vector<1x1x8x8xbf16>
    %72 = vector.shape_cast %71 : vector<1x1x8x8xbf16> to vector<8x8xbf16>
    %73 = vector.shape_cast %70 : vector<8x8xbf16> to vector<1x1x8x8xbf16>
    tpu.vector_store %arg8[%c0_74, %c3_75, %c0_76, %c0_77], %73 {strides = array<i32>} : memref<1x4x8x8xbf16, #tpu.memory_space<vmem>>, vector<1x1x8x8xbf16>,
    %c0_78 = arith.constant 0 : index
    %c24_79 = arith.constant 24 : index
    %74 = vector.load %arg5[%c0_78, %c24_79] : memref<32x32xbf16, #tpu.memory_space<vmem>>, vector<32x8xbf16>
    %cst_80 = arith.constant dense<0.000000e+00> : vector<8x8xf32>
    %75 = tpu.matmul %2, %74, %cst_80 {dimension_numbers = #tpu.dot_dimension_numbers<[1], [0], [0], [1], [0, 0, 1, 1], [], []>} : vector<8x32xbf16>, vector<32x8xbf16>, vector<8x8xf32> -> vector<8x8xf32>
    %76 = arith.truncf %75 : vector<8x8xf32> to vector<8x8xbf16>
    %c0_81 = arith.constant 0 : index
    %c3_82 = arith.constant 3 : index
    %c0_83 = arith.constant 0 : index
    %c0_84 = arith.constant 0 : index
    %77 = vector.load %arg9[%c0_81, %c3_82, %c0_83, %c0_84] : memref<1x4x8x8xbf16, #tpu.memory_space<vmem>>, vector<1x1x8x8xbf16>
    %78 = vector.shape_cast %77 : vector<1x1x8x8xbf16> to vector<8x8xbf16>
    %79 = vector.shape_cast %76 : vector<8x8xbf16> to vector<1x1x8x8xbf16>
    tpu.vector_store %arg9[%c0_81, %c3_82, %c0_83, %c0_84], %79 {strides = array<i32>} : memref<1x4x8x8xbf16, #tpu.memory_space<vmem>>, vector<1x1x8x8xbf16>,
    return
  }
  func.func @transform_0(%arg0: i32, %arg1: i32) -> (i32, i32, i32) {
    %c0_i32 = arith.constant 0 : i32
    %c0_i32_0 = arith.constant 0 : i32
    return %arg0, %arg1, %c0_i32 : i32, i32, i32
  }
  func.func @transform_1(%arg0: i32, %arg1: i32) -> (i32, i32) {
    %c0_i32 = arith.constant 0 : i32
    %c0_i32_0 = arith.constant 0 : i32
    %c0_i32_1 = arith.constant 0 : i32
    return %c0_i32, %c0_i32_0 : i32, i32
  }
  func.func @transform_2(%arg0: i32, %arg1: i32) -> (i32, i32) {
    %c0_i32 = arith.constant 0 : i32
    %c0_i32_0 = arith.constant 0 : i32
    %c0_i32_1 = arith.constant 0 : i32
    return %c0_i32, %c0_i32_0 : i32, i32
  }
  func.func @transform_3(%arg0: i32, %arg1: i32) -> (i32, i32) {
    %c0_i32 = arith.constant 0 : i32
    %c0_i32_0 = arith.constant 0 : i32
    %c0_i32_1 = arith.constant 0 : i32
    return %c0_i32, %c0_i32_0 : i32, i32
  }
  func.func @transform_4(%arg0: i32, %arg1: i32) -> (i32, i32) {
    %c0_i32 = arith.constant 0 : i32
    %c0_i32_0 = arith.constant 0 : i32
    %c0_i32_1 = arith.constant 0 : i32
    return %c0_i32, %c0_i32_0 : i32, i32
  }
  func.func @transform_5(%arg0: i32, %arg1: i32) -> (i32, i32, i32, i32) {
    %c0_i32 = arith.constant 0 : i32
    %c0_i32_0 = arith.constant 0 : i32
    %c0_i32_1 = arith.constant 0 : i32
    return %arg0, %c0_i32, %arg1, %c0_i32_0 : i32, i32, i32, i32
  }
  func.func @transform_6(%arg0: i32, %arg1: i32) -> (i32, i32, i32, i32) {
    %c0_i32 = arith.constant 0 : i32
    %c0_i32_0 = arith.constant 0 : i32
    %c0_i32_1 = arith.constant 0 : i32
    return %arg0, %c0_i32, %arg1, %c0_i32_0 : i32, i32, i32, i32
  }
  func.func @transform_7(%arg0: i32, %arg1: i32) -> (i32, i32, i32, i32) {
    %c0_i32 = arith.constant 0 : i32
    %c0_i32_0 = arith.constant 0 : i32
    %c0_i32_1 = arith.constant 0 : i32
    return %arg0, %c0_i32, %arg1, %c0_i32_0 : i32, i32, i32, i32
  }
  func.func @transform_8(%arg0: i32, %arg1: i32) -> (i32, i32, i32) {
    %c0_i32 = arith.constant 0 : i32
    %c0_i32_0 = arith.constant 0 : i32
    return %arg0, %arg1, %c0_i32 : i32, i32, i32
  }
}

module attributes {stable_mosaic.version = 11 : i64} {
  func.func @_anomaly_attention_kernel(%arg0: i32, %arg1: i32, %arg2: i32, %arg3: memref<1x8x128xf32, #tpu.memory_space<vmem>>, %arg4: memref<1x1x8x8xbf16, #tpu.memory_space<vmem>>, %arg5: memref<1x1x8x8xbf16, #tpu.memory_space<vmem>>, %arg6: memref<1x1x8x8xbf16, #tpu.memory_space<vmem>>, %arg7: memref<1x1x8x8xf32, #tpu.memory_space<vmem>>, %arg8: memref<1x1x8x8xf32, #tpu.memory_space<vmem>>, %arg9: memref<1x1x8x8xbf16, #tpu.memory_space<vmem>>) attributes {dimension_semantics = [#tpu.dimension_semantics<parallel>, #tpu.dimension_semantics<parallel>, #tpu.dimension_semantics<parallel>], iteration_bounds = array<i64: 2, 4, 1>, scalar_prefetch = 0 : i64, scratch_operands = 0 : i64, tpu.core_type = #tpu.core_type<tc>, window_params = [{transform_indices = @transform_0, window_bounds = array<i64: 1, 8, 128>}, {transform_indices = @transform_1, window_bounds = array<i64: 1, 1, 8, 8>}, {transform_indices = @transform_2, window_bounds = array<i64: 1, 1, 8, 8>}, {transform_indices = @transform_3, window_bounds = array<i64: 1, 1, 8, 8>}, {transform_indices = @transform_4, window_bounds = array<i64: 1, 1, 8, 8>}, {transform_indices = @transform_5, window_bounds = array<i64: 1, 1, 8, 8>}, {transform_indices = @transform_6, window_bounds = array<i64: 1, 1, 8, 8>}]} {
    %c8_i32 = arith.constant 8 : i32
    %0 = arith.muli %arg2, %c8_i32 : i32
    %c0 = arith.constant 0 : index
    %c0_0 = arith.constant 0 : index
    %c0_1 = arith.constant 0 : index
    %1 = vector.load %arg3[%c0, %c0_0, %c0_1] : memref<1x8x128xf32, #tpu.memory_space<vmem>>, vector<1x8x128xf32>
    %2 = vector.shape_cast %1 : vector<1x8x128xf32> to vector<8x128xf32>
    %3 = tpu.iota {dimensions = array<i32: 1>} : vector<8x128xi32>
    %4 = vector.broadcast %arg1 : i32 to vector<8x128xi32>
    %5 = arith.cmpi eq, %3, %4 : vector<8x128xi32>
    %cst = arith.constant 0.000000e+00 : f32
    %6 = vector.broadcast %cst : f32 to vector<8x128xf32>
    %7 = arith.select %5, %2, %6 : vector<8x128xi1>, vector<8x128xf32>
    %cst_2 = arith.constant dense<0.000000e+00> : vector<8xf32>
    %8 = vector.multi_reduction <add>, %7, %cst_2 [1] : vector<8x128xf32> to vector<8xf32>
    %9 = vector.shape_cast %8 : vector<8xf32> to vector<8x1xf32>
    %10 = tpu.iota {dimensions = array<i32: 0>} : vector<8x8xi32>
    %11 = vector.broadcast %0 : i32 to vector<8x8xi32>
    %12 = arith.addi %10, %11 : vector<8x8xi32>
    %13 = tpu.iota {dimensions = array<i32: 1>} : vector<8x8xi32>
    %14 = arith.subi %12, %13 : vector<8x8xi32>
    %15 = arith.sitofp %14 : vector<8x8xi32> to vector<8x8xf32>
    %cst_3 = arith.constant -5.000000e-01 : f32
    %16 = vector.broadcast %cst_3 : f32 to vector<8x8xf32>
    %17 = arith.mulf %16, %15 : vector<8x8xf32>
    %18 = arith.mulf %17, %15 : vector<8x8xf32>
    %19 = arith.mulf %9, %9 : vector<8x1xf32>
    %20 = tpu.reciprocal %19 : vector<8x1xf32> -> vector<8x1xf32>
    %21 = vector.broadcast %20 : vector<8x1xf32> to vector<8x8xf32>
    %22 = arith.mulf %18, %21 : vector<8x8xf32>
    %23 = math.exp %22 : vector<8x8xf32>
    %cst_4 = arith.constant dense<0.000000e+00> : vector<8xf32>
    %24 = vector.multi_reduction <add>, %23, %cst_4 [1] : vector<8x8xf32> to vector<8xf32>
    %25 = vector.shape_cast %24 : vector<8xf32> to vector<8x1xf32>
    %26 = tpu.reciprocal %25 : vector<8x1xf32> -> vector<8x1xf32>
    %27 = vector.broadcast %26 : vector<8x1xf32> to vector<8x8xf32>
    %28 = arith.mulf %23, %27 : vector<8x8xf32>
    %c0_5 = arith.constant 0 : index
    %c0_6 = arith.constant 0 : index
    %c0_7 = arith.constant 0 : index
    %c0_8 = arith.constant 0 : index
    %29 = vector.load %arg7[%c0_5, %c0_6, %c0_7, %c0_8] : memref<1x1x8x8xf32, #tpu.memory_space<vmem>>, vector<1x1x8x8xf32>
    %30 = vector.shape_cast %29 : vector<1x1x8x8xf32> to vector<8x8xf32>
    %31 = vector.shape_cast %28 : vector<8x8xf32> to vector<1x1x8x8xf32>
    tpu.vector_store %arg7[%c0_5, %c0_6, %c0_7, %c0_8], %31 {strides = array<i32>} : memref<1x1x8x8xf32, #tpu.memory_space<vmem>>, vector<1x1x8x8xf32>,
    %c0_9 = arith.constant 0 : index
    %c0_10 = arith.constant 0 : index
    %c0_11 = arith.constant 0 : index
    %c0_12 = arith.constant 0 : index
    %32 = vector.load %arg4[%c0_9, %c0_10, %c0_11, %c0_12] : memref<1x1x8x8xbf16, #tpu.memory_space<vmem>>, vector<1x1x8x8xbf16>
    %33 = vector.shape_cast %32 : vector<1x1x8x8xbf16> to vector<8x8xbf16>
    %c0_13 = arith.constant 0 : index
    %c0_14 = arith.constant 0 : index
    %c0_15 = arith.constant 0 : index
    %c0_16 = arith.constant 0 : index
    %34 = vector.load %arg5[%c0_13, %c0_14, %c0_15, %c0_16] : memref<1x1x8x8xbf16, #tpu.memory_space<vmem>>, vector<1x1x8x8xbf16>
    %35 = vector.shape_cast %34 : vector<1x1x8x8xbf16> to vector<8x8xbf16>
    %cst_17 = arith.constant dense<0.000000e+00> : vector<8x8xf32>
    %36 = tpu.matmul %33, %35, %cst_17 {dimension_numbers = #tpu.dot_dimension_numbers<[1], [1], [0], [0], [0, 0, 1, 0], [], []>} : vector<8x8xbf16>, vector<8x8xbf16>, vector<8x8xf32> -> vector<8x8xf32>
    %cst_18 = arith.constant 0.353553385 : f32
    %37 = vector.broadcast %cst_18 : f32 to vector<8x8xf32>
    %38 = arith.mulf %36, %37 : vector<8x8xf32>
    %cst_19 = arith.constant dense<0xFF800000> : vector<8xf32>
    %39 = vector.multi_reduction <maximumf>, %38, %cst_19 [1] : vector<8x8xf32> to vector<8xf32>
    %40 = vector.shape_cast %39 : vector<8xf32> to vector<8x1xf32>
    %41 = vector.broadcast %40 : vector<8x1xf32> to vector<8x8xf32>
    %42 = arith.subf %38, %41 : vector<8x8xf32>
    %43 = math.exp %42 : vector<8x8xf32>
    %cst_20 = arith.constant dense<0.000000e+00> : vector<8xf32>
    %44 = vector.multi_reduction <add>, %43, %cst_20 [1] : vector<8x8xf32> to vector<8xf32>
    %45 = vector.shape_cast %44 : vector<8xf32> to vector<8x1xf32>
    %46 = tpu.reciprocal %45 : vector<8x1xf32> -> vector<8x1xf32>
    %47 = vector.broadcast %46 : vector<8x1xf32> to vector<8x8xf32>
    %48 = arith.mulf %43, %47 : vector<8x8xf32>
    %c0_21 = arith.constant 0 : index
    %c0_22 = arith.constant 0 : index
    %c0_23 = arith.constant 0 : index
    %c0_24 = arith.constant 0 : index
    %49 = vector.load %arg8[%c0_21, %c0_22, %c0_23, %c0_24] : memref<1x1x8x8xf32, #tpu.memory_space<vmem>>, vector<1x1x8x8xf32>
    %50 = vector.shape_cast %49 : vector<1x1x8x8xf32> to vector<8x8xf32>
    %51 = vector.shape_cast %48 : vector<8x8xf32> to vector<1x1x8x8xf32>
    tpu.vector_store %arg8[%c0_21, %c0_22, %c0_23, %c0_24], %51 {strides = array<i32>} : memref<1x1x8x8xf32, #tpu.memory_space<vmem>>, vector<1x1x8x8xf32>,
    %52 = arith.truncf %48 : vector<8x8xf32> to vector<8x8xbf16>
    %c0_25 = arith.constant 0 : index
    %c0_26 = arith.constant 0 : index
    %c0_27 = arith.constant 0 : index
    %c0_28 = arith.constant 0 : index
    %53 = vector.load %arg6[%c0_25, %c0_26, %c0_27, %c0_28] : memref<1x1x8x8xbf16, #tpu.memory_space<vmem>>, vector<1x1x8x8xbf16>
    %54 = vector.shape_cast %53 : vector<1x1x8x8xbf16> to vector<8x8xbf16>
    %cst_29 = arith.constant dense<0.000000e+00> : vector<8x8xf32>
    %55 = tpu.matmul %52, %54, %cst_29 {dimension_numbers = #tpu.dot_dimension_numbers<[1], [0], [0], [1], [0, 0, 1, 1], [], []>} : vector<8x8xbf16>, vector<8x8xbf16>, vector<8x8xf32> -> vector<8x8xf32>
    %56 = arith.truncf %55 : vector<8x8xf32> to vector<8x8xbf16>
    %c0_30 = arith.constant 0 : index
    %c0_31 = arith.constant 0 : index
    %c0_32 = arith.constant 0 : index
    %c0_33 = arith.constant 0 : index
    %57 = vector.load %arg9[%c0_30, %c0_31, %c0_32, %c0_33] : memref<1x1x8x8xbf16, #tpu.memory_space<vmem>>, vector<1x1x8x8xbf16>
    %58 = vector.shape_cast %57 : vector<1x1x8x8xbf16> to vector<8x8xbf16>
    %59 = vector.shape_cast %56 : vector<8x8xbf16> to vector<1x1x8x8xbf16>
    tpu.vector_store %arg9[%c0_30, %c0_31, %c0_32, %c0_33], %59 {strides = array<i32>} : memref<1x1x8x8xbf16, #tpu.memory_space<vmem>>, vector<1x1x8x8xbf16>,
    return
  }
  func.func @transform_0(%arg0: i32, %arg1: i32, %arg2: i32) -> (i32, i32, i32) {
    %c0_i32 = arith.constant 0 : i32
    %c0_i32_0 = arith.constant 0 : i32
    return %arg0, %arg2, %c0_i32 : i32, i32, i32
  }
  func.func @transform_1(%arg0: i32, %arg1: i32, %arg2: i32) -> (i32, i32, i32, i32) {
    %c0_i32 = arith.constant 0 : i32
    %c0_i32_0 = arith.constant 0 : i32
    return %arg0, %arg1, %arg2, %c0_i32 : i32, i32, i32, i32
  }
  func.func @transform_2(%arg0: i32, %arg1: i32, %arg2: i32) -> (i32, i32, i32, i32) {
    %c0_i32 = arith.constant 0 : i32
    %c0_i32_0 = arith.constant 0 : i32
    %c0_i32_1 = arith.constant 0 : i32
    return %arg0, %arg1, %c0_i32, %c0_i32_0 : i32, i32, i32, i32
  }
  func.func @transform_3(%arg0: i32, %arg1: i32, %arg2: i32) -> (i32, i32, i32, i32) {
    %c0_i32 = arith.constant 0 : i32
    %c0_i32_0 = arith.constant 0 : i32
    %c0_i32_1 = arith.constant 0 : i32
    return %arg0, %arg1, %c0_i32, %c0_i32_0 : i32, i32, i32, i32
  }
  func.func @transform_4(%arg0: i32, %arg1: i32, %arg2: i32) -> (i32, i32, i32, i32) {
    %c0_i32 = arith.constant 0 : i32
    %c0_i32_0 = arith.constant 0 : i32
    return %arg1, %arg0, %arg2, %c0_i32 : i32, i32, i32, i32
  }
  func.func @transform_5(%arg0: i32, %arg1: i32, %arg2: i32) -> (i32, i32, i32, i32) {
    %c0_i32 = arith.constant 0 : i32
    %c0_i32_0 = arith.constant 0 : i32
    return %arg1, %arg0, %arg2, %c0_i32 : i32, i32, i32, i32
  }
  func.func @transform_6(%arg0: i32, %arg1: i32, %arg2: i32) -> (i32, i32, i32, i32) {
    %c0_i32 = arith.constant 0 : i32
    %c0_i32_0 = arith.constant 0 : i32
    return %arg0, %arg1, %arg2, %c0_i32 : i32, i32, i32, i32
  }
}

module attributes {stable_mosaic.version = 11 : i64} {
  func.func @_dense_block_kernel(%arg0: i32, %arg1: i32, %arg2: memref<1x4x8x8xbf16, #tpu.memory_space<vmem>>, %arg3: memref<32x32xbf16, #tpu.memory_space<vmem>>, %arg4: memref<1x8x32xf32, #tpu.memory_space<vmem>>, %arg5: memref<1x32xf32, #tpu.memory_space<vmem>>, %arg6: memref<1x32xf32, #tpu.memory_space<vmem>>, %arg7: memref<32x128xbf16, #tpu.memory_space<vmem>>, %arg8: memref<1x128xf32, #tpu.memory_space<vmem>>, %arg9: memref<128x32xbf16, #tpu.memory_space<vmem>>, %arg10: memref<1x32xf32, #tpu.memory_space<vmem>>, %arg11: memref<1x32xf32, #tpu.memory_space<vmem>>, %arg12: memref<1x32xf32, #tpu.memory_space<vmem>>, %arg13: memref<1x8x32xf32, #tpu.memory_space<vmem>>) attributes {dimension_semantics = [#tpu.dimension_semantics<parallel>, #tpu.dimension_semantics<parallel>], iteration_bounds = array<i64: 2, 1>, scalar_prefetch = 0 : i64, scratch_operands = 0 : i64, tpu.core_type = #tpu.core_type<tc>, window_params = [{transform_indices = @transform_0, window_bounds = array<i64: 1, 4, 8, 8>}, {pipeline_mode = #tpu.pipeline_mode<synchronous>, transform_indices = @transform_1, window_bounds = array<i64: 32, 32>}, {transform_indices = @transform_2, window_bounds = array<i64: 1, 8, 32>}, {pipeline_mode = #tpu.pipeline_mode<synchronous>, transform_indices = @transform_3, window_bounds = array<i64: 1, 32>}, {pipeline_mode = #tpu.pipeline_mode<synchronous>, transform_indices = @transform_4, window_bounds = array<i64: 1, 32>}, {pipeline_mode = #tpu.pipeline_mode<synchronous>, transform_indices = @transform_5, window_bounds = array<i64: 32, 128>}, {pipeline_mode = #tpu.pipeline_mode<synchronous>, transform_indices = @transform_6, window_bounds = array<i64: 1, 128>}, {pipeline_mode = #tpu.pipeline_mode<synchronous>, transform_indices = @transform_7, window_bounds = array<i64: 128, 32>}, {pipeline_mode = #tpu.pipeline_mode<synchronous>, transform_indices = @transform_8, window_bounds = array<i64: 1, 32>}, {pipeline_mode = #tpu.pipeline_mode<synchronous>, transform_indices = @transform_9, window_bounds = array<i64: 1, 32>}, {pipeline_mode = #tpu.pipeline_mode<synchronous>, transform_indices = @transform_10, window_bounds = array<i64: 1, 32>}, {transform_indices = @transform_11, window_bounds = array<i64: 1, 8, 32>}]} {
    %c0 = arith.constant 0 : index
    %c0_0 = arith.constant 0 : index
    %c0_1 = arith.constant 0 : index
    %c0_2 = arith.constant 0 : index
    %0 = vector.load %arg2[%c0, %c0_0, %c0_1, %c0_2] : memref<1x4x8x8xbf16, #tpu.memory_space<vmem>>, vector<1x1x8x8xbf16>
    %1 = vector.shape_cast %0 : vector<1x1x8x8xbf16> to vector<8x8xbf16>
    %c0_3 = arith.constant 0 : index
    %c0_4 = arith.constant 0 : index
    %2 = vector.load %arg3[%c0_3, %c0_4] : memref<32x32xbf16, #tpu.memory_space<vmem>>, vector<8x32xbf16>
    %cst = arith.constant dense<0.000000e+00> : vector<8x32xf32>
    %3 = tpu.matmul %1, %2, %cst {dimension_numbers = #tpu.dot_dimension_numbers<[1], [0], [0], [1], [0, 0, 1, 1], [], []>} : vector<8x8xbf16>, vector<8x32xbf16>, vector<8x32xf32> -> vector<8x32xf32>
    %c0_5 = arith.constant 0 : index
    %c1 = arith.constant 1 : index
    %c0_6 = arith.constant 0 : index
    %c0_7 = arith.constant 0 : index
    %4 = vector.load %arg2[%c0_5, %c1, %c0_6, %c0_7] : memref<1x4x8x8xbf16, #tpu.memory_space<vmem>>, vector<1x1x8x8xbf16>
    %5 = vector.shape_cast %4 : vector<1x1x8x8xbf16> to vector<8x8xbf16>
    %c8 = arith.constant 8 : index
    %c0_8 = arith.constant 0 : index
    %6 = vector.load %arg3[%c8, %c0_8] : memref<32x32xbf16, #tpu.memory_space<vmem>>, vector<8x32xbf16>
    %cst_9 = arith.constant dense<0.000000e+00> : vector<8x32xf32>
    %7 = tpu.matmul %5, %6, %cst_9 {dimension_numbers = #tpu.dot_dimension_numbers<[1], [0], [0], [1], [0, 0, 1, 1], [], []>} : vector<8x8xbf16>, vector<8x32xbf16>, vector<8x32xf32> -> vector<8x32xf32>
    %8 = arith.addf %3, %7 : vector<8x32xf32>
    %c0_10 = arith.constant 0 : index
    %c2 = arith.constant 2 : index
    %c0_11 = arith.constant 0 : index
    %c0_12 = arith.constant 0 : index
    %9 = vector.load %arg2[%c0_10, %c2, %c0_11, %c0_12] : memref<1x4x8x8xbf16, #tpu.memory_space<vmem>>, vector<1x1x8x8xbf16>
    %10 = vector.shape_cast %9 : vector<1x1x8x8xbf16> to vector<8x8xbf16>
    %c16 = arith.constant 16 : index
    %c0_13 = arith.constant 0 : index
    %11 = vector.load %arg3[%c16, %c0_13] : memref<32x32xbf16, #tpu.memory_space<vmem>>, vector<8x32xbf16>
    %cst_14 = arith.constant dense<0.000000e+00> : vector<8x32xf32>
    %12 = tpu.matmul %10, %11, %cst_14 {dimension_numbers = #tpu.dot_dimension_numbers<[1], [0], [0], [1], [0, 0, 1, 1], [], []>} : vector<8x8xbf16>, vector<8x32xbf16>, vector<8x32xf32> -> vector<8x32xf32>
    %13 = arith.addf %8, %12 : vector<8x32xf32>
    %c0_15 = arith.constant 0 : index
    %c3 = arith.constant 3 : index
    %c0_16 = arith.constant 0 : index
    %c0_17 = arith.constant 0 : index
    %14 = vector.load %arg2[%c0_15, %c3, %c0_16, %c0_17] : memref<1x4x8x8xbf16, #tpu.memory_space<vmem>>, vector<1x1x8x8xbf16>
    %15 = vector.shape_cast %14 : vector<1x1x8x8xbf16> to vector<8x8xbf16>
    %c24 = arith.constant 24 : index
    %c0_18 = arith.constant 0 : index
    %16 = vector.load %arg3[%c24, %c0_18] : memref<32x32xbf16, #tpu.memory_space<vmem>>, vector<8x32xbf16>
    %cst_19 = arith.constant dense<0.000000e+00> : vector<8x32xf32>
    %17 = tpu.matmul %15, %16, %cst_19 {dimension_numbers = #tpu.dot_dimension_numbers<[1], [0], [0], [1], [0, 0, 1, 1], [], []>} : vector<8x8xbf16>, vector<8x32xbf16>, vector<8x32xf32> -> vector<8x32xf32>
    %18 = arith.addf %13, %17 : vector<8x32xf32>
    %c0_20 = arith.constant 0 : index
    %c0_21 = arith.constant 0 : index
    %c0_22 = arith.constant 0 : index
    %19 = vector.load %arg4[%c0_20, %c0_21, %c0_22] : memref<1x8x32xf32, #tpu.memory_space<vmem>>, vector<1x8x32xf32>
    %20 = vector.shape_cast %19 : vector<1x8x32xf32> to vector<8x32xf32>
    %21 = arith.addf %18, %20 : vector<8x32xf32>
    %cst_23 = arith.constant dense<0.000000e+00> : vector<8xf32>
    %22 = vector.multi_reduction <add>, %21, %cst_23 [1] : vector<8x32xf32> to vector<8xf32>
    %23 = vector.shape_cast %22 : vector<8xf32> to vector<8x1xf32>
    %cst_24 = arith.constant 3.200000e+01 : f32
    %24 = vector.broadcast %cst_24 : f32 to vector<8x1xf32>
    %25 = arith.divf %23, %24 : vector<8x1xf32>
    %26 = vector.broadcast %25 : vector<8x1xf32> to vector<8x32xf32>
    %27 = arith.subf %21, %26 : vector<8x32xf32>
    %28 = arith.mulf %27, %27 : vector<8x32xf32>
    %cst_25 = arith.constant dense<0.000000e+00> : vector<8xf32>
    %29 = vector.multi_reduction <add>, %28, %cst_25 [1] : vector<8x32xf32> to vector<8xf32>
    %30 = vector.shape_cast %29 : vector<8xf32> to vector<8x1xf32>
    %cst_26 = arith.constant 3.200000e+01 : f32
    %31 = vector.broadcast %cst_26 : f32 to vector<8x1xf32>
    %32 = arith.divf %30, %31 : vector<8x1xf32>
    %33 = vector.broadcast %25 : vector<8x1xf32> to vector<8x32xf32>
    %34 = arith.subf %21, %33 : vector<8x32xf32>
    %cst_27 = arith.constant 9.99999974E-6 : f32
    %35 = vector.broadcast %cst_27 : f32 to vector<8x1xf32>
    %36 = arith.addf %32, %35 : vector<8x1xf32>
    %37 = math.rsqrt %36 : vector<8x1xf32>
    %38 = vector.broadcast %37 : vector<8x1xf32> to vector<8x32xf32>
    %39 = arith.mulf %34, %38 : vector<8x32xf32>
    %c0_28 = arith.constant 0 : index
    %c0_29 = arith.constant 0 : index
    %40 = vector.load %arg5[%c0_28, %c0_29] : memref<1x32xf32, #tpu.memory_space<vmem>>, vector<1x32xf32>
    %41 = vector.broadcast %40 : vector<1x32xf32> to vector<8x32xf32>
    %42 = arith.mulf %39, %41 : vector<8x32xf32>
    %c0_30 = arith.constant 0 : index
    %c0_31 = arith.constant 0 : index
    %43 = vector.load %arg6[%c0_30, %c0_31] : memref<1x32xf32, #tpu.memory_space<vmem>>, vector<1x32xf32>
    %44 = vector.broadcast %43 : vector<1x32xf32> to vector<8x32xf32>
    %45 = arith.addf %42, %44 : vector<8x32xf32>
    %46 = arith.truncf %45 : vector<8x32xf32> to vector<8x32xbf16>
    %c0_32 = arith.constant 0 : index
    %c0_33 = arith.constant 0 : index
    %47 = vector.load %arg7[%c0_32, %c0_33] : memref<32x128xbf16, #tpu.memory_space<vmem>>, vector<32x128xbf16>
    %cst_34 = arith.constant dense<0.000000e+00> : vector<8x128xf32>
    %48 = tpu.matmul %46, %47, %cst_34 {dimension_numbers = #tpu.dot_dimension_numbers<[1], [0], [0], [1], [0, 0, 1, 1], [], []>} : vector<8x32xbf16>, vector<32x128xbf16>, vector<8x128xf32> -> vector<8x128xf32>
    %c0_35 = arith.constant 0 : index
    %c0_36 = arith.constant 0 : index
    %49 = vector.load %arg8[%c0_35, %c0_36] : memref<1x128xf32, #tpu.memory_space<vmem>>, vector<1x128xf32>
    %50 = vector.broadcast %49 : vector<1x128xf32> to vector<8x128xf32>
    %51 = arith.addf %48, %50 : vector<8x128xf32>
    %cst_37 = arith.constant 0.000000e+00 : f32
    %52 = vector.broadcast %cst_37 : f32 to vector<8x128xf32>
    %53 = arith.maximumf %51, %52 : vector<8x128xf32>
    %54 = arith.truncf %53 : vector<8x128xf32> to vector<8x128xbf16>
    %c0_38 = arith.constant 0 : index
    %c0_39 = arith.constant 0 : index
    %55 = vector.load %arg9[%c0_38, %c0_39] : memref<128x32xbf16, #tpu.memory_space<vmem>>, vector<128x32xbf16>
    %cst_40 = arith.constant dense<0.000000e+00> : vector<8x32xf32>
    %56 = tpu.matmul %54, %55, %cst_40 {dimension_numbers = #tpu.dot_dimension_numbers<[1], [0], [0], [1], [0, 0, 1, 1], [], []>} : vector<8x128xbf16>, vector<128x32xbf16>, vector<8x32xf32> -> vector<8x32xf32>
    %c0_41 = arith.constant 0 : index
    %c0_42 = arith.constant 0 : index
    %57 = vector.load %arg10[%c0_41, %c0_42] : memref<1x32xf32, #tpu.memory_space<vmem>>, vector<1x32xf32>
    %58 = vector.broadcast %57 : vector<1x32xf32> to vector<8x32xf32>
    %59 = arith.addf %56, %58 : vector<8x32xf32>
    %60 = arith.addf %59, %45 : vector<8x32xf32>
    %cst_43 = arith.constant dense<0.000000e+00> : vector<8xf32>
    %61 = vector.multi_reduction <add>, %60, %cst_43 [1] : vector<8x32xf32> to vector<8xf32>
    %62 = vector.shape_cast %61 : vector<8xf32> to vector<8x1xf32>
    %cst_44 = arith.constant 3.200000e+01 : f32
    %63 = vector.broadcast %cst_44 : f32 to vector<8x1xf32>
    %64 = arith.divf %62, %63 : vector<8x1xf32>
    %65 = vector.broadcast %64 : vector<8x1xf32> to vector<8x32xf32>
    %66 = arith.subf %60, %65 : vector<8x32xf32>
    %67 = arith.mulf %66, %66 : vector<8x32xf32>
    %cst_45 = arith.constant dense<0.000000e+00> : vector<8xf32>
    %68 = vector.multi_reduction <add>, %67, %cst_45 [1] : vector<8x32xf32> to vector<8xf32>
    %69 = vector.shape_cast %68 : vector<8xf32> to vector<8x1xf32>
    %cst_46 = arith.constant 3.200000e+01 : f32
    %70 = vector.broadcast %cst_46 : f32 to vector<8x1xf32>
    %71 = arith.divf %69, %70 : vector<8x1xf32>
    %72 = vector.broadcast %64 : vector<8x1xf32> to vector<8x32xf32>
    %73 = arith.subf %60, %72 : vector<8x32xf32>
    %cst_47 = arith.constant 9.99999974E-6 : f32
    %74 = vector.broadcast %cst_47 : f32 to vector<8x1xf32>
    %75 = arith.addf %71, %74 : vector<8x1xf32>
    %76 = math.rsqrt %75 : vector<8x1xf32>
    %77 = vector.broadcast %76 : vector<8x1xf32> to vector<8x32xf32>
    %78 = arith.mulf %73, %77 : vector<8x32xf32>
    %c0_48 = arith.constant 0 : index
    %c0_49 = arith.constant 0 : index
    %79 = vector.load %arg11[%c0_48, %c0_49] : memref<1x32xf32, #tpu.memory_space<vmem>>, vector<1x32xf32>
    %80 = vector.broadcast %79 : vector<1x32xf32> to vector<8x32xf32>
    %81 = arith.mulf %78, %80 : vector<8x32xf32>
    %c0_50 = arith.constant 0 : index
    %c0_51 = arith.constant 0 : index
    %82 = vector.load %arg12[%c0_50, %c0_51] : memref<1x32xf32, #tpu.memory_space<vmem>>, vector<1x32xf32>
    %83 = vector.broadcast %82 : vector<1x32xf32> to vector<8x32xf32>
    %84 = arith.addf %81, %83 : vector<8x32xf32>
    %c0_52 = arith.constant 0 : index
    %c0_53 = arith.constant 0 : index
    %c0_54 = arith.constant 0 : index
    %85 = vector.load %arg13[%c0_52, %c0_53, %c0_54] : memref<1x8x32xf32, #tpu.memory_space<vmem>>, vector<1x8x32xf32>
    %86 = vector.shape_cast %85 : vector<1x8x32xf32> to vector<8x32xf32>
    %87 = vector.shape_cast %84 : vector<8x32xf32> to vector<1x8x32xf32>
    tpu.vector_store %arg13[%c0_52, %c0_53, %c0_54], %87 {strides = array<i32>} : memref<1x8x32xf32, #tpu.memory_space<vmem>>, vector<1x8x32xf32>,
    return
  }
  func.func @transform_0(%arg0: i32, %arg1: i32) -> (i32, i32, i32, i32) {
    %c0_i32 = arith.constant 0 : i32
    %c0_i32_0 = arith.constant 0 : i32
    %c0_i32_1 = arith.constant 0 : i32
    return %arg0, %c0_i32, %arg1, %c0_i32_0 : i32, i32, i32, i32
  }
  func.func @transform_1(%arg0: i32, %arg1: i32) -> (i32, i32) {
    %c0_i32 = arith.constant 0 : i32
    %c0_i32_0 = arith.constant 0 : i32
    %c0_i32_1 = arith.constant 0 : i32
    return %c0_i32, %c0_i32_0 : i32, i32
  }
  func.func @transform_2(%arg0: i32, %arg1: i32) -> (i32, i32, i32) {
    %c0_i32 = arith.constant 0 : i32
    %c0_i32_0 = arith.constant 0 : i32
    return %arg0, %arg1, %c0_i32 : i32, i32, i32
  }
  func.func @transform_3(%arg0: i32, %arg1: i32) -> (i32, i32) {
    %c0_i32 = arith.constant 0 : i32
    %c0_i32_0 = arith.constant 0 : i32
    %c0_i32_1 = arith.constant 0 : i32
    return %c0_i32, %c0_i32_0 : i32, i32
  }
  func.func @transform_4(%arg0: i32, %arg1: i32) -> (i32, i32) {
    %c0_i32 = arith.constant 0 : i32
    %c0_i32_0 = arith.constant 0 : i32
    %c0_i32_1 = arith.constant 0 : i32
    return %c0_i32, %c0_i32_0 : i32, i32
  }
  func.func @transform_5(%arg0: i32, %arg1: i32) -> (i32, i32) {
    %c0_i32 = arith.constant 0 : i32
    %c0_i32_0 = arith.constant 0 : i32
    %c0_i32_1 = arith.constant 0 : i32
    return %c0_i32, %c0_i32_0 : i32, i32
  }
  func.func @transform_6(%arg0: i32, %arg1: i32) -> (i32, i32) {
    %c0_i32 = arith.constant 0 : i32
    %c0_i32_0 = arith.constant 0 : i32
    %c0_i32_1 = arith.constant 0 : i32
    return %c0_i32, %c0_i32_0 : i32, i32
  }
  func.func @transform_7(%arg0: i32, %arg1: i32) -> (i32, i32) {
    %c0_i32 = arith.constant 0 : i32
    %c0_i32_0 = arith.constant 0 : i32
    %c0_i32_1 = arith.constant 0 : i32
    return %c0_i32, %c0_i32_0 : i32, i32
  }
  func.func @transform_8(%arg0: i32, %arg1: i32) -> (i32, i32) {
    %c0_i32 = arith.constant 0 : i32
    %c0_i32_0 = arith.constant 0 : i32
    %c0_i32_1 = arith.constant 0 : i32
    return %c0_i32, %c0_i32_0 : i32, i32
  }
  func.func @transform_9(%arg0: i32, %arg1: i32) -> (i32, i32) {
    %c0_i32 = arith.constant 0 : i32
    %c0_i32_0 = arith.constant 0 : i32
    %c0_i32_1 = arith.constant 0 : i32
    return %c0_i32, %c0_i32_0 : i32, i32
  }
  func.func @transform_10(%arg0: i32, %arg1: i32) -> (i32, i32) {
    %c0_i32 = arith.constant 0 : i32
    %c0_i32_0 = arith.constant 0 : i32
    %c0_i32_1 = arith.constant 0 : i32
    return %c0_i32, %c0_i32_0 : i32, i32
  }
  func.func @transform_11(%arg0: i32, %arg1: i32) -> (i32, i32, i32) {
    %c0_i32 = arith.constant 0 : i32
    %c0_i32_0 = arith.constant 0 : i32
    return %arg0, %arg1, %c0_i32 : i32, i32, i32
  }
}

module attributes {stable_mosaic.version = 11 : i64} {
  func.func @_anomaly_attention_kernel(%arg0: i32, %arg1: i32, %arg2: i32, %arg3: memref<1x8x128xf32, #tpu.memory_space<vmem>>, %arg4: memref<1x1x8x8xbf16, #tpu.memory_space<vmem>>, %arg5: memref<1x1x8x8xbf16, #tpu.memory_space<vmem>>, %arg6: memref<1x1x8x8xbf16, #tpu.memory_space<vmem>>, %arg7: memref<1x1x8x8xf32, #tpu.memory_space<vmem>>, %arg8: memref<1x1x8x8xf32, #tpu.memory_space<vmem>>, %arg9: memref<1x1x8x8xbf16, #tpu.memory_space<vmem>>) attributes {dimension_semantics = [#tpu.dimension_semantics<parallel>, #tpu.dimension_semantics<parallel>, #tpu.dimension_semantics<parallel>], iteration_bounds = array<i64: 2, 4, 1>, scalar_prefetch = 0 : i64, scratch_operands = 0 : i64, tpu.core_type = #tpu.core_type<tc>, window_params = [{transform_indices = @transform_0, window_bounds = array<i64: 1, 8, 128>}, {transform_indices = @transform_1, window_bounds = array<i64: 1, 1, 8, 8>}, {transform_indices = @transform_2, window_bounds = array<i64: 1, 1, 8, 8>}, {transform_indices = @transform_3, window_bounds = array<i64: 1, 1, 8, 8>}, {transform_indices = @transform_4, window_bounds = array<i64: 1, 1, 8, 8>}, {transform_indices = @transform_5, window_bounds = array<i64: 1, 1, 8, 8>}, {transform_indices = @transform_6, window_bounds = array<i64: 1, 1, 8, 8>}]} {
    %c8_i32 = arith.constant 8 : i32
    %0 = arith.muli %arg2, %c8_i32 : i32
    %c0 = arith.constant 0 : index
    %c0_0 = arith.constant 0 : index
    %c0_1 = arith.constant 0 : index
    %1 = vector.load %arg3[%c0, %c0_0, %c0_1] : memref<1x8x128xf32, #tpu.memory_space<vmem>>, vector<1x8x128xf32>
    %2 = vector.shape_cast %1 : vector<1x8x128xf32> to vector<8x128xf32>
    %3 = tpu.iota {dimensions = array<i32: 1>} : vector<8x128xi32>
    %4 = vector.broadcast %arg1 : i32 to vector<8x128xi32>
    %5 = arith.cmpi eq, %3, %4 : vector<8x128xi32>
    %cst = arith.constant 0.000000e+00 : f32
    %6 = vector.broadcast %cst : f32 to vector<8x128xf32>
    %7 = arith.select %5, %2, %6 : vector<8x128xi1>, vector<8x128xf32>
    %cst_2 = arith.constant dense<0.000000e+00> : vector<8xf32>
    %8 = vector.multi_reduction <add>, %7, %cst_2 [1] : vector<8x128xf32> to vector<8xf32>
    %9 = vector.shape_cast %8 : vector<8xf32> to vector<8x1xf32>
    %10 = tpu.iota {dimensions = array<i32: 0>} : vector<8x8xi32>
    %11 = vector.broadcast %0 : i32 to vector<8x8xi32>
    %12 = arith.addi %10, %11 : vector<8x8xi32>
    %13 = tpu.iota {dimensions = array<i32: 1>} : vector<8x8xi32>
    %14 = arith.subi %12, %13 : vector<8x8xi32>
    %15 = arith.sitofp %14 : vector<8x8xi32> to vector<8x8xf32>
    %cst_3 = arith.constant -5.000000e-01 : f32
    %16 = vector.broadcast %cst_3 : f32 to vector<8x8xf32>
    %17 = arith.mulf %16, %15 : vector<8x8xf32>
    %18 = arith.mulf %17, %15 : vector<8x8xf32>
    %19 = arith.mulf %9, %9 : vector<8x1xf32>
    %20 = tpu.reciprocal %19 : vector<8x1xf32> -> vector<8x1xf32>
    %21 = vector.broadcast %20 : vector<8x1xf32> to vector<8x8xf32>
    %22 = arith.mulf %18, %21 : vector<8x8xf32>
    %23 = math.exp %22 : vector<8x8xf32>
    %cst_4 = arith.constant dense<0.000000e+00> : vector<8xf32>
    %24 = vector.multi_reduction <add>, %23, %cst_4 [1] : vector<8x8xf32> to vector<8xf32>
    %25 = vector.shape_cast %24 : vector<8xf32> to vector<8x1xf32>
    %26 = tpu.reciprocal %25 : vector<8x1xf32> -> vector<8x1xf32>
    %27 = vector.broadcast %26 : vector<8x1xf32> to vector<8x8xf32>
    %28 = arith.mulf %23, %27 : vector<8x8xf32>
    %c0_5 = arith.constant 0 : index
    %c0_6 = arith.constant 0 : index
    %c0_7 = arith.constant 0 : index
    %c0_8 = arith.constant 0 : index
    %29 = vector.load %arg7[%c0_5, %c0_6, %c0_7, %c0_8] : memref<1x1x8x8xf32, #tpu.memory_space<vmem>>, vector<1x1x8x8xf32>
    %30 = vector.shape_cast %29 : vector<1x1x8x8xf32> to vector<8x8xf32>
    %31 = vector.shape_cast %28 : vector<8x8xf32> to vector<1x1x8x8xf32>
    tpu.vector_store %arg7[%c0_5, %c0_6, %c0_7, %c0_8], %31 {strides = array<i32>} : memref<1x1x8x8xf32, #tpu.memory_space<vmem>>, vector<1x1x8x8xf32>,
    %c0_9 = arith.constant 0 : index
    %c0_10 = arith.constant 0 : index
    %c0_11 = arith.constant 0 : index
    %c0_12 = arith.constant 0 : index
    %32 = vector.load %arg4[%c0_9, %c0_10, %c0_11, %c0_12] : memref<1x1x8x8xbf16, #tpu.memory_space<vmem>>, vector<1x1x8x8xbf16>
    %33 = vector.shape_cast %32 : vector<1x1x8x8xbf16> to vector<8x8xbf16>
    %c0_13 = arith.constant 0 : index
    %c0_14 = arith.constant 0 : index
    %c0_15 = arith.constant 0 : index
    %c0_16 = arith.constant 0 : index
    %34 = vector.load %arg5[%c0_13, %c0_14, %c0_15, %c0_16] : memref<1x1x8x8xbf16, #tpu.memory_space<vmem>>, vector<1x1x8x8xbf16>
    %35 = vector.shape_cast %34 : vector<1x1x8x8xbf16> to vector<8x8xbf16>
    %cst_17 = arith.constant dense<0.000000e+00> : vector<8x8xf32>
    %36 = tpu.matmul %33, %35, %cst_17 {dimension_numbers = #tpu.dot_dimension_numbers<[1], [1], [0], [0], [0, 0, 1, 0], [], []>} : vector<8x8xbf16>, vector<8x8xbf16>, vector<8x8xf32> -> vector<8x8xf32>
    %cst_18 = arith.constant 0.353553385 : f32
    %37 = vector.broadcast %cst_18 : f32 to vector<8x8xf32>
    %38 = arith.mulf %36, %37 : vector<8x8xf32>
    %cst_19 = arith.constant dense<0xFF800000> : vector<8xf32>
    %39 = vector.multi_reduction <maximumf>, %38, %cst_19 [1] : vector<8x8xf32> to vector<8xf32>
    %40 = vector.shape_cast %39 : vector<8xf32> to vector<8x1xf32>
    %41 = vector.broadcast %40 : vector<8x1xf32> to vector<8x8xf32>
    %42 = arith.subf %38, %41 : vector<8x8xf32>
    %43 = math.exp %42 : vector<8x8xf32>
    %cst_20 = arith.constant dense<0.000000e+00> : vector<8xf32>
    %44 = vector.multi_reduction <add>, %43, %cst_20 [1] : vector<8x8xf32> to vector<8xf32>
    %45 = vector.shape_cast %44 : vector<8xf32> to vector<8x1xf32>
    %46 = tpu.reciprocal %45 : vector<8x1xf32> -> vector<8x1xf32>
    %47 = vector.broadcast %46 : vector<8x1xf32> to vector<8x8xf32>
    %48 = arith.mulf %43, %47 : vector<8x8xf32>
    %c0_21 = arith.constant 0 : index
    %c0_22 = arith.constant 0 : index
    %c0_23 = arith.constant 0 : index
    %c0_24 = arith.constant 0 : index
    %49 = vector.load %arg8[%c0_21, %c0_22, %c0_23, %c0_24] : memref<1x1x8x8xf32, #tpu.memory_space<vmem>>, vector<1x1x8x8xf32>
    %50 = vector.shape_cast %49 : vector<1x1x8x8xf32> to vector<8x8xf32>
    %51 = vector.shape_cast %48 : vector<8x8xf32> to vector<1x1x8x8xf32>
    tpu.vector_store %arg8[%c0_21, %c0_22, %c0_23, %c0_24], %51 {strides = array<i32>} : memref<1x1x8x8xf32, #tpu.memory_space<vmem>>, vector<1x1x8x8xf32>,
    %52 = arith.truncf %48 : vector<8x8xf32> to vector<8x8xbf16>
    %c0_25 = arith.constant 0 : index
    %c0_26 = arith.constant 0 : index
    %c0_27 = arith.constant 0 : index
    %c0_28 = arith.constant 0 : index
    %53 = vector.load %arg6[%c0_25, %c0_26, %c0_27, %c0_28] : memref<1x1x8x8xbf16, #tpu.memory_space<vmem>>, vector<1x1x8x8xbf16>
    %54 = vector.shape_cast %53 : vector<1x1x8x8xbf16> to vector<8x8xbf16>
    %cst_29 = arith.constant dense<0.000000e+00> : vector<8x8xf32>
    %55 = tpu.matmul %52, %54, %cst_29 {dimension_numbers = #tpu.dot_dimension_numbers<[1], [0], [0], [1], [0, 0, 1, 1], [], []>} : vector<8x8xbf16>, vector<8x8xbf16>, vector<8x8xf32> -> vector<8x8xf32>
    %56 = arith.truncf %55 : vector<8x8xf32> to vector<8x8xbf16>
    %c0_30 = arith.constant 0 : index
    %c0_31 = arith.constant 0 : index
    %c0_32 = arith.constant 0 : index
    %c0_33 = arith.constant 0 : index
    %57 = vector.load %arg9[%c0_30, %c0_31, %c0_32, %c0_33] : memref<1x1x8x8xbf16, #tpu.memory_space<vmem>>, vector<1x1x8x8xbf16>
    %58 = vector.shape_cast %57 : vector<1x1x8x8xbf16> to vector<8x8xbf16>
    %59 = vector.shape_cast %56 : vector<8x8xbf16> to vector<1x1x8x8xbf16>
    tpu.vector_store %arg9[%c0_30, %c0_31, %c0_32, %c0_33], %59 {strides = array<i32>} : memref<1x1x8x8xbf16, #tpu.memory_space<vmem>>, vector<1x1x8x8xbf16>,
    return
  }
  func.func @transform_0(%arg0: i32, %arg1: i32, %arg2: i32) -> (i32, i32, i32) {
    %c0_i32 = arith.constant 0 : i32
    %c0_i32_0 = arith.constant 0 : i32
    return %arg0, %arg2, %c0_i32 : i32, i32, i32
  }
  func.func @transform_1(%arg0: i32, %arg1: i32, %arg2: i32) -> (i32, i32, i32, i32) {
    %c0_i32 = arith.constant 0 : i32
    %c0_i32_0 = arith.constant 0 : i32
    return %arg0, %arg1, %arg2, %c0_i32 : i32, i32, i32, i32
  }
  func.func @transform_2(%arg0: i32, %arg1: i32, %arg2: i32) -> (i32, i32, i32, i32) {
    %c0_i32 = arith.constant 0 : i32
    %c0_i32_0 = arith.constant 0 : i32
    %c0_i32_1 = arith.constant 0 : i32
    return %arg0, %arg1, %c0_i32, %c0_i32_0 : i32, i32, i32, i32
  }
  func.func @transform_3(%arg0: i32, %arg1: i32, %arg2: i32) -> (i32, i32, i32, i32) {
    %c0_i32 = arith.constant 0 : i32
    %c0_i32_0 = arith.constant 0 : i32
    %c0_i32_1 = arith.constant 0 : i32
    return %arg0, %arg1, %c0_i32, %c0_i32_0 : i32, i32, i32, i32
  }
  func.func @transform_4(%arg0: i32, %arg1: i32, %arg2: i32) -> (i32, i32, i32, i32) {
    %c0_i32 = arith.constant 0 : i32
    %c0_i32_0 = arith.constant 0 : i32
    return %arg1, %arg0, %arg2, %c0_i32 : i32, i32, i32, i32
  }
  func.func @transform_5(%arg0: i32, %arg1: i32, %arg2: i32) -> (i32, i32, i32, i32) {
    %c0_i32 = arith.constant 0 : i32
    %c0_i32_0 = arith.constant 0 : i32
    return %arg1, %arg0, %arg2, %c0_i32 : i32, i32, i32, i32
  }
  func.func @transform_6(%arg0: i32, %arg1: i32, %arg2: i32) -> (i32, i32, i32, i32) {
    %c0_i32 = arith.constant 0 : i32
    %c0_i32_0 = arith.constant 0 : i32
    return %arg0, %arg1, %arg2, %c0_i32 : i32, i32, i32, i32
  }
}

module attributes {stable_mosaic.version = 11 : i64} {
  func.func @_qkv_sigma_kernel(%arg0: i32, %arg1: i32, %arg2: memref<1x8x32xf32, #tpu.memory_space<vmem>>, %arg3: memref<32x32xbf16, #tpu.memory_space<vmem>>, %arg4: memref<32x32xbf16, #tpu.memory_space<vmem>>, %arg5: memref<32x32xbf16, #tpu.memory_space<vmem>>, %arg6: memref<32x128xbf16, #tpu.memory_space<vmem>>, %arg7: memref<1x4x8x8xbf16, #tpu.memory_space<vmem>>, %arg8: memref<1x4x8x8xbf16, #tpu.memory_space<vmem>>, %arg9: memref<1x4x8x8xbf16, #tpu.memory_space<vmem>>, %arg10: memref<1x8x128xf32, #tpu.memory_space<vmem>>) attributes {dimension_semantics = [#tpu.dimension_semantics<parallel>, #tpu.dimension_semantics<parallel>], iteration_bounds = array<i64: 2, 1>, scalar_prefetch = 0 : i64, scratch_operands = 0 : i64, tpu.core_type = #tpu.core_type<tc>, window_params = [{transform_indices = @transform_0, window_bounds = array<i64: 1, 8, 32>}, {pipeline_mode = #tpu.pipeline_mode<synchronous>, transform_indices = @transform_1, window_bounds = array<i64: 32, 32>}, {pipeline_mode = #tpu.pipeline_mode<synchronous>, transform_indices = @transform_2, window_bounds = array<i64: 32, 32>}, {pipeline_mode = #tpu.pipeline_mode<synchronous>, transform_indices = @transform_3, window_bounds = array<i64: 32, 32>}, {pipeline_mode = #tpu.pipeline_mode<synchronous>, transform_indices = @transform_4, window_bounds = array<i64: 32, 128>}, {transform_indices = @transform_5, window_bounds = array<i64: 1, 4, 8, 8>}, {transform_indices = @transform_6, window_bounds = array<i64: 1, 4, 8, 8>}, {transform_indices = @transform_7, window_bounds = array<i64: 1, 4, 8, 8>}, {transform_indices = @transform_8, window_bounds = array<i64: 1, 8, 128>}]} {
    %c0 = arith.constant 0 : index
    %c0_0 = arith.constant 0 : index
    %c0_1 = arith.constant 0 : index
    %0 = vector.load %arg2[%c0, %c0_0, %c0_1] : memref<1x8x32xf32, #tpu.memory_space<vmem>>, vector<1x8x32xf32>
    %1 = vector.shape_cast %0 : vector<1x8x32xf32> to vector<8x32xf32>
    %2 = arith.truncf %1 : vector<8x32xf32> to vector<8x32xbf16>
    %c0_2 = arith.constant 0 : index
    %c0_3 = arith.constant 0 : index
    %3 = vector.load %arg6[%c0_2, %c0_3] : memref<32x128xbf16, #tpu.memory_space<vmem>>, vector<32x128xbf16>
    %cst = arith.constant dense<0.000000e+00> : vector<8x128xf32>
    %4 = tpu.matmul %2, %3, %cst {dimension_numbers = #tpu.dot_dimension_numbers<[1], [0], [0], [1], [0, 0, 1, 1], [], []>} : vector<8x32xbf16>, vector<32x128xbf16>, vector<8x128xf32> -> vector<8x128xf32>
    %c0_4 = arith.constant 0 : index
    %c0_5 = arith.constant 0 : index
    %c0_6 = arith.constant 0 : index
    %5 = vector.load %arg10[%c0_4, %c0_5, %c0_6] : memref<1x8x128xf32, #tpu.memory_space<vmem>>, vector<1x8x128xf32>
    %6 = vector.shape_cast %5 : vector<1x8x128xf32> to vector<8x128xf32>
    %7 = vector.shape_cast %4 : vector<8x128xf32> to vector<1x8x128xf32>
    tpu.vector_store %arg10[%c0_4, %c0_5, %c0_6], %7 {strides = array<i32>} : memref<1x8x128xf32, #tpu.memory_space<vmem>>, vector<1x8x128xf32>,
    %c0_7 = arith.constant 0 : index
    %c0_8 = arith.constant 0 : index
    %8 = vector.load %arg3[%c0_7, %c0_8] : memref<32x32xbf16, #tpu.memory_space<vmem>>, vector<32x8xbf16>
    %cst_9 = arith.constant dense<0.000000e+00> : vector<8x8xf32>
    %9 = tpu.matmul %2, %8, %cst_9 {dimension_numbers = #tpu.dot_dimension_numbers<[1], [0], [0], [1], [0, 0, 1, 1], [], []>} : vector<8x32xbf16>, vector<32x8xbf16>, vector<8x8xf32> -> vector<8x8xf32>
    %10 = arith.truncf %9 : vector<8x8xf32> to vector<8x8xbf16>
    %c0_10 = arith.constant 0 : index
    %c0_11 = arith.constant 0 : index
    %c0_12 = arith.constant 0 : index
    %c0_13 = arith.constant 0 : index
    %11 = vector.load %arg7[%c0_10, %c0_11, %c0_12, %c0_13] : memref<1x4x8x8xbf16, #tpu.memory_space<vmem>>, vector<1x1x8x8xbf16>
    %12 = vector.shape_cast %11 : vector<1x1x8x8xbf16> to vector<8x8xbf16>
    %13 = vector.shape_cast %10 : vector<8x8xbf16> to vector<1x1x8x8xbf16>
    tpu.vector_store %arg7[%c0_10, %c0_11, %c0_12, %c0_13], %13 {strides = array<i32>} : memref<1x4x8x8xbf16, #tpu.memory_space<vmem>>, vector<1x1x8x8xbf16>,
    %c0_14 = arith.constant 0 : index
    %c0_15 = arith.constant 0 : index
    %14 = vector.load %arg4[%c0_14, %c0_15] : memref<32x32xbf16, #tpu.memory_space<vmem>>, vector<32x8xbf16>
    %cst_16 = arith.constant dense<0.000000e+00> : vector<8x8xf32>
    %15 = tpu.matmul %2, %14, %cst_16 {dimension_numbers = #tpu.dot_dimension_numbers<[1], [0], [0], [1], [0, 0, 1, 1], [], []>} : vector<8x32xbf16>, vector<32x8xbf16>, vector<8x8xf32> -> vector<8x8xf32>
    %16 = arith.truncf %15 : vector<8x8xf32> to vector<8x8xbf16>
    %c0_17 = arith.constant 0 : index
    %c0_18 = arith.constant 0 : index
    %c0_19 = arith.constant 0 : index
    %c0_20 = arith.constant 0 : index
    %17 = vector.load %arg8[%c0_17, %c0_18, %c0_19, %c0_20] : memref<1x4x8x8xbf16, #tpu.memory_space<vmem>>, vector<1x1x8x8xbf16>
    %18 = vector.shape_cast %17 : vector<1x1x8x8xbf16> to vector<8x8xbf16>
    %19 = vector.shape_cast %16 : vector<8x8xbf16> to vector<1x1x8x8xbf16>
    tpu.vector_store %arg8[%c0_17, %c0_18, %c0_19, %c0_20], %19 {strides = array<i32>} : memref<1x4x8x8xbf16, #tpu.memory_space<vmem>>, vector<1x1x8x8xbf16>,
    %c0_21 = arith.constant 0 : index
    %c0_22 = arith.constant 0 : index
    %20 = vector.load %arg5[%c0_21, %c0_22] : memref<32x32xbf16, #tpu.memory_space<vmem>>, vector<32x8xbf16>
    %cst_23 = arith.constant dense<0.000000e+00> : vector<8x8xf32>
    %21 = tpu.matmul %2, %20, %cst_23 {dimension_numbers = #tpu.dot_dimension_numbers<[1], [0], [0], [1], [0, 0, 1, 1], [], []>} : vector<8x32xbf16>, vector<32x8xbf16>, vector<8x8xf32> -> vector<8x8xf32>
    %22 = arith.truncf %21 : vector<8x8xf32> to vector<8x8xbf16>
    %c0_24 = arith.constant 0 : index
    %c0_25 = arith.constant 0 : index
    %c0_26 = arith.constant 0 : index
    %c0_27 = arith.constant 0 : index
    %23 = vector.load %arg9[%c0_24, %c0_25, %c0_26, %c0_27] : memref<1x4x8x8xbf16, #tpu.memory_space<vmem>>, vector<1x1x8x8xbf16>
    %24 = vector.shape_cast %23 : vector<1x1x8x8xbf16> to vector<8x8xbf16>
    %25 = vector.shape_cast %22 : vector<8x8xbf16> to vector<1x1x8x8xbf16>
    tpu.vector_store %arg9[%c0_24, %c0_25, %c0_26, %c0_27], %25 {strides = array<i32>} : memref<1x4x8x8xbf16, #tpu.memory_space<vmem>>, vector<1x1x8x8xbf16>,
    %c0_28 = arith.constant 0 : index
    %c8 = arith.constant 8 : index
    %26 = vector.load %arg3[%c0_28, %c8] : memref<32x32xbf16, #tpu.memory_space<vmem>>, vector<32x8xbf16>
    %cst_29 = arith.constant dense<0.000000e+00> : vector<8x8xf32>
    %27 = tpu.matmul %2, %26, %cst_29 {dimension_numbers = #tpu.dot_dimension_numbers<[1], [0], [0], [1], [0, 0, 1, 1], [], []>} : vector<8x32xbf16>, vector<32x8xbf16>, vector<8x8xf32> -> vector<8x8xf32>
    %28 = arith.truncf %27 : vector<8x8xf32> to vector<8x8xbf16>
    %c0_30 = arith.constant 0 : index
    %c1 = arith.constant 1 : index
    %c0_31 = arith.constant 0 : index
    %c0_32 = arith.constant 0 : index
    %29 = vector.load %arg7[%c0_30, %c1, %c0_31, %c0_32] : memref<1x4x8x8xbf16, #tpu.memory_space<vmem>>, vector<1x1x8x8xbf16>
    %30 = vector.shape_cast %29 : vector<1x1x8x8xbf16> to vector<8x8xbf16>
    %31 = vector.shape_cast %28 : vector<8x8xbf16> to vector<1x1x8x8xbf16>
    tpu.vector_store %arg7[%c0_30, %c1, %c0_31, %c0_32], %31 {strides = array<i32>} : memref<1x4x8x8xbf16, #tpu.memory_space<vmem>>, vector<1x1x8x8xbf16>,
    %c0_33 = arith.constant 0 : index
    %c8_34 = arith.constant 8 : index
    %32 = vector.load %arg4[%c0_33, %c8_34] : memref<32x32xbf16, #tpu.memory_space<vmem>>, vector<32x8xbf16>
    %cst_35 = arith.constant dense<0.000000e+00> : vector<8x8xf32>
    %33 = tpu.matmul %2, %32, %cst_35 {dimension_numbers = #tpu.dot_dimension_numbers<[1], [0], [0], [1], [0, 0, 1, 1], [], []>} : vector<8x32xbf16>, vector<32x8xbf16>, vector<8x8xf32> -> vector<8x8xf32>
    %34 = arith.truncf %33 : vector<8x8xf32> to vector<8x8xbf16>
    %c0_36 = arith.constant 0 : index
    %c1_37 = arith.constant 1 : index
    %c0_38 = arith.constant 0 : index
    %c0_39 = arith.constant 0 : index
    %35 = vector.load %arg8[%c0_36, %c1_37, %c0_38, %c0_39] : memref<1x4x8x8xbf16, #tpu.memory_space<vmem>>, vector<1x1x8x8xbf16>
    %36 = vector.shape_cast %35 : vector<1x1x8x8xbf16> to vector<8x8xbf16>
    %37 = vector.shape_cast %34 : vector<8x8xbf16> to vector<1x1x8x8xbf16>
    tpu.vector_store %arg8[%c0_36, %c1_37, %c0_38, %c0_39], %37 {strides = array<i32>} : memref<1x4x8x8xbf16, #tpu.memory_space<vmem>>, vector<1x1x8x8xbf16>,
    %c0_40 = arith.constant 0 : index
    %c8_41 = arith.constant 8 : index
    %38 = vector.load %arg5[%c0_40, %c8_41] : memref<32x32xbf16, #tpu.memory_space<vmem>>, vector<32x8xbf16>
    %cst_42 = arith.constant dense<0.000000e+00> : vector<8x8xf32>
    %39 = tpu.matmul %2, %38, %cst_42 {dimension_numbers = #tpu.dot_dimension_numbers<[1], [0], [0], [1], [0, 0, 1, 1], [], []>} : vector<8x32xbf16>, vector<32x8xbf16>, vector<8x8xf32> -> vector<8x8xf32>
    %40 = arith.truncf %39 : vector<8x8xf32> to vector<8x8xbf16>
    %c0_43 = arith.constant 0 : index
    %c1_44 = arith.constant 1 : index
    %c0_45 = arith.constant 0 : index
    %c0_46 = arith.constant 0 : index
    %41 = vector.load %arg9[%c0_43, %c1_44, %c0_45, %c0_46] : memref<1x4x8x8xbf16, #tpu.memory_space<vmem>>, vector<1x1x8x8xbf16>
    %42 = vector.shape_cast %41 : vector<1x1x8x8xbf16> to vector<8x8xbf16>
    %43 = vector.shape_cast %40 : vector<8x8xbf16> to vector<1x1x8x8xbf16>
    tpu.vector_store %arg9[%c0_43, %c1_44, %c0_45, %c0_46], %43 {strides = array<i32>} : memref<1x4x8x8xbf16, #tpu.memory_space<vmem>>, vector<1x1x8x8xbf16>,
    %c0_47 = arith.constant 0 : index
    %c16 = arith.constant 16 : index
    %44 = vector.load %arg3[%c0_47, %c16] : memref<32x32xbf16, #tpu.memory_space<vmem>>, vector<32x8xbf16>
    %cst_48 = arith.constant dense<0.000000e+00> : vector<8x8xf32>
    %45 = tpu.matmul %2, %44, %cst_48 {dimension_numbers = #tpu.dot_dimension_numbers<[1], [0], [0], [1], [0, 0, 1, 1], [], []>} : vector<8x32xbf16>, vector<32x8xbf16>, vector<8x8xf32> -> vector<8x8xf32>
    %46 = arith.truncf %45 : vector<8x8xf32> to vector<8x8xbf16>
    %c0_49 = arith.constant 0 : index
    %c2 = arith.constant 2 : index
    %c0_50 = arith.constant 0 : index
    %c0_51 = arith.constant 0 : index
    %47 = vector.load %arg7[%c0_49, %c2, %c0_50, %c0_51] : memref<1x4x8x8xbf16, #tpu.memory_space<vmem>>, vector<1x1x8x8xbf16>
    %48 = vector.shape_cast %47 : vector<1x1x8x8xbf16> to vector<8x8xbf16>
    %49 = vector.shape_cast %46 : vector<8x8xbf16> to vector<1x1x8x8xbf16>
    tpu.vector_store %arg7[%c0_49, %c2, %c0_50, %c0_51], %49 {strides = array<i32>} : memref<1x4x8x8xbf16, #tpu.memory_space<vmem>>, vector<1x1x8x8xbf16>,
    %c0_52 = arith.constant 0 : index
    %c16_53 = arith.constant 16 : index
    %50 = vector.load %arg4[%c0_52, %c16_53] : memref<32x32xbf16, #tpu.memory_space<vmem>>, vector<32x8xbf16>
    %cst_54 = arith.constant dense<0.000000e+00> : vector<8x8xf32>
    %51 = tpu.matmul %2, %50, %cst_54 {dimension_numbers = #tpu.dot_dimension_numbers<[1], [0], [0], [1], [0, 0, 1, 1], [], []>} : vector<8x32xbf16>, vector<32x8xbf16>, vector<8x8xf32> -> vector<8x8xf32>
    %52 = arith.truncf %51 : vector<8x8xf32> to vector<8x8xbf16>
    %c0_55 = arith.constant 0 : index
    %c2_56 = arith.constant 2 : index
    %c0_57 = arith.constant 0 : index
    %c0_58 = arith.constant 0 : index
    %53 = vector.load %arg8[%c0_55, %c2_56, %c0_57, %c0_58] : memref<1x4x8x8xbf16, #tpu.memory_space<vmem>>, vector<1x1x8x8xbf16>
    %54 = vector.shape_cast %53 : vector<1x1x8x8xbf16> to vector<8x8xbf16>
    %55 = vector.shape_cast %52 : vector<8x8xbf16> to vector<1x1x8x8xbf16>
    tpu.vector_store %arg8[%c0_55, %c2_56, %c0_57, %c0_58], %55 {strides = array<i32>} : memref<1x4x8x8xbf16, #tpu.memory_space<vmem>>, vector<1x1x8x8xbf16>,
    %c0_59 = arith.constant 0 : index
    %c16_60 = arith.constant 16 : index
    %56 = vector.load %arg5[%c0_59, %c16_60] : memref<32x32xbf16, #tpu.memory_space<vmem>>, vector<32x8xbf16>
    %cst_61 = arith.constant dense<0.000000e+00> : vector<8x8xf32>
    %57 = tpu.matmul %2, %56, %cst_61 {dimension_numbers = #tpu.dot_dimension_numbers<[1], [0], [0], [1], [0, 0, 1, 1], [], []>} : vector<8x32xbf16>, vector<32x8xbf16>, vector<8x8xf32> -> vector<8x8xf32>
    %58 = arith.truncf %57 : vector<8x8xf32> to vector<8x8xbf16>
    %c0_62 = arith.constant 0 : index
    %c2_63 = arith.constant 2 : index
    %c0_64 = arith.constant 0 : index
    %c0_65 = arith.constant 0 : index
    %59 = vector.load %arg9[%c0_62, %c2_63, %c0_64, %c0_65] : memref<1x4x8x8xbf16, #tpu.memory_space<vmem>>, vector<1x1x8x8xbf16>
    %60 = vector.shape_cast %59 : vector<1x1x8x8xbf16> to vector<8x8xbf16>
    %61 = vector.shape_cast %58 : vector<8x8xbf16> to vector<1x1x8x8xbf16>
    tpu.vector_store %arg9[%c0_62, %c2_63, %c0_64, %c0_65], %61 {strides = array<i32>} : memref<1x4x8x8xbf16, #tpu.memory_space<vmem>>, vector<1x1x8x8xbf16>,
    %c0_66 = arith.constant 0 : index
    %c24 = arith.constant 24 : index
    %62 = vector.load %arg3[%c0_66, %c24] : memref<32x32xbf16, #tpu.memory_space<vmem>>, vector<32x8xbf16>
    %cst_67 = arith.constant dense<0.000000e+00> : vector<8x8xf32>
    %63 = tpu.matmul %2, %62, %cst_67 {dimension_numbers = #tpu.dot_dimension_numbers<[1], [0], [0], [1], [0, 0, 1, 1], [], []>} : vector<8x32xbf16>, vector<32x8xbf16>, vector<8x8xf32> -> vector<8x8xf32>
    %64 = arith.truncf %63 : vector<8x8xf32> to vector<8x8xbf16>
    %c0_68 = arith.constant 0 : index
    %c3 = arith.constant 3 : index
    %c0_69 = arith.constant 0 : index
    %c0_70 = arith.constant 0 : index
    %65 = vector.load %arg7[%c0_68, %c3, %c0_69, %c0_70] : memref<1x4x8x8xbf16, #tpu.memory_space<vmem>>, vector<1x1x8x8xbf16>
    %66 = vector.shape_cast %65 : vector<1x1x8x8xbf16> to vector<8x8xbf16>
    %67 = vector.shape_cast %64 : vector<8x8xbf16> to vector<1x1x8x8xbf16>
    tpu.vector_store %arg7[%c0_68, %c3, %c0_69, %c0_70], %67 {strides = array<i32>} : memref<1x4x8x8xbf16, #tpu.memory_space<vmem>>, vector<1x1x8x8xbf16>,
    %c0_71 = arith.constant 0 : index
    %c24_72 = arith.constant 24 : index
    %68 = vector.load %arg4[%c0_71, %c24_72] : memref<32x32xbf16, #tpu.memory_space<vmem>>, vector<32x8xbf16>
    %cst_73 = arith.constant dense<0.000000e+00> : vector<8x8xf32>
    %69 = tpu.matmul %2, %68, %cst_73 {dimension_numbers = #tpu.dot_dimension_numbers<[1], [0], [0], [1], [0, 0, 1, 1], [], []>} : vector<8x32xbf16>, vector<32x8xbf16>, vector<8x8xf32> -> vector<8x8xf32>
    %70 = arith.truncf %69 : vector<8x8xf32> to vector<8x8xbf16>
    %c0_74 = arith.constant 0 : index
    %c3_75 = arith.constant 3 : index
    %c0_76 = arith.constant 0 : index
    %c0_77 = arith.constant 0 : index
    %71 = vector.load %arg8[%c0_74, %c3_75, %c0_76, %c0_77] : memref<1x4x8x8xbf16, #tpu.memory_space<vmem>>, vector<1x1x8x8xbf16>
    %72 = vector.shape_cast %71 : vector<1x1x8x8xbf16> to vector<8x8xbf16>
    %73 = vector.shape_cast %70 : vector<8x8xbf16> to vector<1x1x8x8xbf16>
    tpu.vector_store %arg8[%c0_74, %c3_75, %c0_76, %c0_77], %73 {strides = array<i32>} : memref<1x4x8x8xbf16, #tpu.memory_space<vmem>>, vector<1x1x8x8xbf16>,
    %c0_78 = arith.constant 0 : index
    %c24_79 = arith.constant 24 : index
    %74 = vector.load %arg5[%c0_78, %c24_79] : memref<32x32xbf16, #tpu.memory_space<vmem>>, vector<32x8xbf16>
    %cst_80 = arith.constant dense<0.000000e+00> : vector<8x8xf32>
    %75 = tpu.matmul %2, %74, %cst_80 {dimension_numbers = #tpu.dot_dimension_numbers<[1], [0], [0], [1], [0, 0, 1, 1], [], []>} : vector<8x32xbf16>, vector<32x8xbf16>, vector<8x8xf32> -> vector<8x8xf32>
    %76 = arith.truncf %75 : vector<8x8xf32> to vector<8x8xbf16>
    %c0_81 = arith.constant 0 : index
    %c3_82 = arith.constant 3 : index
    %c0_83 = arith.constant 0 : index
    %c0_84 = arith.constant 0 : index
    %77 = vector.load %arg9[%c0_81, %c3_82, %c0_83, %c0_84] : memref<1x4x8x8xbf16, #tpu.memory_space<vmem>>, vector<1x1x8x8xbf16>
    %78 = vector.shape_cast %77 : vector<1x1x8x8xbf16> to vector<8x8xbf16>
    %79 = vector.shape_cast %76 : vector<8x8xbf16> to vector<1x1x8x8xbf16>
    tpu.vector_store %arg9[%c0_81, %c3_82, %c0_83, %c0_84], %79 {strides = array<i32>} : memref<1x4x8x8xbf16, #tpu.memory_space<vmem>>, vector<1x1x8x8xbf16>,
    return
  }
  func.func @transform_0(%arg0: i32, %arg1: i32) -> (i32, i32, i32) {
    %c0_i32 = arith.constant 0 : i32
    %c0_i32_0 = arith.constant 0 : i32
    return %arg0, %arg1, %c0_i32 : i32, i32, i32
  }
  func.func @transform_1(%arg0: i32, %arg1: i32) -> (i32, i32) {
    %c0_i32 = arith.constant 0 : i32
    %c0_i32_0 = arith.constant 0 : i32
    %c0_i32_1 = arith.constant 0 : i32
    return %c0_i32, %c0_i32_0 : i32, i32
  }
  func.func @transform_2(%arg0: i32, %arg1: i32) -> (i32, i32) {
    %c0_i32 = arith.constant 0 : i32
    %c0_i32_0 = arith.constant 0 : i32
    %c0_i32_1 = arith.constant 0 : i32
    return %c0_i32, %c0_i32_0 : i32, i32
  }
  func.func @transform_3(%arg0: i32, %arg1: i32) -> (i32, i32) {
    %c0_i32 = arith.constant 0 : i32
    %c0_i32_0 = arith.constant 0 : i32
    %c0_i32_1 = arith.constant 0 : i32
    return %c0_i32, %c0_i32_0 : i32, i32
  }
  func.func @transform_4(%arg0: i32, %arg1: i32) -> (i32, i32) {
    %c0_i32 = arith.constant 0 : i32
    %c0_i32_0 = arith.constant 0 : i32
    %c0_i32_1 = arith.constant 0 : i32
    return %c0_i32, %c0_i32_0 : i32, i32
  }
  func.func @transform_5(%arg0: i32, %arg1: i32) -> (i32, i32, i32, i32) {
    %c0_i32 = arith.constant 0 : i32
    %c0_i32_0 = arith.constant 0 : i32
    %c0_i32_1 = arith.constant 0 : i32
    return %arg0, %c0_i32, %arg1, %c0_i32_0 : i32, i32, i32, i32
  }
  func.func @transform_6(%arg0: i32, %arg1: i32) -> (i32, i32, i32, i32) {
    %c0_i32 = arith.constant 0 : i32
    %c0_i32_0 = arith.constant 0 : i32
    %c0_i32_1 = arith.constant 0 : i32
    return %arg0, %c0_i32, %arg1, %c0_i32_0 : i32, i32, i32, i32
  }
  func.func @transform_7(%arg0: i32, %arg1: i32) -> (i32, i32, i32, i32) {
    %c0_i32 = arith.constant 0 : i32
    %c0_i32_0 = arith.constant 0 : i32
    %c0_i32_1 = arith.constant 0 : i32
    return %arg0, %c0_i32, %arg1, %c0_i32_0 : i32, i32, i32, i32
  }
  func.func @transform_8(%arg0: i32, %arg1: i32) -> (i32, i32, i32) {
    %c0_i32 = arith.constant 0 : i32
    %c0_i32_0 = arith.constant 0 : i32
    return %arg0, %arg1, %c0_i32 : i32, i32, i32
  }
}

module attributes {stable_mosaic.version = 11 : i64} {
  func.func @_dense_block_kernel(%arg0: i32, %arg1: i32, %arg2: memref<1x4x8x8xbf16, #tpu.memory_space<vmem>>, %arg3: memref<32x32xbf16, #tpu.memory_space<vmem>>, %arg4: memref<1x8x32xf32, #tpu.memory_space<vmem>>, %arg5: memref<1x32xf32, #tpu.memory_space<vmem>>, %arg6: memref<1x32xf32, #tpu.memory_space<vmem>>, %arg7: memref<32x128xbf16, #tpu.memory_space<vmem>>, %arg8: memref<1x128xf32, #tpu.memory_space<vmem>>, %arg9: memref<128x32xbf16, #tpu.memory_space<vmem>>, %arg10: memref<1x32xf32, #tpu.memory_space<vmem>>, %arg11: memref<1x32xf32, #tpu.memory_space<vmem>>, %arg12: memref<1x32xf32, #tpu.memory_space<vmem>>, %arg13: memref<1x8x32xf32, #tpu.memory_space<vmem>>) attributes {dimension_semantics = [#tpu.dimension_semantics<parallel>, #tpu.dimension_semantics<parallel>], iteration_bounds = array<i64: 2, 1>, scalar_prefetch = 0 : i64, scratch_operands = 0 : i64, tpu.core_type = #tpu.core_type<tc>, window_params = [{transform_indices = @transform_0, window_bounds = array<i64: 1, 4, 8, 8>}, {pipeline_mode = #tpu.pipeline_mode<synchronous>, transform_indices = @transform_1, window_bounds = array<i64: 32, 32>}, {transform_indices = @transform_2, window_bounds = array<i64: 1, 8, 32>}, {pipeline_mode = #tpu.pipeline_mode<synchronous>, transform_indices = @transform_3, window_bounds = array<i64: 1, 32>}, {pipeline_mode = #tpu.pipeline_mode<synchronous>, transform_indices = @transform_4, window_bounds = array<i64: 1, 32>}, {pipeline_mode = #tpu.pipeline_mode<synchronous>, transform_indices = @transform_5, window_bounds = array<i64: 32, 128>}, {pipeline_mode = #tpu.pipeline_mode<synchronous>, transform_indices = @transform_6, window_bounds = array<i64: 1, 128>}, {pipeline_mode = #tpu.pipeline_mode<synchronous>, transform_indices = @transform_7, window_bounds = array<i64: 128, 32>}, {pipeline_mode = #tpu.pipeline_mode<synchronous>, transform_indices = @transform_8, window_bounds = array<i64: 1, 32>}, {pipeline_mode = #tpu.pipeline_mode<synchronous>, transform_indices = @transform_9, window_bounds = array<i64: 1, 32>}, {pipeline_mode = #tpu.pipeline_mode<synchronous>, transform_indices = @transform_10, window_bounds = array<i64: 1, 32>}, {transform_indices = @transform_11, window_bounds = array<i64: 1, 8, 32>}]} {
    %c0 = arith.constant 0 : index
    %c0_0 = arith.constant 0 : index
    %c0_1 = arith.constant 0 : index
    %c0_2 = arith.constant 0 : index
    %0 = vector.load %arg2[%c0, %c0_0, %c0_1, %c0_2] : memref<1x4x8x8xbf16, #tpu.memory_space<vmem>>, vector<1x1x8x8xbf16>
    %1 = vector.shape_cast %0 : vector<1x1x8x8xbf16> to vector<8x8xbf16>
    %c0_3 = arith.constant 0 : index
    %c0_4 = arith.constant 0 : index
    %2 = vector.load %arg3[%c0_3, %c0_4] : memref<32x32xbf16, #tpu.memory_space<vmem>>, vector<8x32xbf16>
    %cst = arith.constant dense<0.000000e+00> : vector<8x32xf32>
    %3 = tpu.matmul %1, %2, %cst {dimension_numbers = #tpu.dot_dimension_numbers<[1], [0], [0], [1], [0, 0, 1, 1], [], []>} : vector<8x8xbf16>, vector<8x32xbf16>, vector<8x32xf32> -> vector<8x32xf32>
    %c0_5 = arith.constant 0 : index
    %c1 = arith.constant 1 : index
    %c0_6 = arith.constant 0 : index
    %c0_7 = arith.constant 0 : index
    %4 = vector.load %arg2[%c0_5, %c1, %c0_6, %c0_7] : memref<1x4x8x8xbf16, #tpu.memory_space<vmem>>, vector<1x1x8x8xbf16>
    %5 = vector.shape_cast %4 : vector<1x1x8x8xbf16> to vector<8x8xbf16>
    %c8 = arith.constant 8 : index
    %c0_8 = arith.constant 0 : index
    %6 = vector.load %arg3[%c8, %c0_8] : memref<32x32xbf16, #tpu.memory_space<vmem>>, vector<8x32xbf16>
    %cst_9 = arith.constant dense<0.000000e+00> : vector<8x32xf32>
    %7 = tpu.matmul %5, %6, %cst_9 {dimension_numbers = #tpu.dot_dimension_numbers<[1], [0], [0], [1], [0, 0, 1, 1], [], []>} : vector<8x8xbf16>, vector<8x32xbf16>, vector<8x32xf32> -> vector<8x32xf32>
    %8 = arith.addf %3, %7 : vector<8x32xf32>
    %c0_10 = arith.constant 0 : index
    %c2 = arith.constant 2 : index
    %c0_11 = arith.constant 0 : index
    %c0_12 = arith.constant 0 : index
    %9 = vector.load %arg2[%c0_10, %c2, %c0_11, %c0_12] : memref<1x4x8x8xbf16, #tpu.memory_space<vmem>>, vector<1x1x8x8xbf16>
    %10 = vector.shape_cast %9 : vector<1x1x8x8xbf16> to vector<8x8xbf16>
    %c16 = arith.constant 16 : index
    %c0_13 = arith.constant 0 : index
    %11 = vector.load %arg3[%c16, %c0_13] : memref<32x32xbf16, #tpu.memory_space<vmem>>, vector<8x32xbf16>
    %cst_14 = arith.constant dense<0.000000e+00> : vector<8x32xf32>
    %12 = tpu.matmul %10, %11, %cst_14 {dimension_numbers = #tpu.dot_dimension_numbers<[1], [0], [0], [1], [0, 0, 1, 1], [], []>} : vector<8x8xbf16>, vector<8x32xbf16>, vector<8x32xf32> -> vector<8x32xf32>
    %13 = arith.addf %8, %12 : vector<8x32xf32>
    %c0_15 = arith.constant 0 : index
    %c3 = arith.constant 3 : index
    %c0_16 = arith.constant 0 : index
    %c0_17 = arith.constant 0 : index
    %14 = vector.load %arg2[%c0_15, %c3, %c0_16, %c0_17] : memref<1x4x8x8xbf16, #tpu.memory_space<vmem>>, vector<1x1x8x8xbf16>
    %15 = vector.shape_cast %14 : vector<1x1x8x8xbf16> to vector<8x8xbf16>
    %c24 = arith.constant 24 : index
    %c0_18 = arith.constant 0 : index
    %16 = vector.load %arg3[%c24, %c0_18] : memref<32x32xbf16, #tpu.memory_space<vmem>>, vector<8x32xbf16>
    %cst_19 = arith.constant dense<0.000000e+00> : vector<8x32xf32>
    %17 = tpu.matmul %15, %16, %cst_19 {dimension_numbers = #tpu.dot_dimension_numbers<[1], [0], [0], [1], [0, 0, 1, 1], [], []>} : vector<8x8xbf16>, vector<8x32xbf16>, vector<8x32xf32> -> vector<8x32xf32>
    %18 = arith.addf %13, %17 : vector<8x32xf32>
    %c0_20 = arith.constant 0 : index
    %c0_21 = arith.constant 0 : index
    %c0_22 = arith.constant 0 : index
    %19 = vector.load %arg4[%c0_20, %c0_21, %c0_22] : memref<1x8x32xf32, #tpu.memory_space<vmem>>, vector<1x8x32xf32>
    %20 = vector.shape_cast %19 : vector<1x8x32xf32> to vector<8x32xf32>
    %21 = arith.addf %18, %20 : vector<8x32xf32>
    %cst_23 = arith.constant dense<0.000000e+00> : vector<8xf32>
    %22 = vector.multi_reduction <add>, %21, %cst_23 [1] : vector<8x32xf32> to vector<8xf32>
    %23 = vector.shape_cast %22 : vector<8xf32> to vector<8x1xf32>
    %cst_24 = arith.constant 3.200000e+01 : f32
    %24 = vector.broadcast %cst_24 : f32 to vector<8x1xf32>
    %25 = arith.divf %23, %24 : vector<8x1xf32>
    %26 = vector.broadcast %25 : vector<8x1xf32> to vector<8x32xf32>
    %27 = arith.subf %21, %26 : vector<8x32xf32>
    %28 = arith.mulf %27, %27 : vector<8x32xf32>
    %cst_25 = arith.constant dense<0.000000e+00> : vector<8xf32>
    %29 = vector.multi_reduction <add>, %28, %cst_25 [1] : vector<8x32xf32> to vector<8xf32>
    %30 = vector.shape_cast %29 : vector<8xf32> to vector<8x1xf32>
    %cst_26 = arith.constant 3.200000e+01 : f32
    %31 = vector.broadcast %cst_26 : f32 to vector<8x1xf32>
    %32 = arith.divf %30, %31 : vector<8x1xf32>
    %33 = vector.broadcast %25 : vector<8x1xf32> to vector<8x32xf32>
    %34 = arith.subf %21, %33 : vector<8x32xf32>
    %cst_27 = arith.constant 9.99999974E-6 : f32
    %35 = vector.broadcast %cst_27 : f32 to vector<8x1xf32>
    %36 = arith.addf %32, %35 : vector<8x1xf32>
    %37 = math.rsqrt %36 : vector<8x1xf32>
    %38 = vector.broadcast %37 : vector<8x1xf32> to vector<8x32xf32>
    %39 = arith.mulf %34, %38 : vector<8x32xf32>
    %c0_28 = arith.constant 0 : index
    %c0_29 = arith.constant 0 : index
    %40 = vector.load %arg5[%c0_28, %c0_29] : memref<1x32xf32, #tpu.memory_space<vmem>>, vector<1x32xf32>
    %41 = vector.broadcast %40 : vector<1x32xf32> to vector<8x32xf32>
    %42 = arith.mulf %39, %41 : vector<8x32xf32>
    %c0_30 = arith.constant 0 : index
    %c0_31 = arith.constant 0 : index
    %43 = vector.load %arg6[%c0_30, %c0_31] : memref<1x32xf32, #tpu.memory_space<vmem>>, vector<1x32xf32>
    %44 = vector.broadcast %43 : vector<1x32xf32> to vector<8x32xf32>
    %45 = arith.addf %42, %44 : vector<8x32xf32>
    %46 = arith.truncf %45 : vector<8x32xf32> to vector<8x32xbf16>
    %c0_32 = arith.constant 0 : index
    %c0_33 = arith.constant 0 : index
    %47 = vector.load %arg7[%c0_32, %c0_33] : memref<32x128xbf16, #tpu.memory_space<vmem>>, vector<32x128xbf16>
    %cst_34 = arith.constant dense<0.000000e+00> : vector<8x128xf32>
    %48 = tpu.matmul %46, %47, %cst_34 {dimension_numbers = #tpu.dot_dimension_numbers<[1], [0], [0], [1], [0, 0, 1, 1], [], []>} : vector<8x32xbf16>, vector<32x128xbf16>, vector<8x128xf32> -> vector<8x128xf32>
    %c0_35 = arith.constant 0 : index
    %c0_36 = arith.constant 0 : index
    %49 = vector.load %arg8[%c0_35, %c0_36] : memref<1x128xf32, #tpu.memory_space<vmem>>, vector<1x128xf32>
    %50 = vector.broadcast %49 : vector<1x128xf32> to vector<8x128xf32>
    %51 = arith.addf %48, %50 : vector<8x128xf32>
    %cst_37 = arith.constant 0.000000e+00 : f32
    %52 = vector.broadcast %cst_37 : f32 to vector<8x128xf32>
    %53 = arith.maximumf %51, %52 : vector<8x128xf32>
    %54 = arith.truncf %53 : vector<8x128xf32> to vector<8x128xbf16>
    %c0_38 = arith.constant 0 : index
    %c0_39 = arith.constant 0 : index
    %55 = vector.load %arg9[%c0_38, %c0_39] : memref<128x32xbf16, #tpu.memory_space<vmem>>, vector<128x32xbf16>
    %cst_40 = arith.constant dense<0.000000e+00> : vector<8x32xf32>
    %56 = tpu.matmul %54, %55, %cst_40 {dimension_numbers = #tpu.dot_dimension_numbers<[1], [0], [0], [1], [0, 0, 1, 1], [], []>} : vector<8x128xbf16>, vector<128x32xbf16>, vector<8x32xf32> -> vector<8x32xf32>
    %c0_41 = arith.constant 0 : index
    %c0_42 = arith.constant 0 : index
    %57 = vector.load %arg10[%c0_41, %c0_42] : memref<1x32xf32, #tpu.memory_space<vmem>>, vector<1x32xf32>
    %58 = vector.broadcast %57 : vector<1x32xf32> to vector<8x32xf32>
    %59 = arith.addf %56, %58 : vector<8x32xf32>
    %60 = arith.addf %59, %45 : vector<8x32xf32>
    %cst_43 = arith.constant dense<0.000000e+00> : vector<8xf32>
    %61 = vector.multi_reduction <add>, %60, %cst_43 [1] : vector<8x32xf32> to vector<8xf32>
    %62 = vector.shape_cast %61 : vector<8xf32> to vector<8x1xf32>
    %cst_44 = arith.constant 3.200000e+01 : f32
    %63 = vector.broadcast %cst_44 : f32 to vector<8x1xf32>
    %64 = arith.divf %62, %63 : vector<8x1xf32>
    %65 = vector.broadcast %64 : vector<8x1xf32> to vector<8x32xf32>
    %66 = arith.subf %60, %65 : vector<8x32xf32>
    %67 = arith.mulf %66, %66 : vector<8x32xf32>
    %cst_45 = arith.constant dense<0.000000e+00> : vector<8xf32>
    %68 = vector.multi_reduction <add>, %67, %cst_45 [1] : vector<8x32xf32> to vector<8xf32>
    %69 = vector.shape_cast %68 : vector<8xf32> to vector<8x1xf32>
    %cst_46 = arith.constant 3.200000e+01 : f32
    %70 = vector.broadcast %cst_46 : f32 to vector<8x1xf32>
    %71 = arith.divf %69, %70 : vector<8x1xf32>
    %72 = vector.broadcast %64 : vector<8x1xf32> to vector<8x32xf32>
    %73 = arith.subf %60, %72 : vector<8x32xf32>
    %cst_47 = arith.constant 9.99999974E-6 : f32
    %74 = vector.broadcast %cst_47 : f32 to vector<8x1xf32>
    %75 = arith.addf %71, %74 : vector<8x1xf32>
    %76 = math.rsqrt %75 : vector<8x1xf32>
    %77 = vector.broadcast %76 : vector<8x1xf32> to vector<8x32xf32>
    %78 = arith.mulf %73, %77 : vector<8x32xf32>
    %c0_48 = arith.constant 0 : index
    %c0_49 = arith.constant 0 : index
    %79 = vector.load %arg11[%c0_48, %c0_49] : memref<1x32xf32, #tpu.memory_space<vmem>>, vector<1x32xf32>
    %80 = vector.broadcast %79 : vector<1x32xf32> to vector<8x32xf32>
    %81 = arith.mulf %78, %80 : vector<8x32xf32>
    %c0_50 = arith.constant 0 : index
    %c0_51 = arith.constant 0 : index
    %82 = vector.load %arg12[%c0_50, %c0_51] : memref<1x32xf32, #tpu.memory_space<vmem>>, vector<1x32xf32>
    %83 = vector.broadcast %82 : vector<1x32xf32> to vector<8x32xf32>
    %84 = arith.addf %81, %83 : vector<8x32xf32>
    %c0_52 = arith.constant 0 : index
    %c0_53 = arith.constant 0 : index
    %c0_54 = arith.constant 0 : index
    %85 = vector.load %arg13[%c0_52, %c0_53, %c0_54] : memref<1x8x32xf32, #tpu.memory_space<vmem>>, vector<1x8x32xf32>
    %86 = vector.shape_cast %85 : vector<1x8x32xf32> to vector<8x32xf32>
    %87 = vector.shape_cast %84 : vector<8x32xf32> to vector<1x8x32xf32>
    tpu.vector_store %arg13[%c0_52, %c0_53, %c0_54], %87 {strides = array<i32>} : memref<1x8x32xf32, #tpu.memory_space<vmem>>, vector<1x8x32xf32>,
    return
  }
  func.func @transform_0(%arg0: i32, %arg1: i32) -> (i32, i32, i32, i32) {
    %c0_i32 = arith.constant 0 : i32
    %c0_i32_0 = arith.constant 0 : i32
    %c0_i32_1 = arith.constant 0 : i32
    return %arg0, %c0_i32, %arg1, %c0_i32_0 : i32, i32, i32, i32
  }
  func.func @transform_1(%arg0: i32, %arg1: i32) -> (i32, i32) {
    %c0_i32 = arith.constant 0 : i32
    %c0_i32_0 = arith.constant 0 : i32
    %c0_i32_1 = arith.constant 0 : i32
    return %c0_i32, %c0_i32_0 : i32, i32
  }
  func.func @transform_2(%arg0: i32, %arg1: i32) -> (i32, i32, i32) {
    %c0_i32 = arith.constant 0 : i32
    %c0_i32_0 = arith.constant 0 : i32
    return %arg0, %arg1, %c0_i32 : i32, i32, i32
  }
  func.func @transform_3(%arg0: i32, %arg1: i32) -> (i32, i32) {
    %c0_i32 = arith.constant 0 : i32
    %c0_i32_0 = arith.constant 0 : i32
    %c0_i32_1 = arith.constant 0 : i32
    return %c0_i32, %c0_i32_0 : i32, i32
  }
  func.func @transform_4(%arg0: i32, %arg1: i32) -> (i32, i32) {
    %c0_i32 = arith.constant 0 : i32
    %c0_i32_0 = arith.constant 0 : i32
    %c0_i32_1 = arith.constant 0 : i32
    return %c0_i32, %c0_i32_0 : i32, i32
  }
  func.func @transform_5(%arg0: i32, %arg1: i32) -> (i32, i32) {
    %c0_i32 = arith.constant 0 : i32
    %c0_i32_0 = arith.constant 0 : i32
    %c0_i32_1 = arith.constant 0 : i32
    return %c0_i32, %c0_i32_0 : i32, i32
  }
  func.func @transform_6(%arg0: i32, %arg1: i32) -> (i32, i32) {
    %c0_i32 = arith.constant 0 : i32
    %c0_i32_0 = arith.constant 0 : i32
    %c0_i32_1 = arith.constant 0 : i32
    return %c0_i32, %c0_i32_0 : i32, i32
  }
  func.func @transform_7(%arg0: i32, %arg1: i32) -> (i32, i32) {
    %c0_i32 = arith.constant 0 : i32
    %c0_i32_0 = arith.constant 0 : i32
    %c0_i32_1 = arith.constant 0 : i32
    return %c0_i32, %c0_i32_0 : i32, i32
  }
  func.func @transform_8(%arg0: i32, %arg1: i32) -> (i32, i32) {
    %c0_i32 = arith.constant 0 : i32
    %c0_i32_0 = arith.constant 0 : i32
    %c0_i32_1 = arith.constant 0 : i32
    return %c0_i32, %c0_i32_0 : i32, i32
  }
  func.func @transform_9(%arg0: i32, %arg1: i32) -> (i32, i32) {
    %c0_i32 = arith.constant 0 : i32
    %c0_i32_0 = arith.constant 0 : i32
    %c0_i32_1 = arith.constant 0 : i32
    return %c0_i32, %c0_i32_0 : i32, i32
  }
  func.func @transform_10(%arg0: i32, %arg1: i32) -> (i32, i32) {
    %c0_i32 = arith.constant 0 : i32
    %c0_i32_0 = arith.constant 0 : i32
    %c0_i32_1 = arith.constant 0 : i32
    return %c0_i32, %c0_i32_0 : i32, i32
  }
  func.func @transform_11(%arg0: i32, %arg1: i32) -> (i32, i32, i32) {
    %c0_i32 = arith.constant 0 : i32
    %c0_i32_0 = arith.constant 0 : i32
    return %arg0, %arg1, %c0_i32 : i32, i32, i32
  }
}

</mosaic_0001>

<bundles_post_ra>
// kernel: encoder_block_forward.4
= control target key start
LH: loop header
LB: loop body
LE: loop exit
PB: predicated region body
PF: predicated region fallthrough
CT: control target
= control target key end

     0   :  { %s1312_s0 = inlined_call_operand.vmem [shape: f32[2,8,128], index: 0, kind: input, shape index: {}]   ;;  %s1313_s1 = inlined_call_operand.vmem [shape: bf16[2,4,8,8], index: 1, kind: input, shape index: {}]   ;;  %s1314_s2 = inlined_call_operand.vmem [shape: bf16[2,4,8,8], index: 2, kind: input, shape index: {}]   ;;  %s1315_s3 = inlined_call_operand.vmem [shape: bf16[2,4,8,8], index: 3, kind: input, shape index: {}]   ;;  %s1316_s4 = inlined_call_operand.hbm [shape: f32[4,2,8,8], index: 4, kind: output, shape index: {0}]   ;;  %s1317_s5 = inlined_call_operand.hbm [shape: f32[4,2,8,8], index: 5, kind: output, shape index: {1}]   ;;  %s1318_s6 = inlined_call_operand.vmem [shape: bf16[2,4,8,8], index: 6, kind: output, shape index: {2}]  }
   0x1   :  { %1321 = sst [smem:[#allocation9_spill]] %s1312_s0 }
   0x2   :  { %1322 = sst [smem:[#allocation10_spill]] %s1313_s1 }
   0x3   :  { %1323 = sst [smem:[#allocation11_spill]] %s1314_s2 }
   0x4   :  { %12 = vsyncpa [#allocation3], 0 }
   0x5   :  { %14 = vsyncpa [#allocation3 + $0x1], 0 }
   0x6   :  { %15 = vsyncpa [#allocation5], 0 }
   0x7   :  { %17 = vsyncpa [#allocation5 + $0x1], 0  ;;  %s1130_s21 = smov 0   ;;  %s1132_s22 = smov 0  }
   0x8   :  { %s1134_s23 = smov 0   ;;  %s1136_s24 = smov 0  }
   0x9   :  { %s1138_s25 = smov 0   ;;  %s1140_s26 = smov 0  }
   0xa   :  { %s1142_s27 = smov 0   ;;  %s1144_s28 = smov 0  }
   0xb LB: > { %s837_s29 = sadd.s32 4294967295, %s1089_s28   ;;  %s838_s30 = sadd.s32 4294967294, %s1089_s28   ;;  %s1089_s28 = sphi %s1144_s28, %s23_s28   ;;  %s1085_s27 = sphi %s1142_s27, %s1338_s27   ;;  %s1081_s26 = sphi %s1140_s26, %s1337_s26   ;;  %s1077_s25 = sphi %s1138_s25, %s1336_s25   ;;  %s1073_s24 = sphi %s1136_s24, %s1335_s24   ;;  %s1069_s23 = sphi %s1134_s23, %s1334_s23   ;;  %s1065_s22 = sphi %s1132_s22, %s1333_s22   ;;  %s1061_s21 = sphi %s1130_s21, %s1332_s21  }
   0xc   : > { %s38_s7 = sadd.s32 1, %s1081_s26  ;;  %s42_s8 = sadd.s32 1, %s1085_s27 }
   0xd   : > { %p40_p0 = scmp.ge.s32.totalorder %s38_s7, 4  ;;  %p177_p1 = scmp.ne.s32.totalorder %s1069_s23, %s1065_s22 }
   0xe   : > { %p178_p2 = scmp.eq.s32.totalorder %s837_s29, 7  ;;  %p183_p5 = scmp.ne.s32.totalorder %s1065_s22, %s1061_s21 }
   0xf   : > { %s1340_s7 = smov (%p40_p0, %s38_s7), 0  ;;  %s1342_s8 = smov (!%p40_p0, %s42_s8), %s1085_s27 }
  0x10   : > { %s160_s9 = ssub.s32 %s1081_s26, %s1340_s7  ;;  %p1181_p3 = por %p178_p2, %p177_p1 }
  0x11   : > { %p44_p4 = scmp.ge.s32.totalorder %s1342_s8, 2  ;;  %p184_p6 = scmp.eq.s32.totalorder %s838_s30, 7 }
  0x12   : > { %p841_p7 = scmp.ge.s32.totalorder %s1089_s28, 1  ;;  %p308_p9 = scmp.lt.s32.totalorder %s1089_s28, 9 }
  0x13   : > { %s1344_s8 = smov (%p44_p4, %s1342_s8), 0  ;;  %p1190_p8 = por %p184_p6, %p183_p5 }
  0x14   : > { %1325 = sst [smem:[#allocation8_spill]] %s1344_s8  ;;  %s161_s12 = ssub.s32 %s1085_s27, %s1344_s8 }
  0x15   : > { %s167_s13 = sadd.s32 1, %s1069_s23  ;;  %s162_s14 = sor.u32 %s161_s12, %s160_s9 }
  0x16   : > { %p309_p10 = pnand %p841_p7, %p308_p9  ;;  %p165_p11 = scmp.eq.s32.totalorder %s162_s14, 0 }
  0x17   : > { %p383_p12 = scmp.lt.s32.totalorder (!%p309_p10), %s1077_s25, 1  ;;  %p392_p13 = scmp.lt.s32.totalorder (!%p309_p10), %s1073_s24, 3 }
  0x18   : > { %s1199_s15 = scalar_select %p165_p11, %s1069_s23, %s167_s13  }
  0x19   : > { %312 = sbr.rel (%p309_p10) target bundleno = 753 (0x2f1), region = 36  ;;  %s1327_s2 = sld [smem:[#allocation11_spill]] (!%p309_p10) }
  0x1a   : > { %s1328_s1 = sld [smem:[#allocation10_spill]] (!%p309_p10)  ;;  %s1229_s30 = sand.u32 (!%p309_p10), 1, %s1065_s22  }
  0x1b   : > { %s1329_s0 = sld [smem:[#allocation9_spill]] (!%p309_p10) }
  0x1e   : > { %v1091_v0 = vmov 0.0   ;;  %vm1092_vm0 = vmmov 0   ;;  %s384_s16 = scalar_select %p383_p12, %s1077_s25, 1  ;;  %vm451_vm1 = vcmask 64512   ;;  %v431_v4 = vlaneseq }
  0x1f   : > { %867 = vmatprep.subr.bf16.mxu0 %v1091_v0  ;;  %869 = vmatprep.mubr.msk.bf16.mxu0 %vm1092_vm0, %v1091_v0  ;;  %s393_s17 = scalar_select %p392_p13, %s1073_s24, 3  ;;  %v433_v5 = vstv %s1073_s24  ;;  %vm524_vm3 = vcmask 1043456  }
  0x20   : > { %873 = vmatprep.subr.bf16.mxu1 %v1091_v0  ;;  %875 = vmatprep.mubr.msk.bf16.mxu1 %vm1092_vm0, %v1091_v0  ;;  %s845_s18 = sshll.u32 %s384_s16, 2  ;;  %v432_v7 = vand.u32 127, %v431_v4  ;;  %v439_v8 = vshrl.u32 %v431_v4, 7 }
  0x21   : > { %s398_s19 = sadd.s32 %s845_s18, %s393_s17  ;;  %s844_s17 = sshll.u32 %s384_s16, 3 }
  0x22   : > { %s1205_s20 = sshll.u32 %s398_s19, 2  ;;  %s389_s8 = scalar_lea.vmem %s1329_s0, %s844_s17  ;;  %vm434_vm2 = vcmp.eq.s32.totalorder %v432_v7, %v433_v5  ;;  %v442_v9 = vsub.s32 %v439_v8, %v432_v7 }
  0x23   : > { %s408_s9 = scalar_lea.vmem %s1327_s2, %s1205_s20  ;;  %s400_s14 = scalar_lea.vmem %s1328_s1, %s1205_s20  ;;  %v430_v6 = vld [vmem:[%s389_s8] sm:$0xff] }
  0x24   : > { %v459_v1 = vld [vmem:[%s408_s9] sm:$0xf]  ;;  %v435_v10 = vsel %vm434_vm2, %v430_v6, 0.0  ;;  %v443_v19 = vcvt.s32.f32 %v442_v9  ;;  %s416_s29 = scalar_lea.vmem %s1315_s3, %s1205_s20  ;;  %s842_s9 = sshll.u32 %s1229_s30, 3 }
  0x25   : > { %v464_v2 = vsel %vm451_vm1, %v459_v1, 0  ;;  %v458_v3 = vld [vmem:[%s400_s14] sm:$0xf]  ;;  %436 = vadd.xlane.f32.xlu1 %v435_v10  ;;  %s362_s12 = scalar_lea.vmem [#allocation2], %s842_s9  ;;  %s1233_s13 = scalar_lea.vmem [#allocation4], %s842_s9 }
  0x26   : > { %868 = vmatpush3.bf16.xpose.msra.mxu0 %v464_v2  ;;  %v444_v20 = vmul.f32 -0.5, %v443_v19  ;;  %v520_v32 = vld [vmem:[%s416_s29] sm:$0xf]  ;;  %s857_s14 = sshll.u32 %s1073_s24, 1  ;;  %s604_s19 = sshll.u32 %s362_s12, 4  ;;  %s605_s19 = int_to_ptr.vmem [resolvable:$true] %s604_s19 }
  0x27   : > { %v526_v33 = vsel %vm524_vm3, %v520_v32, 0  ;;  %s1240_s17 = sadd.s32 %s1077_s25, %s857_s14  ;;  %s572_s9 = scalar_lea.sflag [#allocation3], %s1229_s30 }
  0x28   : > { %v445_v21 = vmul.f32 %v444_v20, %v443_v19  ;;  %874 = vmatpush3.bf16.msra.mxu1 %v526_v33  ;;  %s1320_s18 = sshll.u32 %s1240_s17, 7  ;;  %s967_s0 = scalar_lea.vmem %s605_s19, 128 }
  0x29   : > { %s602_s29 = scalar_lea.hbm %s1316_s4, %s1320_s18  ;;  %p968_p0 = scmp.ne.s32.totalorder %s605_s19, %s967_s0 }
  0x2a   : > { %s1093_s1 = smov [#allocation2]  }
  0x2b   : > { %p969_p1 = pnand %p968_p0, %p1181_p3  ;;  %s971_s24 = sshll.u32 %s1093_s1, 4  ;;  %s972_s24 = int_to_ptr.vmem [resolvable:$false] %s971_s24 }
  0x2c   : > { %s973_s25 = scalar_lea.vmem %s972_s24, 256  ;;  %p974_p4 = scmp.lt.s32.totalorder %s605_s19, %s972_s24 }
  0x2d   : > { %870 = vmatmul.mubr.msk.bf16.vlgmr.msra.gmra.mxu0 %vm451_vm1, %v458_v3  ;;  %p970_p2 = pneg %p969_p1  ;;  %p975_p5 = scmp.lt.s32.totalorder %s973_s25, %s967_s0 }
  0x2f   : > { %p976_p6 = por %p975_p5, %p974_p4 }
  0x31   : > { %p977_p7 = pnand %p976_p6, %p970_p2 }
  0xae   : > { %v437_v17 = vpop.xlane.xlu1 %436 }
  0xaf   : > { %v446_v18 = vmul.f32 %v437_v17, %v437_v17 }
  0xb1   : > { %957 = vrcp.f32 %v446_v18 }
  0xbe   : > { %v958_v22 = vpop.eup %957 }
  0xbf   : > { %v448_v23 = vmul.f32 %v958_v22, %v445_v21 }
  0xc1   : > { %v449_v24 = vmul.f32 1.442695, %v448_v23 }
  0xc3   : > { %959 = vpow2.f32 %v449_v24 }
  0xd0   : > { %v960_v25 = vpop.eup %959 }
  0xd1   : > { %v452_v26 = vsel %vm451_vm1, %v960_v25, 0.0 }
  0xd2   : > { %453 = vadd.xlane.f32.xlu1 %v452_v26 }
  0xed   : > { %v500_v11 = vpop.f32.mrf.mxu0 }
  0xee   : > { %v506_v12 = vmul.f32 0.35355338, %v500_v11 }
  0xef   : > { %v871_v13 = vpop.f32.mrf.mxu0 }
  0xf0   : > { %v507_v14 = vsel %vm451_vm1, %v506_v12, -inf }
  0xf1   : > { %508 = vmax.xlane.f32.xlu0 %v507_v14  ;;  %v503_v15 = vpop.f32.mrf.mxu0 }
  0xf3   : > { %v872_v16 = vpop.f32.mrf.mxu0 }
 0x15b   : > { %v454_v34 = vpop.xlane.xlu1 %453 }
 0x17a   : > { %v509_v27 = vpop.xlane.xlu0 %508 }
 0x17b   : > { %v510_v28 = vsub.f32 %v506_v12, %v509_v27 }
 0x17d   : > { %v511_v29 = vmul.f32 1.442695, %v510_v28 }
 0x17f   : > { %961 = vpow2.f32 %v511_v29 }
 0x180   : > { %963 = vrcp.f32 %v454_v34 }
 0x18c   : > { %v962_v30 = vpop.eup %961 }
 0x18d   : > { %v513_v31 = vsel %vm451_vm1, %v962_v30, 0.0  ;;  %v964_v35 = vpop.eup %963 }
 0x18e   : > { %514 = vadd.xlane.f32.xlu0 %v513_v31  ;;  %v456_v36 = vmul.f32 %v964_v35, %v960_v25 }
 0x190   : > { %457 = vst.msk [vmem:[%s362_s12] sm:$0xff] %vm451_vm1, %v456_v36 }
 0x217   : > { %v515_v37 = vpop.xlane.xlu0 %514 }
 0x218   : > { %965 = vrcp.f32 %v515_v37 }
 0x225   : > { %v966_v38 = vpop.eup %965 }
 0x226   : > { %v517_v39 = vmul.f32 %v966_v38, %v962_v30 }
 0x228   : > { %v519_v40 = vpack.c.bf16 %v517_v39, %v517_v39  ;;  %518 = vst.msk [vmem:[%s1233_s13] sm:$0xff] %vm451_vm1, %v517_v39 }
 0x22a   : > { %876 = vmatmul.mubr.msk.bf16.vlgmr.msra.gmra.mxu1 %vm451_vm1, %v519_v40 }
 0x22b   : > { %980 = shalt.err (!%p977_p7)
}
 0x22c   : > { %s981_s12 = scalar_lea.hbm %s602_s29, 128  ;;  %s985_s16 = scalar_lea.hbm %s1316_s4, 1024 }
 0x22d   : > { %p982_p9 = scmp.ne.s32.totalorder %s602_s29, %s981_s12  ;;  %p986_p12 = scmp.lt.s32.totalorder %s602_s29, %s1316_s4 }
 0x22e   : > { %p987_p13 = scmp.lt.s32.totalorder %s985_s16, %s981_s12 }
 0x22f   : > { %p983_p10 = pnand %p982_p9, %p1181_p3 }
 0x230   : > { %p988_p0 = por %p987_p13, %p986_p12 }
 0x231   : > { %p984_p11 = pneg %p983_p10 }
 0x233   : > { %p989_p1 = pnand %p988_p0, %p984_p11 }
 0x235   : > { %992 = shalt.err (!%p989_p1)
}
 0x236   : > { %879 = dma.vmem_to_hbm [thread:$0]  (%p1181_p3), %s605_s19, 128, %s602_s29, %s572_s9  }
 0x237   : > { %s1330_s0 = sshll.u32 %s1240_s17, 7  ;;  %s620_s14 = sshll.u32 %s1233_s13, 4  ;;  %s621_s14 = int_to_ptr.vmem [resolvable:$true] %s620_s14 }
 0x238   : > { %s618_s25 = scalar_lea.hbm %s1317_s5, %s1330_s0  ;;  %s577_s2 = scalar_lea.sflag [#allocation5], %s1229_s30 }
 0x239   : > { %s993_s18 = scalar_lea.vmem %s621_s14, 128  ;;  %s1094_s12 = smov [#allocation4]  }
 0x23a   : > { %p994_p2 = scmp.ne.s32.totalorder %s621_s14, %s993_s18  ;;  %s997_s8 = sshll.u32 %s1094_s12, 4  ;;  %s998_s8 = int_to_ptr.vmem [resolvable:$false] %s997_s8 }
 0x23b   : > { %s999_s16 = scalar_lea.vmem %s998_s8, 256  ;;  %p1000_p6 = scmp.lt.s32.totalorder %s621_s14, %s998_s8 }
 0x23c   : > { %p995_p4 = pnand %p994_p2, %p1181_p3  ;;  %p1001_p7 = scmp.lt.s32.totalorder %s999_s16, %s993_s18 }
 0x23e   : > { %p996_p5 = pneg %p995_p4  ;;  %p1002_p9 = por %p1001_p7, %p1000_p6 }
 0x240   : > { %p1003_p10 = pnand %p1002_p9, %p996_p5 }
 0x242   : > { %1006 = shalt.err (!%p1003_p10)
}
 0x243   : > { %s1007_s17 = scalar_lea.hbm %s618_s25, 128  ;;  %s1011_s19 = scalar_lea.hbm %s1317_s5, 1024 }
 0x244   : > { %p1008_p11 = scmp.ne.s32.totalorder %s618_s25, %s1007_s17  ;;  %p1012_p0 = scmp.lt.s32.totalorder %s618_s25, %s1317_s5 }
 0x245   : > { %p1013_p1 = scmp.lt.s32.totalorder %s1011_s19, %s1007_s17 }
 0x246   : > { %p1009_p12 = pnand %p1008_p11, %p1181_p3 }
 0x247   : > { %p1014_p2 = por %p1013_p1, %p1012_p0 }
 0x248   : > { %p1010_p13 = pneg %p1009_p12 }
 0x24a   : > { %p1015_p4 = pnand %p1014_p2, %p1010_p13 }
 0x24c   : > { %1018 = shalt.err (!%p1015_p4)
}
 0x24d   : > { %880 = dma.vmem_to_hbm [thread:$0]  (%p1181_p3), %s621_s14, 128, %s618_s25, %s577_s2   ;;  %vm569_vm4 = vcmask 60416  }
 0x24e   : > { %s427_s24 = scalar_lea.vmem %s1318_s6, %s1205_s20 }
 0x2ea   : > { %v562_v41 = vpop.f32.mrf.mxu1 }
 0x2eb   : > { %v568_v42 = vpack.c.bf16 %v562_v41, %v562_v41 }
 0x2ec   : > { %v877_v43 = vpop.f32.mrf.mxu1 }
 0x2ed   : > { %570 = vst.msk [vmem:[%s427_s24] sm:$0xf] %vm569_vm4, %v568_v42 }
 0x2ee   : > { %v565_v44 = vpop.f32.mrf.mxu1 }
 0x2f0   : > { %v878_v45 = vpop.f32.mrf.mxu1 }
 0x2f1 PF: > { %p890_p5 = scmp.ge.s32.totalorder %s1089_s28, 2  ;;  %s635_s18 = sand.u32 1, %s1061_s21  }
 0x2f2   : > { %s636_s10 = scalar_lea.sflag [#allocation3], %s635_s18 }
 0x2f3   : > { %p884_p6 = pnand %p890_p5, %p1190_p8 }
 0x2f5   : > { %p885_p3 = pneg %p884_p6 }
 0x2f7   : > { %1052 = dma.done.wait (%p885_p3), %s636_s10, 128  }
 0x2f8   : > { %1054 = vsyncadd (%p885_p3), %s636_s10, 4294967168  ;;  %s645_s20 = scalar_lea.sflag [#allocation5], %s635_s18 }
 0x2f9   : > { %1056 = dma.done.wait (%p885_p3), %s645_s20, 128  }
 0x2fa   : > { %1058 = vsyncadd (%p885_p3), %s645_s20, 4294967168  ;;  %s23_s28 = sadd.s32 1, %s1089_s28   ;;  %s1331_s14 = sld [smem:[#allocation8_spill]] }
 0x2fb   : > { %p20_p7 = scmp.ge.s32.totalorder %s23_s28, 10   ;;  %s1332_s21 = smov %s1065_s22 }
 0x2fc   : > { %s1333_s22 = smov %s1069_s23  ;;  %s1334_s23 = smov %s1199_s15 }
 0x2fd   : > { %s1335_s24 = smov %s1081_s26  ;;  %s1336_s25 = smov %s1085_s27 }
 0x2fe   : > { %s1337_s26 = smov %s1340_s7  ;;  %22 = sbr.rel (!%p20_p7) target bundleno = 11 (0xb), region = 109 }
 0x300   : > { %s1338_s27 = smov %s1331_s14 }
 0x303   :  { %664 = vsyncpa [#allocation3], 1 }
 0x304   :  { %666 = vsyncpa [#allocation3 + $0x1], 1 }
 0x305   :  { %667 = vsyncpa [#allocation5], 1 }
 0x306   :  { %669 = vsyncpa [#allocation5 + $0x1], 1 }

// kernel: encoder_block_forward.5
= control target key start
LH: loop header
LB: loop body
LE: loop exit
PB: predicated region body
PF: predicated region fallthrough
CT: control target
= control target key end

     0   :  { %s1514_s0 = inlined_call_operand.vmem [shape: bf16[2,4,8,8], index: 0, kind: input, shape index: {}]   ;;  %s1515_s1 = inlined_call_operand.vmem [shape: bf16[32,32], index: 1, kind: input, shape index: {}]   ;;  %s1516_s2 = inlined_call_operand.vmem [shape: f32[2,8,32], index: 2, kind: input, shape index: {}]   ;;  %s1517_s3 = inlined_call_operand.vmem [shape: f32[1,32], index: 3, kind: input, shape index: {}]   ;;  %s1518_s4 = inlined_call_operand.vmem [shape: f32[1,32], index: 4, kind: input, shape index: {}]   ;;  %s1519_s5 = inlined_call_operand.vmem [shape: bf16[32,128], index: 5, kind: input, shape index: {}]   ;;  %s1520_s6 = inlined_call_operand.vmem [shape: f32[1,128], index: 6, kind: input, shape index: {}]   ;;  %s1521_s7 = inlined_call_operand.vmem [shape: bf16[128,32], index: 7, kind: input, shape index: {}]   ;;  %s1522_s8 = inlined_call_operand.vmem [shape: f32[1,32], index: 8, kind: input, shape index: {}]   ;;  %s1523_s9 = inlined_call_operand.vmem [shape: f32[1,32], index: 9, kind: input, shape index: {}]   ;;  %s1524_s10 = inlined_call_operand.vmem [shape: f32[1,32], index: 10, kind: input, shape index: {}]   ;;  %s1525_s11 = inlined_call_operand.hbm [shape: f32[2,8,32], index: 11, kind: output, shape index: {}]  }
   0x1   :  { %1526 = sst [smem:[#allocation5_spill]] %s1514_s0 }
   0x2   :  { %1527 = sst [smem:[#allocation6_spill]] %s1515_s1 }
   0x3   :  { %1528 = sst [smem:[#allocation7_spill]] %s1516_s2 }
   0x4   :  { %1529 = sst [smem:[#allocation8_spill]] %s1517_s3 }
   0x5   :  { %16 = vsyncpa [#allocation3], 0 }
   0x6   :  { %18 = vsyncpa [#allocation3 + $0x1], 0  ;;  %s1308_s17 = smov 0   ;;  %s1310_s18 = smov 0  }
   0x7   :  { %s1312_s19 = smov 0   ;;  %s1314_s20 = smov 0  }
   0x8   :  { %s1316_s21 = smov 0   ;;  %s1318_s22 = smov 0  }
   0x9 LB: > { %s986_s23 = sadd.s32 4294967295, %s1243_s22   ;;  %s987_s24 = sadd.s32 4294967294, %s1243_s22   ;;  %s1243_s22 = sphi %s1318_s22, %s24_s22   ;;  %s1239_s21 = sphi %s1316_s21, %s1540_s21   ;;  %s1235_s20 = sphi %s1314_s20, %s1539_s20   ;;  %s1231_s19 = sphi %s1312_s19, %s1538_s19   ;;  %s1227_s18 = sphi %s1310_s18, %s1537_s18   ;;  %s1223_s17 = sphi %s1308_s17, %s1536_s17  }
   0xa   : > { %s36_s25 = sadd.s32 1, %s1239_s21  ;;  %s290_s26 = sadd.s32 1, %s1231_s19 }
   0xb   : > { %p38_p0 = scmp.ge.s32.totalorder %s36_s25, 2  ;;  %p300_p1 = scmp.ne.s32.totalorder %s1231_s19, %s1227_s18 }
   0xc   : > { %p301_p2 = scmp.eq.s32.totalorder %s986_s23, 1  ;;  %p306_p3 = scmp.ne.s32.totalorder %s1227_s18, %s1223_s17 }
   0xd   : > { %s1542_s25 = smov (%p38_p0, %s36_s25), 0  ;;  %p307_p5 = scmp.eq.s32.totalorder %s987_s24, 1 }
   0xe   : > { %p1348_p4 = por %p301_p2, %p300_p1  ;;  %s285_s28 = ssub.s32 %s1239_s21, %s1542_s25 }
   0xf   : > { %p990_p6 = scmp.ge.s32.totalorder %s1243_s22, 1  ;;  %p288_p7 = scmp.eq.s32.totalorder %s285_s28, 0 }
  0x10   : > { %p1355_p8 = por %p307_p5, %p306_p3  ;;  %p373_p9 = scmp.lt.s32.totalorder %s1243_s22, 3 }
  0x11   : > { %s1361_s30 = scalar_select %p288_p7, %s1231_s19, %s290_s26  }
  0x12   : > { %p374_p10 = pnand %p990_p6, %p373_p9 }
  0x13   : > { %s1532_s1 = sld [smem:[#allocation6_spill]] (!%p374_p10)  ;;  %p423_p11 = scmp.lt.s32.totalorder (!%p374_p10), %s1235_s20, 1 }
  0x14   : > { %377 = sbr.rel (%p374_p10) target bundleno = 1272 (0x4f8), region = 64  ;;  %s1533_s0 = sld [smem:[#allocation5_spill]] (!%p374_p10) }
  0x15   : > { %s1534_s2 = sld [smem:[#allocation7_spill]] (!%p374_p10)  ;;  %s420_s12 = sand.u32 (!%p374_p10), 1, %s1227_s18  }
  0x16   : > { %s1535_s3 = sld [smem:[#allocation8_spill]] (!%p374_p10)  ;;  %s1247_s15 = smov (!%p374_p10), [#allocation2]  }
  0x19   : > { %v443_v0 = vld [vmem:[%s1532_s1 + $0x4] sm:$0xf]  ;;  %vm448_vm0 = vcmask 1043456   ;;  %v1245_v1 = vmov 0.0   ;;  %vm1246_vm1 = vmmov 0   ;;  %s1375_s16 = scalar_select %p423_p11, %s1235_s20, 1 }
  0x1a   : > { %1044 = vmatprep.subr.bf16.mxu0 %v1245_v1  ;;  %v450_v2 = vsel %vm448_vm0, %v443_v0, 0  ;;  %1046 = vmatprep.mubr.msk.bf16.mxu0 %vm1246_vm1, %v1245_v1  ;;  %v440_v3 = vld [vmem:[%s1532_s1] sm:$0xf]  ;;  %v590_v4 = vld [vmem:[%s1532_s1 + $0xc] sm:$0xf]  ;;  %vm444_vm2 = vcmask 64512  }
  0x1b   : > { %1045 = vmatpush3.bf16.msra.mxu0 %v450_v2  ;;  %1062 = vmatprep.subr.bf16.mxu1 %v1245_v1  ;;  %v595_v5 = vsel %vm448_vm0, %v590_v4, 0  ;;  %s1023_s26 = sshll.u32 %s1375_s16, 4  ;;  %v496_v6 = vsel %vm448_vm0, %v440_v3, 0  ;;  %v540_v9 = vld [vmem:[%s1532_s1 + $0x8] sm:$0xf]  ;;  %s994_s23 = sshll.u32 %s1375_s16, 3 }
  0x1c   : > { %1050 = vmatprep.subr.bf16.mxu0 %v1245_v1  ;;  %1064 = vmatprep.mubr.msk.bf16.mxu1 %vm1246_vm1, %v1245_v1  ;;  %s430_s13 = scalar_lea.vmem %s1533_s0, %s1023_s26  ;;  %v545_v11 = vsel %vm448_vm0, %v540_v9, 0  ;;  %s437_s28 = scalar_lea.vmem %s1534_s2, %s994_s23  ;;  %vm640_vm3 = vcmask 261120   ;;  %v1153_v40 = vld [vmem:[%s1519_s5 + $0x8] sm:$0xff]   ;;  %v1154_v41 = vld [vmem:[%s1519_s5] sm:$0xff]   ;;  %v1155_v42 = vld [vmem:[%s1521_s7 + $0x38] sm:$0xff]  }
  0x1d   : > { %1063 = vmatpush3.bf16.msra.mxu1 %v595_v5  ;;  %v995_v7 = vld [vmem:[%s430_s13 + $0x4] sm:$0xf]  ;;  %v1000_v8 = vld [vmem:[%s430_s13 + $0xc] sm:$0xf]  ;;  %v439_v10 = vld [vmem:[%s430_s13] sm:$0xf] }
  0x1e   : > { %1076 = vmatprep.subr.bf16.mxu1 %v1245_v1  ;;  %1047 = vmatmul.mubr.msk.bf16.vlgmr.msra.gmra.mxu0 %vm444_vm2, %v995_v7  ;;  %v998_v12 = vld [vmem:[%s430_s13 + $0x8] sm:$0xf]  ;;  %v638_v29 = vld [vmem:[%s437_s28] sm:$0xff]  ;;  %v1156_v43 = vld [vmem:[%s1521_s7 + $0x30] sm:$0xff]   ;;  %s991_s13 = sshll.u32 %s420_s12, 3  ;;  %s1020_s26 = sshll.u32 %s1235_s20, 7 }
  0x1f   : > { %1051 = vmatpush3.bf16.msra.mxu0 %v496_v6  ;;  %1052 = vmatprep.mubr.msk.bf16.mxu0 %vm1246_vm1, %v1245_v1  ;;  %v1157_v44 = vld [vmem:[%s1521_s7 + $0x28] sm:$0xff]   ;;  %v1158_v45 = vld [vmem:[%s1521_s7 + $0x20] sm:$0xff]   ;;  %v1159_v46 = vld [vmem:[%s1521_s7 + $0x18] sm:$0xff]   ;;  %s422_s28 = scalar_lea.vmem [#allocation2], %s991_s13  ;;  %s895_s2 = scalar_lea.hbm %s1525_s11, %s1020_s26 }
  0x20   : > { %1065 = vmatmul.mubr.msk.bf16.vlgmr.msra.gmra.mxu1 %vm444_vm2, %v1000_v8  ;;  %1056 = vmatprep.subr.bf16.mxu0 %v1245_v1  ;;  %v1160_v47 = vld [vmem:[%s1521_s7 + $0x10] sm:$0xff]   ;;  %v1002_v52 = vld [vmem:[%s1535_s3] ss:$0 sm:$0xff]  ;;  %v1161_v58 = vld [vmem:[%s1521_s7 + $0x8] sm:$0xff]   ;;  %s897_s16 = sshll.u32 %s422_s28, 4  ;;  %s883_s3 = scalar_lea.sflag [#allocation3], %s420_s12  ;;  %s898_s16 = int_to_ptr.vmem [resolvable:$true] %s897_s16 }
  0x21   : > { %1092 = vmatprep.mubr.msk.bf16.mxu1 %vm1246_vm1, %v1245_v1  ;;  %1077 = vmatpush3.bf16.msra.mxu1 %v1155_v42  ;;  %v1003_v54 = vld [vmem:[%s1518_s4] ss:$0 sm:$0xff]  ;;  %s1167_s14 = scalar_lea.vmem %s898_s16, 128  ;;  %s1171_s23 = sshll.u32 %s1247_s15, 4  ;;  %s1172_s23 = int_to_ptr.vmem [resolvable:$false] %s1171_s23 }
  0x22   : > { %1078 = vmatprep.subr.bf16.mxu1 %v1245_v1  ;;  %v1162_v59 = vld [vmem:[%s1521_s7] sm:$0xff]   ;;  %p1168_p12 = scmp.ne.s32.totalorder %s898_s16, %s1167_s14  ;;  %s1173_s20 = scalar_lea.vmem %s1172_s23, 256 }
  0x23   : > { %v1004_v60 = vld [vmem:[%s1520_s6] ss:$0 sm:$0xff]  ;;  %p1174_p1 = scmp.lt.s32.totalorder %s898_s16, %s1172_s23  ;;  %p1175_p2 = scmp.lt.s32.totalorder %s1173_s20, %s1167_s14 }
  0x24   : > { %p1169_p13 = pnand %p1168_p12, %p1348_p4 }
  0x25   : > { %1079 = vmatpush3.bf16.msra.mxu1 %v1156_v43  ;;  %p1176_p3 = por %p1175_p2, %p1174_p1 }
  0x26   : > { %1053 = vmatmul.mubr.msk.bf16.vlgmr.msra.gmra.mxu0 %vm444_vm2, %v439_v10  ;;  %1080 = vmatprep.subr.bf16.mxu1 %v1245_v1  ;;  %p1170_p0 = pneg %p1169_p13 }
  0x27   : > { %1057 = vmatpush3.bf16.msra.mxu0 %v545_v11  ;;  %1058 = vmatprep.mubr.msk.bf16.mxu0 %vm1246_vm1, %v1245_v1 }
  0x28   : > { %1068 = vmatprep.subr.bf16.mxu0 %v1245_v1  ;;  %p1177_p5 = pnand %p1176_p3, %p1170_p0 }
  0x29   : > { %1081 = vmatpush3.bf16.msra.mxu1 %v1157_v44 }
  0x2a   : > { %1082 = vmatprep.subr.bf16.mxu1 %v1245_v1 }
  0x2d   : > { %1083 = vmatpush3.bf16.msra.mxu1 %v1158_v45 }
  0x2e   : > { %1059 = vmatmul.mubr.msk.bf16.vlgmr.msra.gmra.mxu0 %vm444_vm2, %v998_v12  ;;  %1084 = vmatprep.subr.bf16.mxu1 %v1245_v1 }
  0x2f   : > { %1072 = vmatprep.mubr.msk.bf16.mxu0 %vm1246_vm1, %v1245_v1  ;;  %1069 = vmatpush3.bf16.msra.mxu0 %v1153_v40 }
  0x30   : > { %1070 = vmatprep.subr.bf16.mxu0 %v1245_v1 }
  0x31   : > { %1085 = vmatpush3.bf16.msra.mxu1 %v1159_v46 }
  0x32   : > { %1086 = vmatprep.subr.bf16.mxu1 %v1245_v1 }
  0x33   : > { %1071 = vmatpush3.bf16.msra.mxu0 %v1154_v41 }
  0x35   : > { %1087 = vmatpush3.bf16.msra.mxu1 %v1160_v47 }
  0x36   : > { %1088 = vmatprep.subr.bf16.mxu1 %v1245_v1 }
  0x39   : > { %1089 = vmatpush3.bf16.msra.mxu1 %v1161_v58 }
  0x3a   : > { %1090 = vmatprep.subr.bf16.mxu1 %v1245_v1  ;;  %v1008_v1 = vld [vmem:[%s1522_s8] ss:$0 sm:$0xff] }
  0x3d   : > { %1091 = vmatpush3.bf16.msra.mxu1 %v1162_v59 }
  0xde   : > { %v486_v13 = vpop.f32.mrf.mxu0 }
  0xe0   : > { %v631_v14 = vpop.f32.mrf.mxu1  ;;  %v1048_v15 = vpop.f32.mrf.mxu0 }
  0xe2   : > { %v1066_v16 = vpop.f32.mrf.mxu1  ;;  %v489_v17 = vpop.f32.mrf.mxu0 }
  0xe4   : > { %v634_v18 = vpop.f32.mrf.mxu1  ;;  %v1049_v19 = vpop.f32.mrf.mxu0 }
  0xe6   : > { %v1067_v20 = vpop.f32.mrf.mxu1  ;;  %v532_v21 = vpop.f32.mrf.mxu0 }
  0xe7   : > { %v533_v25 = vadd.f32 %v532_v21, %v486_v13  ;;  %v1017_v21 = vld [vmem:[%s1523_s9] ss:$0 sm:$0xff] }
  0xe8   : > { %v1054_v22 = vpop.f32.mrf.mxu0 }
  0xea   : > { %v535_v23 = vpop.f32.mrf.mxu0 }
  0xeb   : > { %v1018_v23 = vld [vmem:[%s1524_s10] ss:$0 sm:$0xff] }
  0xec   : > { %v1055_v24 = vpop.f32.mrf.mxu0 }
  0xee   : > { %v581_v26 = vpop.f32.mrf.mxu0 }
  0xef   : > { %v587_v27 = vadd.f32 %v581_v26, %v533_v25 }
  0xf0   : > { %v1060_v28 = vpop.f32.mrf.mxu0 }
  0xf1   : > { %v637_v30 = vadd.f32 %v631_v14, %v587_v27 }
  0xf2   : > { %v584_v31 = vpop.f32.mrf.mxu0 }
  0xf3   : > { %v639_v32 = vadd.f32 %v638_v29, %v637_v30 }
  0xf4   : > { %v1061_v33 = vpop.f32.mrf.mxu0 }
  0xf5   : > { %v641_v34 = vsel %vm640_vm3, %v639_v32, 0.0 }
  0xf6   : > { %642 = vadd.xlane.f32.xlu0 %v641_v34 }
 0x17f   : > { %v643_v35 = vpop.xlane.xlu0 %642 }
 0x180   : > { %v645_v36 = vmul.f32 0.03125, %v643_v35 }
 0x182   : > { %v646_v37 = vsub.f32 %v639_v32, %v645_v36 }
 0x184   : > { %v647_v38 = vmul.f32 %v646_v37, %v646_v37 }
 0x186   : > { %v648_v39 = vsel %vm640_vm3, %v647_v38, 0.0 }
 0x187   : > { %649 = vadd.xlane.f32.xlu0 %v648_v39 }
 0x210   : > { %v650_v48 = vpop.xlane.xlu0 %649 }
 0x211   : > { %v651_v49 = vmul.f32 0.03125, %v650_v48 }
 0x213   : > { %v652_v50 = vadd.f32 1e-05, %v651_v49 }
 0x215   : > { %1163 = vrsqrt.f32 %v652_v50 }
 0x222   : > { %v1164_v51 = vpop.eup %1163 }
 0x223   : > { %v654_v53 = vmul.f32 %v1164_v51, %v646_v37 }
 0x225   : > { %v662_v55 = vmul.f32 %v1002_v52, %v654_v53 }
 0x227   : > { %v670_v56 = vadd.f32 %v1003_v54, %v662_v55 }
 0x229   : > { %v671_v57 = vpack.c.bf16 %v670_v56, %v670_v56 }
 0x22b   : > { %1073 = vmatmul.mubr.msk.bf16.vlgmr.msra.gmra.mxu0 %vm640_vm3, %v671_v57 }
 0x2eb   : > { %v732_v61 = vpop.f32.mrf.mxu0 }
 0x2ec   : > { %v733_v62 = vadd.f32 %v1004_v60, %v732_v61 }
 0x2ed   : > { %v1074_v63 = vpop.f32.mrf.mxu0 }
 0x2ee   : > { %v738_v0 = vmax.f32 %v733_v62, 0.0 }
 0x2ef   : > { %v735_v2 = vpop.f32.mrf.mxu0 }
 0x2f0   : > { %v739_v3 = vpack.c.bf16 %v738_v0, %v738_v0 }
 0x2f1   : > { %v1075_v4 = vpop.f32.mrf.mxu0 }
 0x2f2   : > { %1093 = vmatmul.mubr.bf16.vlgmr.msra.gmra.mxu1 %v739_v3 }
 0x3b2   : > { %v845_v5 = vpop.f32.mrf.mxu1 }
 0x3b3   : > { %v846_v6 = vadd.f32 %v1008_v1, %v845_v5 }
 0x3b4   : > { %v1094_v7 = vpop.f32.mrf.mxu1 }
 0x3b5   : > { %v851_v8 = vadd.f32 %v846_v6, %v670_v56 }
 0x3b6   : > { %v848_v9 = vpop.f32.mrf.mxu1 }
 0x3b7   : > { %v852_v10 = vsel %vm640_vm3, %v851_v8, 0.0 }
 0x3b8   : > { %853 = vadd.xlane.f32.xlu1 %v852_v10  ;;  %v1095_v11 = vpop.f32.mrf.mxu1 }
 0x441   : > { %v854_v12 = vpop.xlane.xlu1 %853 }
 0x442   : > { %v855_v13 = vmul.f32 0.03125, %v854_v12 }
 0x444   : > { %v856_v14 = vsub.f32 %v851_v8, %v855_v13 }
 0x446   : > { %v857_v15 = vmul.f32 %v856_v14, %v856_v14 }
 0x448   : > { %v858_v16 = vsel %vm640_vm3, %v857_v15, 0.0 }
 0x449   : > { %859 = vadd.xlane.f32.xlu1 %v858_v16 }
 0x4d2   : > { %v860_v17 = vpop.xlane.xlu1 %859 }
 0x4d3   : > { %v861_v18 = vmul.f32 0.03125, %v860_v17 }
 0x4d5   : > { %v862_v19 = vadd.f32 1e-05, %v861_v18 }
 0x4d7   : > { %1165 = vrsqrt.f32 %v862_v19 }
 0x4e4   : > { %v1166_v20 = vpop.eup %1165 }
 0x4e5   : > { %v864_v22 = vmul.f32 %v1166_v20, %v856_v14 }
 0x4e7   : > { %v872_v24 = vmul.f32 %v1017_v21, %v864_v22 }
 0x4e9   : > { %v880_v25 = vadd.f32 %v1018_v23, %v872_v24 }
 0x4eb   : > { %881 = vst.msk [vmem:[%s422_s28] sm:$0xff] %vm640_vm3, %v880_v25 }
 0x4ec   : > { %1180 = shalt.err (!%p1177_p5)
}
 0x4ed   : > { %s1181_s0 = scalar_lea.hbm %s895_s2, 128  ;;  %s1185_s13 = scalar_lea.hbm %s1525_s11, 256 }
 0x4ee   : > { %p1182_p6 = scmp.ne.s32.totalorder %s895_s2, %s1181_s0  ;;  %p1186_p10 = scmp.lt.s32.totalorder %s895_s2, %s1525_s11 }
 0x4ef   : > { %p1187_p11 = scmp.lt.s32.totalorder %s1185_s13, %s1181_s0 }
 0x4f0   : > { %p1183_p7 = pnand %p1182_p6, %p1348_p4 }
 0x4f1   : > { %p1188_p12 = por %p1187_p11, %p1186_p10 }
 0x4f2   : > { %p1184_p9 = pneg %p1183_p7 }
 0x4f4   : > { %p1189_p13 = pnand %p1188_p12, %p1184_p9 }
 0x4f6   : > { %1192 = shalt.err (!%p1189_p13)
}
 0x4f7   : > { %1096 = dma.vmem_to_hbm [thread:$0]  (%p1348_p4), %s898_s16, 128, %s895_s2, %s883_s3  }
 0x4f8 PF: > { %p1102_p0 = scmp.ge.s32.totalorder %s1243_s22, 2  ;;  %s909_s28 = sand.u32 1, %s1223_s17  }
 0x4f9   : > { %s910_s14 = scalar_lea.sflag [#allocation3], %s909_s28 }
 0x4fa   : > { %p1099_p1 = pnand %p1102_p0, %p1355_p8 }
 0x4fc   : > { %p1100_p2 = pneg %p1099_p1 }
 0x4fe   : > { %1218 = dma.done.wait (%p1100_p2), %s910_s14, 128  }
 0x4ff   : > { %1220 = vsyncadd (%p1100_p2), %s910_s14, 4294967168  ;;  %s24_s22 = sadd.s32 1, %s1243_s22   ;;  %s1536_s17 = smov %s1227_s18 }
 0x500   : > { %p21_p3 = scmp.ge.s32.totalorder %s24_s22, 4   ;;  %s1537_s18 = smov %s1231_s19 }
 0x501   : > { %s1538_s19 = smov %s1361_s30  ;;  %s1539_s20 = smov %s1239_s21 }
 0x502   : > { %s1540_s21 = smov %s1542_s25  ;;  %23 = sbr.rel (!%p21_p3) target bundleno = 9 (0x9), region = 105 }
 0x507   :  { %915 = vsyncpa [#allocation3], 1 }
 0x508   :  { %917 = vsyncpa [#allocation3 + $0x1], 1 }

// kernel: encoder_block_forward.3
= control target key start
LH: loop header
LB: loop body
LE: loop exit
PB: predicated region body
PF: predicated region fallthrough
CT: control target
= control target key end

     0   :  { %s1752_s27 = smov 0   ;;  %s1754_s28 = smov 0   ;;  %s2000_s0 = inlined_call_operand.vmem [shape: f32[2,8,32], index: 0, kind: input, shape index: {}]   ;;  %s2001_s1 = inlined_call_operand.vmem [shape: bf16[32,32], index: 1, kind: input, shape index: {}]   ;;  %s2002_s2 = inlined_call_operand.vmem [shape: bf16[32,32], index: 2, kind: input, shape index: {}]   ;;  %s2003_s3 = inlined_call_operand.vmem [shape: bf16[32,32], index: 3, kind: input, shape index: {}]   ;;  %s2004_s4 = inlined_call_operand.vmem [shape: bf16[32,128], index: 4, kind: input, shape index: {}]   ;;  %s2005_s5 = inlined_call_operand.vmem [shape: bf16[2,4,8,8], index: 5, kind: output, shape index: {0}]   ;;  %s2006_s6 = inlined_call_operand.vmem [shape: bf16[2,4,8,8], index: 6, kind: output, shape index: {1}]   ;;  %s2007_s7 = inlined_call_operand.vmem [shape: bf16[2,4,8,8], index: 7, kind: output, shape index: {2}]   ;;  %s2008_s8 = inlined_call_operand.vmem [shape: f32[2,8,128], index: 8, kind: output, shape index: {3}]  }
   0x1   :  { %s1756_s29 = smov 0  }
   0x2 LB: > { %s31_s30 = sadd.s32 1, %s1696_s28  ;;  %p1418_p0 = scmp.ge.s32.totalorder %s1700_s29, 1  ;;  %s1700_s29 = sphi %s1756_s29, %s19_s29   ;;  %s1696_s28 = sphi %s1754_s28, %s2010_s28   ;;  %s1692_s27 = sphi %s1752_s27, %s2009_s27  }
   0x3   : > { %p33_p1 = scmp.ge.s32.totalorder %s31_s30, 2  ;;  %p293_p2 = scmp.lt.s32.totalorder %s1700_s29, 3 }
   0x5   : > { %s2012_s30 = smov (%p33_p1, %s31_s30), 0  ;;  %p294_p3 = pnand %p1418_p0, %p293_p2 }
   0x6   : > { %s1702_s13 = smov (!%p294_p3), 120   ;;  %p355_p4 = scmp.lt.s32.totalorder (!%p294_p3), %s1692_s27, 1 }
   0x7   : > { %297 = sbr.rel (%p294_p3) target bundleno = 366 (0x16e), region = 40  ;;  %s1705_s26 = smov (!%p294_p3), 112  }
   0x8   : > { %s1706_s16 = smov (!%p294_p3), 104  }
   0xc   : > { %v1652_v0 = vld [vmem:[%s2001_s1 + $0x8] sm:$0xff]   ;;  %v1654_v2 = vld [vmem:[%s2001_s1] sm:$0xff]   ;;  %v1703_v4 = vmov 0.0   ;;  %vm1704_vm0 = vmmov 0   ;;  %s2014_s27 = smov (!%p355_p4, %s1692_s27), 1  ;;  %vm412_vm1 = vcmask 261120  }
   0xd   : > { %v1653_v1 = vld [vmem:[%s2002_s2 + $0x8] sm:$0xff]   ;;  %648 = vrot.lane.b32.xlu0 %v1652_v0, %s1702_s13  ;;  %1519 = vmatprep.subr.bf16.mxu0 %v1703_v4  ;;  %v1656_v5 = vld [vmem:[%s2002_s2] sm:$0xff]   ;;  %s1419_s11 = sshll.u32 %s2014_s27, 3  ;;  %vm514_vm2 = vcmask 60416  }
   0xe   : > { %711 = vrot.lane.b32.xlu1 %v1653_v1, %s1702_s13  ;;  %v1655_v3 = vld [vmem:[%s2003_s3 + $0x8] sm:$0xff]   ;;  %1527 = vmatprep.subr.bf16.mxu1 %v1703_v4  ;;  %v1657_v6 = vld [vmem:[%s2003_s3] sm:$0xff]   ;;  %s361_s20 = scalar_lea.vmem %s2000_s0, %s1419_s11  ;;  %s392_s19 = scalar_lea.vmem %s2008_s8, %s1419_s11 }
   0xf   : > { %1523 = vmatprep.mubr.msk.bf16.mxu0 %vm1704_vm0, %v1703_v4  ;;  %1531 = vmatprep.mubr.msk.bf16.mxu1 %vm1704_vm0, %v1703_v4  ;;  %v1658_v7 = vld [vmem:[%s2001_s1 + $0x8] sm:$0xff]   ;;  %v1660_v9 = vld [vmem:[%s2001_s1] sm:$0xff]  }
  0x10   : > { %v1659_v8 = vld [vmem:[%s2002_s2 + $0x8] sm:$0xff]   ;;  %v1661_v10 = vld [vmem:[%s2002_s2] sm:$0xff]  }
  0x11   : > { %646 = vrot.lane.b32.xlu0 %v1654_v2, %s1702_s13  ;;  %v1662_v11 = vld [vmem:[%s2003_s3 + $0x8] sm:$0xff]   ;;  %v1671_v14 = vld [vmem:[%s2004_s4] sm:$0xff]  }
  0x12   : > { %774 = vrot.lane.b32.xlu1 %v1655_v3, %s1702_s13  ;;  %v1663_v12 = vld [vmem:[%s2001_s1 + $0x8] sm:$0xff]   ;;  %v1664_v15 = vld [vmem:[%s2003_s3] sm:$0xff]  }
  0x13   : > { %v1670_v13 = vld [vmem:[%s2004_s4 + $0x8] sm:$0xff]   ;;  %v394_v16 = vld [vmem:[%s361_s20] sm:$0xff]  ;;  %s1477_s20 = sshll.u32 %s2014_s27, 4 }
  0x14   : > { %1520 = vmatpush3.bf16.msra.mxu0 %v1670_v13  ;;  %v1672_v17 = vld [vmem:[%s2001_s1 + $0x8] sm:$0xff]   ;;  %v1665_v18 = vld [vmem:[%s2001_s1] sm:$0xff]   ;;  %v1841_v19 = vpack.c.bf16 %v394_v16, %v394_v16  ;;  %s1955_s23 = scalar_lea.vmem %s2005_s5, %s1477_s20  ;;  %s1962_s25 = scalar_lea.vmem %s2006_s6, %s1477_s20 }
  0x15   : > { %709 = vrot.lane.b32.xlu0 %v1656_v5, %s1702_s13  ;;  %1521 = vmatprep.subr.bf16.mxu0 %v1703_v4  ;;  %v1673_v20 = vld [vmem:[%s2002_s2 + $0x8] sm:$0xff]   ;;  %v1674_v21 = vld [vmem:[%s2001_s1] sm:$0xff]   ;;  %s1969_s9 = scalar_lea.vmem %s2007_s7, %s1477_s20 }
  0x16   : > { %772 = vrot.lane.b32.xlu1 %v1657_v6, %s1702_s13  ;;  %1528 = vmatpush3.bf16.msra.mxu1 %v1672_v17  ;;  %v1666_v22 = vld [vmem:[%s2002_s2 + $0x8] sm:$0xff]   ;;  %v1675_v24 = vld [vmem:[%s2002_s2] sm:$0xff]  }
  0x17   : > { %1529 = vmatprep.subr.bf16.mxu1 %v1703_v4  ;;  %v1667_v23 = vld [vmem:[%s2003_s3 + $0x8] sm:$0xff]   ;;  %v1668_v26 = vld [vmem:[%s2002_s2] sm:$0xff]  }
  0x18   : > { %1522 = vmatpush3.bf16.msra.mxu0 %v1671_v14  ;;  %v1676_v25 = vld [vmem:[%s2003_s3 + $0x8] sm:$0xff]   ;;  %v1669_v27 = vld [vmem:[%s2003_s3] sm:$0xff]  }
  0x19   : > { %837 = vrot.lane.b32.xlu0 %v1658_v7, %s1705_s26  ;;  %1535 = vmatprep.subr.bf16.mxu0 %v1703_v4  ;;  %v1677_v28 = vld [vmem:[%s2003_s3] sm:$0xff]  }
  0x1a   : > { %900 = vrot.lane.b32.xlu1 %v1659_v8, %s1705_s26  ;;  %1530 = vmatpush3.bf16.msra.mxu1 %v1674_v21 }
  0x1b   : > { %1524 = vmatmul.mubr.msk.bf16.vlgmr.msra.gmra.mxu0 %vm412_vm1, %v1841_v19  ;;  %1543 = vmatprep.subr.bf16.mxu1 %v1703_v4 }
  0x1c   : > { %1536 = vmatpush3.bf16.msra.mxu0 %v1673_v20  ;;  %1539 = vmatprep.mubr.msk.bf16.mxu0 %vm1704_vm0, %v1703_v4 }
  0x1d   : > { %835 = vrot.lane.b32.xlu0 %v1660_v9, %s1705_s26  ;;  %1537 = vmatprep.subr.bf16.mxu0 %v1703_v4 }
  0x1e   : > { %898 = vrot.lane.b32.xlu1 %v1661_v10, %s1705_s26  ;;  %1532 = vmatmul.mubr.msk.bf16.vlgmr.msra.gmra.mxu1 %vm412_vm1, %v1841_v19 }
  0x1f   : > { %1544 = vmatpush3.bf16.msra.mxu1 %v1676_v25  ;;  %1547 = vmatprep.mubr.msk.bf16.mxu1 %vm1704_vm0, %v1703_v4 }
  0x20   : > { %1538 = vmatpush3.bf16.msra.mxu0 %v1675_v24  ;;  %1545 = vmatprep.subr.bf16.mxu1 %v1703_v4 }
  0x21   : > { %963 = vrot.lane.b32.xlu0 %v1662_v11, %s1705_s26  ;;  %1551 = vmatprep.subr.bf16.mxu0 %v1703_v4 }
  0x22   : > { %1026 = vrot.lane.b32.xlu1 %v1663_v12, %s1706_s16 }
  0x23   : > { %1540 = vmatmul.mubr.msk.bf16.vlgmr.msra.gmra.mxu0 %vm412_vm1, %v1841_v19  ;;  %1546 = vmatpush3.bf16.msra.mxu1 %v1677_v28 }
  0x24   : > { %1555 = vmatprep.mubr.msk.bf16.mxu0 %vm1704_vm0, %v1703_v4  ;;  %1559 = vmatprep.subr.bf16.mxu1 %v1703_v4 }
  0x25   : > { %961 = vrot.lane.b32.xlu0 %v1664_v15, %s1705_s26 }
  0x26   : > { %1024 = vrot.lane.b32.xlu1 %v1665_v18, %s1706_s16  ;;  %1548 = vmatmul.mubr.msk.bf16.vlgmr.msra.gmra.mxu1 %vm412_vm1, %v1841_v19 }
  0x27   : > { %1563 = vmatprep.mubr.msk.bf16.mxu1 %vm1704_vm0, %v1703_v4 }
  0x29   : > { %1089 = vrot.lane.b32.xlu0 %v1666_v22, %s1706_s16 }
  0x2a   : > { %1152 = vrot.lane.b32.xlu1 %v1667_v23, %s1706_s16 }
  0x2d   : > { %1087 = vrot.lane.b32.xlu0 %v1668_v26, %s1706_s16 }
  0x2e   : > { %1150 = vrot.lane.b32.xlu1 %v1669_v27, %s1706_s16 }
  0x7f   : > { %v649_v29 = vpop.permute.xlu0 %648 }
  0x80   : > { %1552 = vmatpush3.bf16.msra.mxu0 %v649_v29  ;;  %v712_v30 = vpop.permute.xlu1 %711 }
  0x81   : > { %1553 = vmatprep.subr.bf16.mxu0 %v1703_v4  ;;  %1560 = vmatpush3.bf16.msra.mxu1 %v712_v30 }
  0x82   : > { %1561 = vmatprep.subr.bf16.mxu1 %v1703_v4 }
  0x83   : > { %v647_v31 = vpop.permute.xlu0 %646 }
  0x84   : > { %1554 = vmatpush3.bf16.msra.mxu0 %v647_v31  ;;  %v775_v32 = vpop.permute.xlu1 %774 }
  0x85   : > { %1567 = vmatprep.subr.bf16.mxu0 %v1703_v4 }
  0x87   : > { %v710_v33 = vpop.permute.xlu0 %709  ;;  %1556 = vmatmul.mubr.msk.bf16.vlgmr.msra.gmra.mxu0 %vm412_vm1, %v1841_v19 }
  0x88   : > { %1562 = vmatpush3.bf16.msra.mxu1 %v710_v33  ;;  %1568 = vmatpush3.bf16.msra.mxu0 %v775_v32  ;;  %v773_v34 = vpop.permute.xlu1 %772 }
  0x89   : > { %1569 = vmatprep.subr.bf16.mxu0 %v1703_v4  ;;  %1575 = vmatprep.subr.bf16.mxu1 %v1703_v4 }
  0x8a   : > { %1571 = vmatprep.mubr.msk.bf16.mxu0 %vm1704_vm0, %v1703_v4 }
  0x8b   : > { %v838_v35 = vpop.permute.xlu0 %837  ;;  %1564 = vmatmul.mubr.msk.bf16.vlgmr.msra.gmra.mxu1 %vm412_vm1, %v1841_v19 }
  0x8c   : > { %1570 = vmatpush3.bf16.msra.mxu0 %v773_v34  ;;  %1576 = vmatpush3.bf16.msra.mxu1 %v838_v35  ;;  %v901_v36 = vpop.permute.xlu1 %900 }
  0x8d   : > { %1577 = vmatprep.subr.bf16.mxu1 %v1703_v4  ;;  %1583 = vmatprep.subr.bf16.mxu0 %v1703_v4 }
  0x8e   : > { %1579 = vmatprep.mubr.msk.bf16.mxu1 %vm1704_vm0, %v1703_v4 }
  0x8f   : > { %v836_v37 = vpop.permute.xlu0 %835  ;;  %1572 = vmatmul.mubr.msk.bf16.vlgmr.msra.gmra.mxu0 %vm412_vm1, %v1841_v19 }
  0x90   : > { %1578 = vmatpush3.bf16.msra.mxu1 %v836_v37  ;;  %1584 = vmatpush3.bf16.msra.mxu0 %v901_v36  ;;  %v899_v38 = vpop.permute.xlu1 %898 }
  0x91   : > { %1585 = vmatprep.subr.bf16.mxu0 %v1703_v4  ;;  %1591 = vmatprep.subr.bf16.mxu1 %v1703_v4 }
  0x92   : > { %1587 = vmatprep.mubr.msk.bf16.mxu0 %vm1704_vm0, %v1703_v4 }
  0x93   : > { %v964_v39 = vpop.permute.xlu0 %963  ;;  %1580 = vmatmul.mubr.msk.bf16.vlgmr.msra.gmra.mxu1 %vm412_vm1, %v1841_v19 }
  0x94   : > { %1586 = vmatpush3.bf16.msra.mxu0 %v899_v38  ;;  %1592 = vmatpush3.bf16.msra.mxu1 %v964_v39  ;;  %v1027_v40 = vpop.permute.xlu1 %1026 }
  0x95   : > { %1593 = vmatprep.subr.bf16.mxu1 %v1703_v4  ;;  %1599 = vmatprep.subr.bf16.mxu0 %v1703_v4 }
  0x96   : > { %1595 = vmatprep.mubr.msk.bf16.mxu1 %vm1704_vm0, %v1703_v4 }
  0x97   : > { %v962_v41 = vpop.permute.xlu0 %961  ;;  %1588 = vmatmul.mubr.msk.bf16.vlgmr.msra.gmra.mxu0 %vm412_vm1, %v1841_v19 }
  0x98   : > { %1594 = vmatpush3.bf16.msra.mxu1 %v962_v41  ;;  %1600 = vmatpush3.bf16.msra.mxu0 %v1027_v40  ;;  %v1025_v42 = vpop.permute.xlu1 %1024 }
  0x99   : > { %1601 = vmatprep.subr.bf16.mxu0 %v1703_v4  ;;  %1607 = vmatprep.subr.bf16.mxu1 %v1703_v4 }
  0x9a   : > { %1603 = vmatprep.mubr.msk.bf16.mxu0 %vm1704_vm0, %v1703_v4 }
  0x9b   : > { %v1090_v43 = vpop.permute.xlu0 %1089  ;;  %1596 = vmatmul.mubr.msk.bf16.vlgmr.msra.gmra.mxu1 %vm412_vm1, %v1841_v19 }
  0x9c   : > { %1602 = vmatpush3.bf16.msra.mxu0 %v1025_v42  ;;  %1608 = vmatpush3.bf16.msra.mxu1 %v1090_v43  ;;  %v1153_v44 = vpop.permute.xlu1 %1152 }
  0x9d   : > { %1609 = vmatprep.subr.bf16.mxu1 %v1703_v4  ;;  %1615 = vmatprep.subr.bf16.mxu0 %v1703_v4 }
  0x9e   : > { %1611 = vmatprep.mubr.msk.bf16.mxu1 %vm1704_vm0, %v1703_v4 }
  0x9f   : > { %v1088_v45 = vpop.permute.xlu0 %1087  ;;  %1604 = vmatmul.mubr.msk.bf16.vlgmr.msra.gmra.mxu0 %vm412_vm1, %v1841_v19 }
  0xa0   : > { %1610 = vmatpush3.bf16.msra.mxu1 %v1088_v45  ;;  %1616 = vmatpush3.bf16.msra.mxu0 %v1153_v44  ;;  %v1151_v46 = vpop.permute.xlu1 %1150 }
  0xa1   : > { %1617 = vmatprep.subr.bf16.mxu0 %v1703_v4  ;;  %1619 = vmatprep.mubr.msk.bf16.mxu0 %vm1704_vm0, %v1703_v4 }
  0xa3   : > { %1612 = vmatmul.mubr.msk.bf16.vlgmr.msra.gmra.mxu1 %vm412_vm1, %v1841_v19 }
  0xa4   : > { %1618 = vmatpush3.bf16.msra.mxu0 %v1151_v46 }
  0xa7   : > { %1620 = vmatmul.mubr.msk.bf16.vlgmr.msra.gmra.mxu0 %vm412_vm1, %v1841_v19 }
  0xdb   : > { %v450_v47 = vpop.f32.mrf.mxu0 }
  0xdc   : > { %456 = vst [vmem:[%s392_s19] sm:$0xff] %v450_v47 }
  0xdd   : > { %v1525_v48 = vpop.f32.mrf.mxu0 }
  0xde   : > { %v507_v50 = vpop.f32.mrf.mxu1 }
  0xdf   : > { %v453_v49 = vpop.f32.mrf.mxu0  ;;  %v513_v51 = vpack.c.bf16 %v507_v50, %v507_v50 }
  0xe0   : > { %v1533_v53 = vpop.f32.mrf.mxu1 }
  0xe1   : > { %v1526_v52 = vpop.f32.mrf.mxu0  ;;  %515 = vst.msk [vmem:[%s1955_s23] sm:$0xf] %vm514_vm2, %v513_v51 }
  0xe2   : > { %v510_v55 = vpop.f32.mrf.mxu1 }
  0xe3   : > { %v566_v54 = vpop.f32.mrf.mxu0 }
  0xe4   : > { %v572_v56 = vpack.c.bf16 %v566_v54, %v566_v54  ;;  %v1534_v58 = vpop.f32.mrf.mxu1 }
  0xe5   : > { %v1541_v57 = vpop.f32.mrf.mxu0 }
  0xe6   : > { %573 = vst.msk [vmem:[%s1962_s25] sm:$0xf] %vm514_vm2, %v572_v56  ;;  %v624_v60 = vpop.f32.mrf.mxu1 }
  0xe7   : > { %v569_v59 = vpop.f32.mrf.mxu0  ;;  %v630_v61 = vpack.c.bf16 %v624_v60, %v624_v60 }
  0xe8   : > { %v1549_v63 = vpop.f32.mrf.mxu1 }
  0xe9   : > { %v1542_v62 = vpop.f32.mrf.mxu0  ;;  %631 = vst.msk [vmem:[%s1969_s9] sm:$0xf] %vm514_vm2, %v630_v61 }
  0xea   : > { %v627_v0 = vpop.f32.mrf.mxu1 }
  0xec   : > { %v1550_v1 = vpop.f32.mrf.mxu1 }
 0x147   : > { %v686_v2 = vpop.f32.mrf.mxu0 }
 0x148   : > { %v692_v3 = vpack.c.bf16 %v686_v2, %v686_v2 }
 0x149   : > { %v1557_v4 = vpop.f32.mrf.mxu0 }
 0x14a   : > { %1442 = vst.msk [vmem:[%s1955_s23 + $0x4] sm:$0xf] %vm514_vm2, %v692_v3 }
 0x14b   : > { %v689_v5 = vpop.f32.mrf.mxu0  ;;  %v749_v6 = vpop.f32.mrf.mxu1 }
 0x14c   : > { %v755_v7 = vpack.c.bf16 %v749_v6, %v749_v6 }
 0x14d   : > { %v1558_v8 = vpop.f32.mrf.mxu0  ;;  %v1565_v9 = vpop.f32.mrf.mxu1 }
 0x14e   : > { %1446 = vst.msk [vmem:[%s1962_s25 + $0x4] sm:$0xf] %vm514_vm2, %v755_v7 }
 0x14f   : > { %v752_v10 = vpop.f32.mrf.mxu1  ;;  %v812_v11 = vpop.f32.mrf.mxu0 }
 0x150   : > { %v818_v12 = vpack.c.bf16 %v812_v11, %v812_v11 }
 0x151   : > { %v1566_v13 = vpop.f32.mrf.mxu1  ;;  %v1573_v14 = vpop.f32.mrf.mxu0 }
 0x152   : > { %1450 = vst.msk [vmem:[%s1969_s9 + $0x4] sm:$0xf] %vm514_vm2, %v818_v12 }
 0x153   : > { %v815_v15 = vpop.f32.mrf.mxu0  ;;  %v875_v16 = vpop.f32.mrf.mxu1 }
 0x154   : > { %v881_v17 = vpack.c.bf16 %v875_v16, %v875_v16 }
 0x155   : > { %v1574_v18 = vpop.f32.mrf.mxu0  ;;  %v1581_v19 = vpop.f32.mrf.mxu1 }
 0x156   : > { %1454 = vst.msk [vmem:[%s1955_s23 + $0x8] sm:$0xf] %vm514_vm2, %v881_v17 }
 0x157   : > { %v878_v20 = vpop.f32.mrf.mxu1  ;;  %v938_v21 = vpop.f32.mrf.mxu0 }
 0x158   : > { %v944_v22 = vpack.c.bf16 %v938_v21, %v938_v21 }
 0x159   : > { %v1582_v23 = vpop.f32.mrf.mxu1  ;;  %v1589_v24 = vpop.f32.mrf.mxu0 }
 0x15a   : > { %1458 = vst.msk [vmem:[%s1962_s25 + $0x8] sm:$0xf] %vm514_vm2, %v944_v22 }
 0x15b   : > { %v941_v25 = vpop.f32.mrf.mxu0  ;;  %v1001_v26 = vpop.f32.mrf.mxu1 }
 0x15c   : > { %v1007_v27 = vpack.c.bf16 %v1001_v26, %v1001_v26 }
 0x15d   : > { %v1590_v28 = vpop.f32.mrf.mxu0  ;;  %v1597_v29 = vpop.f32.mrf.mxu1 }
 0x15e   : > { %1462 = vst.msk [vmem:[%s1969_s9 + $0x8] sm:$0xf] %vm514_vm2, %v1007_v27 }
 0x15f   : > { %v1004_v30 = vpop.f32.mrf.mxu1  ;;  %v1064_v31 = vpop.f32.mrf.mxu0 }
 0x160   : > { %v1070_v32 = vpack.c.bf16 %v1064_v31, %v1064_v31 }
 0x161   : > { %v1598_v33 = vpop.f32.mrf.mxu1  ;;  %v1605_v34 = vpop.f32.mrf.mxu0 }
 0x162   : > { %1466 = vst.msk [vmem:[%s1955_s23 + $0xc] sm:$0xf] %vm514_vm2, %v1070_v32 }
 0x163   : > { %v1067_v35 = vpop.f32.mrf.mxu0  ;;  %v1127_v36 = vpop.f32.mrf.mxu1 }
 0x164   : > { %v1133_v37 = vpack.c.bf16 %v1127_v36, %v1127_v36 }
 0x165   : > { %v1606_v38 = vpop.f32.mrf.mxu0  ;;  %v1613_v39 = vpop.f32.mrf.mxu1 }
 0x166   : > { %1470 = vst.msk [vmem:[%s1962_s25 + $0xc] sm:$0xf] %vm514_vm2, %v1133_v37 }
 0x167   : > { %v1130_v40 = vpop.f32.mrf.mxu1  ;;  %v1190_v41 = vpop.f32.mrf.mxu0 }
 0x168   : > { %v1196_v42 = vpack.c.bf16 %v1190_v41, %v1190_v41 }
 0x169   : > { %v1614_v43 = vpop.f32.mrf.mxu1  ;;  %v1621_v44 = vpop.f32.mrf.mxu0 }
 0x16a   : > { %1474 = vst.msk [vmem:[%s1969_s9 + $0xc] sm:$0xf] %vm514_vm2, %v1196_v42 }
 0x16b   : > { %v1193_v45 = vpop.f32.mrf.mxu0 }
 0x16d   : > { %v1622_v46 = vpop.f32.mrf.mxu0 }
 0x16e PF: > { %s19_s29 = sadd.s32 1, %s1700_s29   ;;  %s2009_s27 = smov %s1696_s28 }
 0x16f   : > { %p16_p5 = scmp.ge.s32.totalorder %s19_s29, 4   ;;  %s2010_s28 = smov %s2012_s30 }
 0x171   :  { %18 = sbr.rel (!%p16_p5) target bundleno = 2 (0x2), region = 115 }

// kernel: encoder_block_forward.4
= control target key start
LH: loop header
LB: loop body
LE: loop exit
PB: predicated region body
PF: predicated region fallthrough
CT: control target
= control target key end

     0   :  { %s1312_s0 = inlined_call_operand.vmem [shape: f32[2,8,128], index: 0, kind: input, shape index: {}]   ;;  %s1313_s1 = inlined_call_operand.vmem [shape: bf16[2,4,8,8], index: 1, kind: input, shape index: {}]   ;;  %s1314_s2 = inlined_call_operand.vmem [shape: bf16[2,4,8,8], index: 2, kind: input, shape index: {}]   ;;  %s1315_s3 = inlined_call_operand.vmem [shape: bf16[2,4,8,8], index: 3, kind: input, shape index: {}]   ;;  %s1316_s4 = inlined_call_operand.hbm [shape: f32[4,2,8,8], index: 4, kind: output, shape index: {0}]   ;;  %s1317_s5 = inlined_call_operand.hbm [shape: f32[4,2,8,8], index: 5, kind: output, shape index: {1}]   ;;  %s1318_s6 = inlined_call_operand.vmem [shape: bf16[2,4,8,8], index: 6, kind: output, shape index: {2}]  }
   0x1   :  { %1321 = sst [smem:[#allocation9_spill]] %s1312_s0 }
   0x2   :  { %1322 = sst [smem:[#allocation10_spill]] %s1313_s1 }
   0x3   :  { %1323 = sst [smem:[#allocation11_spill]] %s1314_s2 }
   0x4   :  { %12 = vsyncpa [#allocation3], 0 }
   0x5   :  { %14 = vsyncpa [#allocation3 + $0x1], 0 }
   0x6   :  { %15 = vsyncpa [#allocation5], 0 }
   0x7   :  { %17 = vsyncpa [#allocation5 + $0x1], 0  ;;  %s1130_s21 = smov 0   ;;  %s1132_s22 = smov 0  }
   0x8   :  { %s1134_s23 = smov 0   ;;  %s1136_s24 = smov 0  }
   0x9   :  { %s1138_s25 = smov 0   ;;  %s1140_s26 = smov 0  }
   0xa   :  { %s1142_s27 = smov 0   ;;  %s1144_s28 = smov 0  }
   0xb LB: > { %s837_s29 = sadd.s32 4294967295, %s1089_s28   ;;  %s838_s30 = sadd.s32 4294967294, %s1089_s28   ;;  %s1089_s28 = sphi %s1144_s28, %s23_s28   ;;  %s1085_s27 = sphi %s1142_s27, %s1338_s27   ;;  %s1081_s26 = sphi %s1140_s26, %s1337_s26   ;;  %s1077_s25 = sphi %s1138_s25, %s1336_s25   ;;  %s1073_s24 = sphi %s1136_s24, %s1335_s24   ;;  %s1069_s23 = sphi %s1134_s23, %s1334_s23   ;;  %s1065_s22 = sphi %s1132_s22, %s1333_s22   ;;  %s1061_s21 = sphi %s1130_s21, %s1332_s21  }
   0xc   : > { %s38_s7 = sadd.s32 1, %s1081_s26  ;;  %s42_s8 = sadd.s32 1, %s1085_s27 }
   0xd   : > { %p40_p0 = scmp.ge.s32.totalorder %s38_s7, 4  ;;  %p177_p1 = scmp.ne.s32.totalorder %s1069_s23, %s1065_s22 }
   0xe   : > { %p178_p2 = scmp.eq.s32.totalorder %s837_s29, 7  ;;  %p183_p5 = scmp.ne.s32.totalorder %s1065_s22, %s1061_s21 }
   0xf   : > { %s1340_s7 = smov (%p40_p0, %s38_s7), 0  ;;  %s1342_s8 = smov (!%p40_p0, %s42_s8), %s1085_s27 }
  0x10   : > { %s160_s9 = ssub.s32 %s1081_s26, %s1340_s7  ;;  %p1181_p3 = por %p178_p2, %p177_p1 }
  0x11   : > { %p44_p4 = scmp.ge.s32.totalorder %s1342_s8, 2  ;;  %p184_p6 = scmp.eq.s32.totalorder %s838_s30, 7 }
  0x12   : > { %p841_p7 = scmp.ge.s32.totalorder %s1089_s28, 1  ;;  %p308_p9 = scmp.lt.s32.totalorder %s1089_s28, 9 }
  0x13   : > { %s1344_s8 = smov (%p44_p4, %s1342_s8), 0  ;;  %p1190_p8 = por %p184_p6, %p183_p5 }
  0x14   : > { %1325 = sst [smem:[#allocation8_spill]] %s1344_s8  ;;  %s161_s12 = ssub.s32 %s1085_s27, %s1344_s8 }
  0x15   : > { %s167_s13 = sadd.s32 1, %s1069_s23  ;;  %s162_s14 = sor.u32 %s161_s12, %s160_s9 }
  0x16   : > { %p309_p10 = pnand %p841_p7, %p308_p9  ;;  %p165_p11 = scmp.eq.s32.totalorder %s162_s14, 0 }
  0x17   : > { %p383_p12 = scmp.lt.s32.totalorder (!%p309_p10), %s1077_s25, 1  ;;  %p392_p13 = scmp.lt.s32.totalorder (!%p309_p10), %s1073_s24, 3 }
  0x18   : > { %s1199_s15 = scalar_select %p165_p11, %s1069_s23, %s167_s13  }
  0x19   : > { %312 = sbr.rel (%p309_p10) target bundleno = 753 (0x2f1), region = 36  ;;  %s1327_s2 = sld [smem:[#allocation11_spill]] (!%p309_p10) }
  0x1a   : > { %s1328_s1 = sld [smem:[#allocation10_spill]] (!%p309_p10)  ;;  %s1229_s30 = sand.u32 (!%p309_p10), 1, %s1065_s22  }
  0x1b   : > { %s1329_s0 = sld [smem:[#allocation9_spill]] (!%p309_p10) }
  0x1e   : > { %v1091_v0 = vmov 0.0   ;;  %vm1092_vm0 = vmmov 0   ;;  %s384_s16 = scalar_select %p383_p12, %s1077_s25, 1  ;;  %vm451_vm1 = vcmask 64512   ;;  %v431_v4 = vlaneseq }
  0x1f   : > { %867 = vmatprep.subr.bf16.mxu0 %v1091_v0  ;;  %869 = vmatprep.mubr.msk.bf16.mxu0 %vm1092_vm0, %v1091_v0  ;;  %s393_s17 = scalar_select %p392_p13, %s1073_s24, 3  ;;  %v433_v5 = vstv %s1073_s24  ;;  %vm524_vm3 = vcmask 1043456  }
  0x20   : > { %873 = vmatprep.subr.bf16.mxu1 %v1091_v0  ;;  %875 = vmatprep.mubr.msk.bf16.mxu1 %vm1092_vm0, %v1091_v0  ;;  %s845_s18 = sshll.u32 %s384_s16, 2  ;;  %v432_v7 = vand.u32 127, %v431_v4  ;;  %v439_v8 = vshrl.u32 %v431_v4, 7 }
  0x21   : > { %s398_s19 = sadd.s32 %s845_s18, %s393_s17  ;;  %s844_s17 = sshll.u32 %s384_s16, 3 }
  0x22   : > { %s1205_s20 = sshll.u32 %s398_s19, 2  ;;  %s389_s8 = scalar_lea.vmem %s1329_s0, %s844_s17  ;;  %vm434_vm2 = vcmp.eq.s32.totalorder %v432_v7, %v433_v5  ;;  %v442_v9 = vsub.s32 %v439_v8, %v432_v7 }
  0x23   : > { %s408_s9 = scalar_lea.vmem %s1327_s2, %s1205_s20  ;;  %s400_s14 = scalar_lea.vmem %s1328_s1, %s1205_s20  ;;  %v430_v6 = vld [vmem:[%s389_s8] sm:$0xff] }
  0x24   : > { %v459_v1 = vld [vmem:[%s408_s9] sm:$0xf]  ;;  %v435_v10 = vsel %vm434_vm2, %v430_v6, 0.0  ;;  %v443_v19 = vcvt.s32.f32 %v442_v9  ;;  %s416_s29 = scalar_lea.vmem %s1315_s3, %s1205_s20  ;;  %s842_s9 = sshll.u32 %s1229_s30, 3 }
  0x25   : > { %v464_v2 = vsel %vm451_vm1, %v459_v1, 0  ;;  %v458_v3 = vld [vmem:[%s400_s14] sm:$0xf]  ;;  %436 = vadd.xlane.f32.xlu1 %v435_v10  ;;  %s362_s12 = scalar_lea.vmem [#allocation2], %s842_s9  ;;  %s1233_s13 = scalar_lea.vmem [#allocation4], %s842_s9 }
  0x26   : > { %868 = vmatpush3.bf16.xpose.msra.mxu0 %v464_v2  ;;  %v444_v20 = vmul.f32 -0.5, %v443_v19  ;;  %v520_v32 = vld [vmem:[%s416_s29] sm:$0xf]  ;;  %s857_s14 = sshll.u32 %s1073_s24, 1  ;;  %s604_s19 = sshll.u32 %s362_s12, 4  ;;  %s605_s19 = int_to_ptr.vmem [resolvable:$true] %s604_s19 }
  0x27   : > { %v526_v33 = vsel %vm524_vm3, %v520_v32, 0  ;;  %s1240_s17 = sadd.s32 %s1077_s25, %s857_s14  ;;  %s572_s9 = scalar_lea.sflag [#allocation3], %s1229_s30 }
  0x28   : > { %v445_v21 = vmul.f32 %v444_v20, %v443_v19  ;;  %874 = vmatpush3.bf16.msra.mxu1 %v526_v33  ;;  %s1320_s18 = sshll.u32 %s1240_s17, 7  ;;  %s967_s0 = scalar_lea.vmem %s605_s19, 128 }
  0x29   : > { %s602_s29 = scalar_lea.hbm %s1316_s4, %s1320_s18  ;;  %p968_p0 = scmp.ne.s32.totalorder %s605_s19, %s967_s0 }
  0x2a   : > { %s1093_s1 = smov [#allocation2]  }
  0x2b   : > { %p969_p1 = pnand %p968_p0, %p1181_p3  ;;  %s971_s24 = sshll.u32 %s1093_s1, 4  ;;  %s972_s24 = int_to_ptr.vmem [resolvable:$false] %s971_s24 }
  0x2c   : > { %s973_s25 = scalar_lea.vmem %s972_s24, 256  ;;  %p974_p4 = scmp.lt.s32.totalorder %s605_s19, %s972_s24 }
  0x2d   : > { %870 = vmatmul.mubr.msk.bf16.vlgmr.msra.gmra.mxu0 %vm451_vm1, %v458_v3  ;;  %p970_p2 = pneg %p969_p1  ;;  %p975_p5 = scmp.lt.s32.totalorder %s973_s25, %s967_s0 }
  0x2f   : > { %p976_p6 = por %p975_p5, %p974_p4 }
  0x31   : > { %p977_p7 = pnand %p976_p6, %p970_p2 }
  0xae   : > { %v437_v17 = vpop.xlane.xlu1 %436 }
  0xaf   : > { %v446_v18 = vmul.f32 %v437_v17, %v437_v17 }
  0xb1   : > { %957 = vrcp.f32 %v446_v18 }
  0xbe   : > { %v958_v22 = vpop.eup %957 }
  0xbf   : > { %v448_v23 = vmul.f32 %v958_v22, %v445_v21 }
  0xc1   : > { %v449_v24 = vmul.f32 1.442695, %v448_v23 }
  0xc3   : > { %959 = vpow2.f32 %v449_v24 }
  0xd0   : > { %v960_v25 = vpop.eup %959 }
  0xd1   : > { %v452_v26 = vsel %vm451_vm1, %v960_v25, 0.0 }
  0xd2   : > { %453 = vadd.xlane.f32.xlu1 %v452_v26 }
  0xed   : > { %v500_v11 = vpop.f32.mrf.mxu0 }
  0xee   : > { %v506_v12 = vmul.f32 0.35355338, %v500_v11 }
  0xef   : > { %v871_v13 = vpop.f32.mrf.mxu0 }
  0xf0   : > { %v507_v14 = vsel %vm451_vm1, %v506_v12, -inf }
  0xf1   : > { %508 = vmax.xlane.f32.xlu0 %v507_v14  ;;  %v503_v15 = vpop.f32.mrf.mxu0 }
  0xf3   : > { %v872_v16 = vpop.f32.mrf.mxu0 }
 0x15b   : > { %v454_v34 = vpop.xlane.xlu1 %453 }
 0x17a   : > { %v509_v27 = vpop.xlane.xlu0 %508 }
 0x17b   : > { %v510_v28 = vsub.f32 %v506_v12, %v509_v27 }
 0x17d   : > { %v511_v29 = vmul.f32 1.442695, %v510_v28 }
 0x17f   : > { %961 = vpow2.f32 %v511_v29 }
 0x180   : > { %963 = vrcp.f32 %v454_v34 }
 0x18c   : > { %v962_v30 = vpop.eup %961 }
 0x18d   : > { %v513_v31 = vsel %vm451_vm1, %v962_v30, 0.0  ;;  %v964_v35 = vpop.eup %963 }
 0x18e   : > { %514 = vadd.xlane.f32.xlu0 %v513_v31  ;;  %v456_v36 = vmul.f32 %v964_v35, %v960_v25 }
 0x190   : > { %457 = vst.msk [vmem:[%s362_s12] sm:$0xff] %vm451_vm1, %v456_v36 }
 0x217   : > { %v515_v37 = vpop.xlane.xlu0 %514 }
 0x218   : > { %965 = vrcp.f32 %v515_v37 }
 0x225   : > { %v966_v38 = vpop.eup %965 }
 0x226   : > { %v517_v39 = vmul.f32 %v966_v38, %v962_v30 }
 0x228   : > { %v519_v40 = vpack.c.bf16 %v517_v39, %v517_v39  ;;  %518 = vst.msk [vmem:[%s1233_s13] sm:$0xff] %vm451_vm1, %v517_v39 }
 0x22a   : > { %876 = vmatmul.mubr.msk.bf16.vlgmr.msra.gmra.mxu1 %vm451_vm1, %v519_v40 }
 0x22b   : > { %980 = shalt.err (!%p977_p7)
}
 0x22c   : > { %s981_s12 = scalar_lea.hbm %s602_s29, 128  ;;  %s985_s16 = scalar_lea.hbm %s1316_s4, 1024 }
 0x22d   : > { %p982_p9 = scmp.ne.s32.totalorder %s602_s29, %s981_s12  ;;  %p986_p12 = scmp.lt.s32.totalorder %s602_s29, %s1316_s4 }
 0x22e   : > { %p987_p13 = scmp.lt.s32.totalorder %s985_s16, %s981_s12 }
 0x22f   : > { %p983_p10 = pnand %p982_p9, %p1181_p3 }
 0x230   : > { %p988_p0 = por %p987_p13, %p986_p12 }
 0x231   : > { %p984_p11 = pneg %p983_p10 }
 0x233   : > { %p989_p1 = pnand %p988_p0, %p984_p11 }
 0x235   : > { %992 = shalt.err (!%p989_p1)
}
 0x236   : > { %879 = dma.vmem_to_hbm [thread:$0]  (%p1181_p3), %s605_s19, 128, %s602_s29, %s572_s9  }
 0x237   : > { %s1330_s0 = sshll.u32 %s1240_s17, 7  ;;  %s620_s14 = sshll.u32 %s1233_s13, 4  ;;  %s621_s14 = int_to_ptr.vmem [resolvable:$true] %s620_s14 }
 0x238   : > { %s618_s25 = scalar_lea.hbm %s1317_s5, %s1330_s0  ;;  %s577_s2 = scalar_lea.sflag [#allocation5], %s1229_s30 }
 0x239   : > { %s993_s18 = scalar_lea.vmem %s621_s14, 128  ;;  %s1094_s12 = smov [#allocation4]  }
 0x23a   : > { %p994_p2 = scmp.ne.s32.totalorder %s621_s14, %s993_s18  ;;  %s997_s8 = sshll.u32 %s1094_s12, 4  ;;  %s998_s8 = int_to_ptr.vmem [resolvable:$false] %s997_s8 }
 0x23b   : > { %s999_s16 = scalar_lea.vmem %s998_s8, 256  ;;  %p1000_p6 = scmp.lt.s32.totalorder %s621_s14, %s998_s8 }
 0x23c   : > { %p995_p4 = pnand %p994_p2, %p1181_p3  ;;  %p1001_p7 = scmp.lt.s32.totalorder %s999_s16, %s993_s18 }
 0x23e   : > { %p996_p5 = pneg %p995_p4  ;;  %p1002_p9 = por %p1001_p7, %p1000_p6 }
 0x240   : > { %p1003_p10 = pnand %p1002_p9, %p996_p5 }
 0x242   : > { %1006 = shalt.err (!%p1003_p10)
}
 0x243   : > { %s1007_s17 = scalar_lea.hbm %s618_s25, 128  ;;  %s1011_s19 = scalar_lea.hbm %s1317_s5, 1024 }
 0x244   : > { %p1008_p11 = scmp.ne.s32.totalorder %s618_s25, %s1007_s17  ;;  %p1012_p0 = scmp.lt.s32.totalorder %s618_s25, %s1317_s5 }
 0x245   : > { %p1013_p1 = scmp.lt.s32.totalorder %s1011_s19, %s1007_s17 }
 0x246   : > { %p1009_p12 = pnand %p1008_p11, %p1181_p3 }
 0x247   : > { %p1014_p2 = por %p1013_p1, %p1012_p0 }
 0x248   : > { %p1010_p13 = pneg %p1009_p12 }
 0x24a   : > { %p1015_p4 = pnand %p1014_p2, %p1010_p13 }
 0x24c   : > { %1018 = shalt.err (!%p1015_p4)
}
 0x24d   : > { %880 = dma.vmem_to_hbm [thread:$0]  (%p1181_p3), %s621_s14, 128, %s618_s25, %s577_s2   ;;  %vm569_vm4 = vcmask 60416  }
 0x24e   : > { %s427_s24 = scalar_lea.vmem %s1318_s6, %s1205_s20 }
 0x2ea   : > { %v562_v41 = vpop.f32.mrf.mxu1 }
 0x2eb   : > { %v568_v42 = vpack.c.bf16 %v562_v41, %v562_v41 }
 0x2ec   : > { %v877_v43 = vpop.f32.mrf.mxu1 }
 0x2ed   : > { %570 = vst.msk [vmem:[%s427_s24] sm:$0xf] %vm569_vm4, %v568_v42 }
 0x2ee   : > { %v565_v44 = vpop.f32.mrf.mxu1 }
 0x2f0   : > { %v878_v45 = vpop.f32.mrf.mxu1 }
 0x2f1 PF: > { %p890_p5 = scmp.ge.s32.totalorder %s1089_s28, 2  ;;  %s635_s18 = sand.u32 1, %s1061_s21  }
 0x2f2   : > { %s636_s10 = scalar_lea.sflag [#allocation3], %s635_s18 }
 0x2f3   : > { %p884_p6 = pnand %p890_p5, %p1190_p8 }
 0x2f5   : > { %p885_p3 = pneg %p884_p6 }
 0x2f7   : > { %1052 = dma.done.wait (%p885_p3), %s636_s10, 128  }
 0x2f8   : > { %1054 = vsyncadd (%p885_p3), %s636_s10, 4294967168  ;;  %s645_s20 = scalar_lea.sflag [#allocation5], %s635_s18 }
 0x2f9   : > { %1056 = dma.done.wait (%p885_p3), %s645_s20, 128  }
 0x2fa   : > { %1058 = vsyncadd (%p885_p3), %s645_s20, 4294967168  ;;  %s23_s28 = sadd.s32 1, %s1089_s28   ;;  %s1331_s14 = sld [smem:[#allocation8_spill]] }
 0x2fb   : > { %p20_p7 = scmp.ge.s32.totalorder %s23_s28, 10   ;;  %s1332_s21 = smov %s1065_s22 }
 0x2fc   : > { %s1333_s22 = smov %s1069_s23  ;;  %s1334_s23 = smov %s1199_s15 }
 0x2fd   : > { %s1335_s24 = smov %s1081_s26  ;;  %s1336_s25 = smov %s1085_s27 }
 0x2fe   : > { %s1337_s26 = smov %s1340_s7  ;;  %22 = sbr.rel (!%p20_p7) target bundleno = 11 (0xb), region = 109 }
 0x300   : > { %s1338_s27 = smov %s1331_s14 }
 0x303   :  { %664 = vsyncpa [#allocation3], 1 }
 0x304   :  { %666 = vsyncpa [#allocation3 + $0x1], 1 }
 0x305   :  { %667 = vsyncpa [#allocation5], 1 }
 0x306   :  { %669 = vsyncpa [#allocation5 + $0x1], 1 }

// kernel: encoder_block_forward.3
= control target key start
LH: loop header
LB: loop body
LE: loop exit
PB: predicated region body
PF: predicated region fallthrough
CT: control target
= control target key end

     0   :  { %s1752_s27 = smov 0   ;;  %s1754_s28 = smov 0   ;;  %s2000_s0 = inlined_call_operand.vmem [shape: f32[2,8,32], index: 0, kind: input, shape index: {}]   ;;  %s2001_s1 = inlined_call_operand.vmem [shape: bf16[32,32], index: 1, kind: input, shape index: {}]   ;;  %s2002_s2 = inlined_call_operand.vmem [shape: bf16[32,32], index: 2, kind: input, shape index: {}]   ;;  %s2003_s3 = inlined_call_operand.vmem [shape: bf16[32,32], index: 3, kind: input, shape index: {}]   ;;  %s2004_s4 = inlined_call_operand.vmem [shape: bf16[32,128], index: 4, kind: input, shape index: {}]   ;;  %s2005_s5 = inlined_call_operand.vmem [shape: bf16[2,4,8,8], index: 5, kind: output, shape index: {0}]   ;;  %s2006_s6 = inlined_call_operand.vmem [shape: bf16[2,4,8,8], index: 6, kind: output, shape index: {1}]   ;;  %s2007_s7 = inlined_call_operand.vmem [shape: bf16[2,4,8,8], index: 7, kind: output, shape index: {2}]   ;;  %s2008_s8 = inlined_call_operand.vmem [shape: f32[2,8,128], index: 8, kind: output, shape index: {3}]  }
   0x1   :  { %s1756_s29 = smov 0  }
   0x2 LB: > { %s31_s30 = sadd.s32 1, %s1696_s28  ;;  %p1418_p0 = scmp.ge.s32.totalorder %s1700_s29, 1  ;;  %s1700_s29 = sphi %s1756_s29, %s19_s29   ;;  %s1696_s28 = sphi %s1754_s28, %s2010_s28   ;;  %s1692_s27 = sphi %s1752_s27, %s2009_s27  }
   0x3   : > { %p33_p1 = scmp.ge.s32.totalorder %s31_s30, 2  ;;  %p293_p2 = scmp.lt.s32.totalorder %s1700_s29, 3 }
   0x5   : > { %s2012_s30 = smov (%p33_p1, %s31_s30), 0  ;;  %p294_p3 = pnand %p1418_p0, %p293_p2 }
   0x6   : > { %s1702_s13 = smov (!%p294_p3), 120   ;;  %p355_p4 = scmp.lt.s32.totalorder (!%p294_p3), %s1692_s27, 1 }
   0x7   : > { %297 = sbr.rel (%p294_p3) target bundleno = 366 (0x16e), region = 40  ;;  %s1705_s26 = smov (!%p294_p3), 112  }
   0x8   : > { %s1706_s16 = smov (!%p294_p3), 104  }
   0xc   : > { %v1652_v0 = vld [vmem:[%s2001_s1 + $0x8] sm:$0xff]   ;;  %v1654_v2 = vld [vmem:[%s2001_s1] sm:$0xff]   ;;  %v1703_v4 = vmov 0.0   ;;  %vm1704_vm0 = vmmov 0   ;;  %s2014_s27 = smov (!%p355_p4, %s1692_s27), 1  ;;  %vm412_vm1 = vcmask 261120  }
   0xd   : > { %v1653_v1 = vld [vmem:[%s2002_s2 + $0x8] sm:$0xff]   ;;  %648 = vrot.lane.b32.xlu0 %v1652_v0, %s1702_s13  ;;  %1519 = vmatprep.subr.bf16.mxu0 %v1703_v4  ;;  %v1656_v5 = vld [vmem:[%s2002_s2] sm:$0xff]   ;;  %s1419_s11 = sshll.u32 %s2014_s27, 3  ;;  %vm514_vm2 = vcmask 60416  }
   0xe   : > { %711 = vrot.lane.b32.xlu1 %v1653_v1, %s1702_s13  ;;  %v1655_v3 = vld [vmem:[%s2003_s3 + $0x8] sm:$0xff]   ;;  %1527 = vmatprep.subr.bf16.mxu1 %v1703_v4  ;;  %v1657_v6 = vld [vmem:[%s2003_s3] sm:$0xff]   ;;  %s361_s20 = scalar_lea.vmem %s2000_s0, %s1419_s11  ;;  %s392_s19 = scalar_lea.vmem %s2008_s8, %s1419_s11 }
   0xf   : > { %1523 = vmatprep.mubr.msk.bf16.mxu0 %vm1704_vm0, %v1703_v4  ;;  %1531 = vmatprep.mubr.msk.bf16.mxu1 %vm1704_vm0, %v1703_v4  ;;  %v1658_v7 = vld [vmem:[%s2001_s1 + $0x8] sm:$0xff]   ;;  %v1660_v9 = vld [vmem:[%s2001_s1] sm:$0xff]  }
  0x10   : > { %v1659_v8 = vld [vmem:[%s2002_s2 + $0x8] sm:$0xff]   ;;  %v1661_v10 = vld [vmem:[%s2002_s2] sm:$0xff]  }
  0x11   : > { %646 = vrot.lane.b32.xlu0 %v1654_v2, %s1702_s13  ;;  %v1662_v11 = vld [vmem:[%s2003_s3 + $0x8] sm:$0xff]   ;;  %v1671_v14 = vld [vmem:[%s2004_s4] sm:$0xff]  }
  0x12   : > { %774 = vrot.lane.b32.xlu1 %v1655_v3, %s1702_s13  ;;  %v1663_v12 = vld [vmem:[%s2001_s1 + $0x8] sm:$0xff]   ;;  %v1664_v15 = vld [vmem:[%s2003_s3] sm:$0xff]  }
  0x13   : > { %v1670_v13 = vld [vmem:[%s2004_s4 + $0x8] sm:$0xff]   ;;  %v394_v16 = vld [vmem:[%s361_s20] sm:$0xff]  ;;  %s1477_s20 = sshll.u32 %s2014_s27, 4 }
  0x14   : > { %1520 = vmatpush3.bf16.msra.mxu0 %v1670_v13  ;;  %v1672_v17 = vld [vmem:[%s2001_s1 + $0x8] sm:$0xff]   ;;  %v1665_v18 = vld [vmem:[%s2001_s1] sm:$0xff]   ;;  %v1841_v19 = vpack.c.bf16 %v394_v16, %v394_v16  ;;  %s1955_s23 = scalar_lea.vmem %s2005_s5, %s1477_s20  ;;  %s1962_s25 = scalar_lea.vmem %s2006_s6, %s1477_s20 }
  0x15   : > { %709 = vrot.lane.b32.xlu0 %v1656_v5, %s1702_s13  ;;  %1521 = vmatprep.subr.bf16.mxu0 %v1703_v4  ;;  %v1673_v20 = vld [vmem:[%s2002_s2 + $0x8] sm:$0xff]   ;;  %v1674_v21 = vld [vmem:[%s2001_s1] sm:$0xff]   ;;  %s1969_s9 = scalar_lea.vmem %s2007_s7, %s1477_s20 }
  0x16   : > { %772 = vrot.lane.b32.xlu1 %v1657_v6, %s1702_s13  ;;  %1528 = vmatpush3.bf16.msra.mxu1 %v1672_v17  ;;  %v1666_v22 = vld [vmem:[%s2002_s2 + $0x8] sm:$0xff]   ;;  %v1675_v24 = vld [vmem:[%s2002_s2] sm:$0xff]  }
  0x17   : > { %1529 = vmatprep.subr.bf16.mxu1 %v1703_v4  ;;  %v1667_v23 = vld [vmem:[%s2003_s3 + $0x8] sm:$0xff]   ;;  %v1668_v26 = vld [vmem:[%s2002_s2] sm:$0xff]  }
  0x18   : > { %1522 = vmatpush3.bf16.msra.mxu0 %v1671_v14  ;;  %v1676_v25 = vld [vmem:[%s2003_s3 + $0x8] sm:$0xff]   ;;  %v1669_v27 = vld [vmem:[%s2003_s3] sm:$0xff]  }
  0x19   : > { %837 = vrot.lane.b32.xlu0 %v1658_v7, %s1705_s26  ;;  %1535 = vmatprep.subr.bf16.mxu0 %v1703_v4  ;;  %v1677_v28 = vld [vmem:[%s2003_s3] sm:$0xff]  }
  0x1a   : > { %900 = vrot.lane.b32.xlu1 %v1659_v8, %s1705_s26  ;;  %1530 = vmatpush3.bf16.msra.mxu1 %v1674_v21 }
  0x1b   : > { %1524 = vmatmul.mubr.msk.bf16.vlgmr.msra.gmra.mxu0 %vm412_vm1, %v1841_v19  ;;  %1543 = vmatprep.subr.bf16.mxu1 %v1703_v4 }
  0x1c   : > { %1536 = vmatpush3.bf16.msra.mxu0 %v1673_v20  ;;  %1539 = vmatprep.mubr.msk.bf16.mxu0 %vm1704_vm0, %v1703_v4 }
  0x1d   : > { %835 = vrot.lane.b32.xlu0 %v1660_v9, %s1705_s26  ;;  %1537 = vmatprep.subr.bf16.mxu0 %v1703_v4 }
  0x1e   : > { %898 = vrot.lane.b32.xlu1 %v1661_v10, %s1705_s26  ;;  %1532 = vmatmul.mubr.msk.bf16.vlgmr.msra.gmra.mxu1 %vm412_vm1, %v1841_v19 }
  0x1f   : > { %1544 = vmatpush3.bf16.msra.mxu1 %v1676_v25  ;;  %1547 = vmatprep.mubr.msk.bf16.mxu1 %vm1704_vm0, %v1703_v4 }
  0x20   : > { %1538 = vmatpush3.bf16.msra.mxu0 %v1675_v24  ;;  %1545 = vmatprep.subr.bf16.mxu1 %v1703_v4 }
  0x21   : > { %963 = vrot.lane.b32.xlu0 %v1662_v11, %s1705_s26  ;;  %1551 = vmatprep.subr.bf16.mxu0 %v1703_v4 }
  0x22   : > { %1026 = vrot.lane.b32.xlu1 %v1663_v12, %s1706_s16 }
  0x23   : > { %1540 = vmatmul.mubr.msk.bf16.vlgmr.msra.gmra.mxu0 %vm412_vm1, %v1841_v19  ;;  %1546 = vmatpush3.bf16.msra.mxu1 %v1677_v28 }
  0x24   : > { %1555 = vmatprep.mubr.msk.bf16.mxu0 %vm1704_vm0, %v1703_v4  ;;  %1559 = vmatprep.subr.bf16.mxu1 %v1703_v4 }
  0x25   : > { %961 = vrot.lane.b32.xlu0 %v1664_v15, %s1705_s26 }
  0x26   : > { %1024 = vrot.lane.b32.xlu1 %v1665_v18, %s1706_s16  ;;  %1548 = vmatmul.mubr.msk.bf16.vlgmr.msra.gmra.mxu1 %vm412_vm1, %v1841_v19 }
  0x27   : > { %1563 = vmatprep.mubr.msk.bf16.mxu1 %vm1704_vm0, %v1703_v4 }
  0x29   : > { %1089 = vrot.lane.b32.xlu0 %v1666_v22, %s1706_s16 }
  0x2a   : > { %1152 = vrot.lane.b32.xlu1 %v1667_v23, %s1706_s16 }
  0x2d   : > { %1087 = vrot.lane.b32.xlu0 %v1668_v26, %s1706_s16 }
  0x2e   : > { %1150 = vrot.lane.b32.xlu1 %v1669_v27, %s1706_s16 }
  0x7f   : > { %v649_v29 = vpop.permute.xlu0 %648 }
  0x80   : > { %1552 = vmatpush3.bf16.msra.mxu0 %v649_v29  ;;  %v712_v30 = vpop.permute.xlu1 %711 }
  0x81   : > { %1553 = vmatprep.subr.bf16.mxu0 %v1703_v4  ;;  %1560 = vmatpush3.bf16.msra.mxu1 %v712_v30 }
  0x82   : > { %1561 = vmatprep.subr.bf16.mxu1 %v1703_v4 }
  0x83   : > { %v647_v31 = vpop.permute.xlu0 %646 }
  0x84   : > { %1554 = vmatpush3.bf16.msra.mxu0 %v647_v31  ;;  %v775_v32 = vpop.permute.xlu1 %774 }
  0x85   : > { %1567 = vmatprep.subr.bf16.mxu0 %v1703_v4 }
  0x87   : > { %v710_v33 = vpop.permute.xlu0 %709  ;;  %1556 = vmatmul.mubr.msk.bf16.vlgmr.msra.gmra.mxu0 %vm412_vm1, %v1841_v19 }
  0x88   : > { %1562 = vmatpush3.bf16.msra.mxu1 %v710_v33  ;;  %1568 = vmatpush3.bf16.msra.mxu0 %v775_v32  ;;  %v773_v34 = vpop.permute.xlu1 %772 }
  0x89   : > { %1569 = vmatprep.subr.bf16.mxu0 %v1703_v4  ;;  %1575 = vmatprep.subr.bf16.mxu1 %v1703_v4 }
  0x8a   : > { %1571 = vmatprep.mubr.msk.bf16.mxu0 %vm1704_vm0, %v1703_v4 }
  0x8b   : > { %v838_v35 = vpop.permute.xlu0 %837  ;;  %1564 = vmatmul.mubr.msk.bf16.vlgmr.msra.gmra.mxu1 %vm412_vm1, %v1841_v19 }
  0x8c   : > { %1570 = vmatpush3.bf16.msra.mxu0 %v773_v34  ;;  %1576 = vmatpush3.bf16.msra.mxu1 %v838_v35  ;;  %v901_v36 = vpop.permute.xlu1 %900 }
  0x8d   : > { %1577 = vmatprep.subr.bf16.mxu1 %v1703_v4  ;;  %1583 = vmatprep.subr.bf16.mxu0 %v1703_v4 }
  0x8e   : > { %1579 = vmatprep.mubr.msk.bf16.mxu1 %vm1704_vm0, %v1703_v4 }
  0x8f   : > { %v836_v37 = vpop.permute.xlu0 %835  ;;  %1572 = vmatmul.mubr.msk.bf16.vlgmr.msra.gmra.mxu0 %vm412_vm1, %v1841_v19 }
  0x90   : > { %1578 = vmatpush3.bf16.msra.mxu1 %v836_v37  ;;  %1584 = vmatpush3.bf16.msra.mxu0 %v901_v36  ;;  %v899_v38 = vpop.permute.xlu1 %898 }
  0x91   : > { %1585 = vmatprep.subr.bf16.mxu0 %v1703_v4  ;;  %1591 = vmatprep.subr.bf16.mxu1 %v1703_v4 }
  0x92   : > { %1587 = vmatprep.mubr.msk.bf16.mxu0 %vm1704_vm0, %v1703_v4 }
  0x93   : > { %v964_v39 = vpop.permute.xlu0 %963  ;;  %1580 = vmatmul.mubr.msk.bf16.vlgmr.msra.gmra.mxu1 %vm412_vm1, %v1841_v19 }
  0x94   : > { %1586 = vmatpush3.bf16.msra.mxu0 %v899_v38  ;;  %1592 = vmatpush3.bf16.msra.mxu1 %v964_v39  ;;  %v1027_v40 = vpop.permute.xlu1 %1026 }
  0x95   : > { %1593 = vmatprep.subr.bf16.mxu1 %v1703_v4  ;;  %1599 = vmatprep.subr.bf16.mxu0 %v1703_v4 }
  0x96   : > { %1595 = vmatprep.mubr.msk.bf16.mxu1 %vm1704_vm0, %v1703_v4 }
  0x97   : > { %v962_v41 = vpop.permute.xlu0 %961  ;;  %1588 = vmatmul.mubr.msk.bf16.vlgmr.msra.gmra.mxu0 %vm412_vm1, %v1841_v19 }
  0x98   : > { %1594 = vmatpush3.bf16.msra.mxu1 %v962_v41  ;;  %1600 = vmatpush3.bf16.msra.mxu0 %v1027_v40  ;;  %v1025_v42 = vpop.permute.xlu1 %1024 }
  0x99   : > { %1601 = vmatprep.subr.bf16.mxu0 %v1703_v4  ;;  %1607 = vmatprep.subr.bf16.mxu1 %v1703_v4 }
  0x9a   : > { %1603 = vmatprep.mubr.msk.bf16.mxu0 %vm1704_vm0, %v1703_v4 }
  0x9b   : > { %v1090_v43 = vpop.permute.xlu0 %1089  ;;  %1596 = vmatmul.mubr.msk.bf16.vlgmr.msra.gmra.mxu1 %vm412_vm1, %v1841_v19 }
  0x9c   : > { %1602 = vmatpush3.bf16.msra.mxu0 %v1025_v42  ;;  %1608 = vmatpush3.bf16.msra.mxu1 %v1090_v43  ;;  %v1153_v44 = vpop.permute.xlu1 %1152 }
  0x9d   : > { %1609 = vmatprep.subr.bf16.mxu1 %v1703_v4  ;;  %1615 = vmatprep.subr.bf16.mxu0 %v1703_v4 }
  0x9e   : > { %1611 = vmatprep.mubr.msk.bf16.mxu1 %vm1704_vm0, %v1703_v4 }
  0x9f   : > { %v1088_v45 = vpop.permute.xlu0 %1087  ;;  %1604 = vmatmul.mubr.msk.bf16.vlgmr.msra.gmra.mxu0 %vm412_vm1, %v1841_v19 }
  0xa0   : > { %1610 = vmatpush3.bf16.msra.mxu1 %v1088_v45  ;;  %1616 = vmatpush3.bf16.msra.mxu0 %v1153_v44  ;;  %v1151_v46 = vpop.permute.xlu1 %1150 }
  0xa1   : > { %1617 = vmatprep.subr.bf16.mxu0 %v1703_v4  ;;  %1619 = vmatprep.mubr.msk.bf16.mxu0 %vm1704_vm0, %v1703_v4 }
  0xa3   : > { %1612 = vmatmul.mubr.msk.bf16.vlgmr.msra.gmra.mxu1 %vm412_vm1, %v1841_v19 }
  0xa4   : > { %1618 = vmatpush3.bf16.msra.mxu0 %v1151_v46 }
  0xa7   : > { %1620 = vmatmul.mubr.msk.bf16.vlgmr.msra.gmra.mxu0 %vm412_vm1, %v1841_v19 }
  0xdb   : > { %v450_v47 = vpop.f32.mrf.mxu0 }
  0xdc   : > { %456 = vst [vmem:[%s392_s19] sm:$0xff] %v450_v47 }
  0xdd   : > { %v1525_v48 = vpop.f32.mrf.mxu0 }
  0xde   : > { %v507_v50 = vpop.f32.mrf.mxu1 }
  0xdf   : > { %v453_v49 = vpop.f32.mrf.mxu0  ;;  %v513_v51 = vpack.c.bf16 %v507_v50, %v507_v50 }
  0xe0   : > { %v1533_v53 = vpop.f32.mrf.mxu1 }
  0xe1   : > { %v1526_v52 = vpop.f32.mrf.mxu0  ;;  %515 = vst.msk [vmem:[%s1955_s23] sm:$0xf] %vm514_vm2, %v513_v51 }
  0xe2   : > { %v510_v55 = vpop.f32.mrf.mxu1 }
  0xe3   : > { %v566_v54 = vpop.f32.mrf.mxu0 }
  0xe4   : > { %v572_v56 = vpack.c.bf16 %v566_v54, %v566_v54  ;;  %v1534_v58 = vpop.f32.mrf.mxu1 }
  0xe5   : > { %v1541_v57 = vpop.f32.mrf.mxu0 }
  0xe6   : > { %573 = vst.msk [vmem:[%s1962_s25] sm:$0xf] %vm514_vm2, %v572_v56  ;;  %v624_v60 = vpop.f32.mrf.mxu1 }
  0xe7   : > { %v569_v59 = vpop.f32.mrf.mxu0  ;;  %v630_v61 = vpack.c.bf16 %v624_v60, %v624_v60 }
  0xe8   : > { %v1549_v63 = vpop.f32.mrf.mxu1 }
  0xe9   : > { %v1542_v62 = vpop.f32.mrf.mxu0  ;;  %631 = vst.msk [vmem:[%s1969_s9] sm:$0xf] %vm514_vm2, %v630_v61 }
  0xea   : > { %v627_v0 = vpop.f32.mrf.mxu1 }
  0xec   : > { %v1550_v1 = vpop.f32.mrf.mxu1 }
 0x147   : > { %v686_v2 = vpop.f32.mrf.mxu0 }
 0x148   : > { %v692_v3 = vpack.c.bf16 %v686_v2, %v686_v2 }
 0x149   : > { %v1557_v4 = vpop.f32.mrf.mxu0 }
 0x14a   : > { %1442 = vst.msk [vmem:[%s1955_s23 + $0x4] sm:$0xf] %vm514_vm2, %v692_v3 }
 0x14b   : > { %v689_v5 = vpop.f32.mrf.mxu0  ;;  %v749_v6 = vpop.f32.mrf.mxu1 }
 0x14c   : > { %v755_v7 = vpack.c.bf16 %v749_v6, %v749_v6 }
 0x14d   : > { %v1558_v8 = vpop.f32.mrf.mxu0  ;;  %v1565_v9 = vpop.f32.mrf.mxu1 }
 0x14e   : > { %1446 = vst.msk [vmem:[%s1962_s25 + $0x4] sm:$0xf] %vm514_vm2, %v755_v7 }
 0x14f   : > { %v752_v10 = vpop.f32.mrf.mxu1  ;;  %v812_v11 = vpop.f32.mrf.mxu0 }
 0x150   : > { %v818_v12 = vpack.c.bf16 %v812_v11, %v812_v11 }
 0x151   : > { %v1566_v13 = vpop.f32.mrf.mxu1  ;;  %v1573_v14 = vpop.f32.mrf.mxu0 }
 0x152   : > { %1450 = vst.msk [vmem:[%s1969_s9 + $0x4] sm:$0xf] %vm514_vm2, %v818_v12 }
 0x153   : > { %v815_v15 = vpop.f32.mrf.mxu0  ;;  %v875_v16 = vpop.f32.mrf.mxu1 }
 0x154   : > { %v881_v17 = vpack.c.bf16 %v875_v16, %v875_v16 }
 0x155   : > { %v1574_v18 = vpop.f32.mrf.mxu0  ;;  %v1581_v19 = vpop.f32.mrf.mxu1 }
 0x156   : > { %1454 = vst.msk [vmem:[%s1955_s23 + $0x8] sm:$0xf] %vm514_vm2, %v881_v17 }
 0x157   : > { %v878_v20 = vpop.f32.mrf.mxu1  ;;  %v938_v21 = vpop.f32.mrf.mxu0 }
 0x158   : > { %v944_v22 = vpack.c.bf16 %v938_v21, %v938_v21 }
 0x159   : > { %v1582_v23 = vpop.f32.mrf.mxu1  ;;  %v1589_v24 = vpop.f32.mrf.mxu0 }
 0x15a   : > { %1458 = vst.msk [vmem:[%s1962_s25 + $0x8] sm:$0xf] %vm514_vm2, %v944_v22 }
 0x15b   : > { %v941_v25 = vpop.f32.mrf.mxu0  ;;  %v1001_v26 = vpop.f32.mrf.mxu1 }
 0x15c   : > { %v1007_v27 = vpack.c.bf16 %v1001_v26, %v1001_v26 }
 0x15d   : > { %v1590_v28 = vpop.f32.mrf.mxu0  ;;  %v1597_v29 = vpop.f32.mrf.mxu1 }
 0x15e   : > { %1462 = vst.msk [vmem:[%s1969_s9 + $0x8] sm:$0xf] %vm514_vm2, %v1007_v27 }
 0x15f   : > { %v1004_v30 = vpop.f32.mrf.mxu1  ;;  %v1064_v31 = vpop.f32.mrf.mxu0 }
 0x160   : > { %v1070_v32 = vpack.c.bf16 %v1064_v31, %v1064_v31 }
 0x161   : > { %v1598_v33 = vpop.f32.mrf.mxu1  ;;  %v1605_v34 = vpop.f32.mrf.mxu0 }
 0x162   : > { %1466 = vst.msk [vmem:[%s1955_s23 + $0xc] sm:$0xf] %vm514_vm2, %v1070_v32 }
 0x163   : > { %v1067_v35 = vpop.f32.mrf.mxu0  ;;  %v1127_v36 = vpop.f32.mrf.mxu1 }
 0x164   : > { %v1133_v37 = vpack.c.bf16 %v1127_v36, %v1127_v36 }
 0x165   : > { %v1606_v38 = vpop.f32.mrf.mxu0  ;;  %v1613_v39 = vpop.f32.mrf.mxu1 }
 0x166   : > { %1470 = vst.msk [vmem:[%s1962_s25 + $0xc] sm:$0xf] %vm514_vm2, %v1133_v37 }
 0x167   : > { %v1130_v40 = vpop.f32.mrf.mxu1  ;;  %v1190_v41 = vpop.f32.mrf.mxu0 }
 0x168   : > { %v1196_v42 = vpack.c.bf16 %v1190_v41, %v1190_v41 }
 0x169   : > { %v1614_v43 = vpop.f32.mrf.mxu1  ;;  %v1621_v44 = vpop.f32.mrf.mxu0 }
 0x16a   : > { %1474 = vst.msk [vmem:[%s1969_s9 + $0xc] sm:$0xf] %vm514_vm2, %v1196_v42 }
 0x16b   : > { %v1193_v45 = vpop.f32.mrf.mxu0 }
 0x16d   : > { %v1622_v46 = vpop.f32.mrf.mxu0 }
 0x16e PF: > { %s19_s29 = sadd.s32 1, %s1700_s29   ;;  %s2009_s27 = smov %s1696_s28 }
 0x16f   : > { %p16_p5 = scmp.ge.s32.totalorder %s19_s29, 4   ;;  %s2010_s28 = smov %s2012_s30 }
 0x171   :  { %18 = sbr.rel (!%p16_p5) target bundleno = 2 (0x2), region = 115 }

// kernel: encoder_block_forward.5
= control target key start
LH: loop header
LB: loop body
LE: loop exit
PB: predicated region body
PF: predicated region fallthrough
CT: control target
= control target key end

     0   :  { %s1514_s0 = inlined_call_operand.vmem [shape: bf16[2,4,8,8], index: 0, kind: input, shape index: {}]   ;;  %s1515_s1 = inlined_call_operand.vmem [shape: bf16[32,32], index: 1, kind: input, shape index: {}]   ;;  %s1516_s2 = inlined_call_operand.vmem [shape: f32[2,8,32], index: 2, kind: input, shape index: {}]   ;;  %s1517_s3 = inlined_call_operand.vmem [shape: f32[1,32], index: 3, kind: input, shape index: {}]   ;;  %s1518_s4 = inlined_call_operand.vmem [shape: f32[1,32], index: 4, kind: input, shape index: {}]   ;;  %s1519_s5 = inlined_call_operand.vmem [shape: bf16[32,128], index: 5, kind: input, shape index: {}]   ;;  %s1520_s6 = inlined_call_operand.vmem [shape: f32[1,128], index: 6, kind: input, shape index: {}]   ;;  %s1521_s7 = inlined_call_operand.vmem [shape: bf16[128,32], index: 7, kind: input, shape index: {}]   ;;  %s1522_s8 = inlined_call_operand.vmem [shape: f32[1,32], index: 8, kind: input, shape index: {}]   ;;  %s1523_s9 = inlined_call_operand.vmem [shape: f32[1,32], index: 9, kind: input, shape index: {}]   ;;  %s1524_s10 = inlined_call_operand.vmem [shape: f32[1,32], index: 10, kind: input, shape index: {}]   ;;  %s1525_s11 = inlined_call_operand.hbm [shape: f32[2,8,32], index: 11, kind: output, shape index: {}]  }
   0x1   :  { %1526 = sst [smem:[#allocation5_spill]] %s1514_s0 }
   0x2   :  { %1527 = sst [smem:[#allocation6_spill]] %s1515_s1 }
   0x3   :  { %1528 = sst [smem:[#allocation7_spill]] %s1516_s2 }
   0x4   :  { %1529 = sst [smem:[#allocation8_spill]] %s1517_s3 }
   0x5   :  { %16 = vsyncpa [#allocation3], 0 }
   0x6   :  { %18 = vsyncpa [#allocation3 + $0x1], 0  ;;  %s1308_s17 = smov 0   ;;  %s1310_s18 = smov 0  }
   0x7   :  { %s1312_s19 = smov 0   ;;  %s1314_s20 = smov 0  }
   0x8   :  { %s1316_s21 = smov 0   ;;  %s1318_s22 = smov 0  }
   0x9 LB: > { %s986_s23 = sadd.s32 4294967295, %s1243_s22   ;;  %s987_s24 = sadd.s32 4294967294, %s1243_s22   ;;  %s1243_s22 = sphi %s1318_s22, %s24_s22   ;;  %s1239_s21 = sphi %s1316_s21, %s1540_s21   ;;  %s1235_s20 = sphi %s1314_s20, %s1539_s20   ;;  %s1231_s19 = sphi %s1312_s19, %s1538_s19   ;;  %s1227_s18 = sphi %s1310_s18, %s1537_s18   ;;  %s1223_s17 = sphi %s1308_s17, %s1536_s17  }
   0xa   : > { %s36_s25 = sadd.s32 1, %s1239_s21  ;;  %s290_s26 = sadd.s32 1, %s1231_s19 }
   0xb   : > { %p38_p0 = scmp.ge.s32.totalorder %s36_s25, 2  ;;  %p300_p1 = scmp.ne.s32.totalorder %s1231_s19, %s1227_s18 }
   0xc   : > { %p301_p2 = scmp.eq.s32.totalorder %s986_s23, 1  ;;  %p306_p3 = scmp.ne.s32.totalorder %s1227_s18, %s1223_s17 }
   0xd   : > { %s1542_s25 = smov (%p38_p0, %s36_s25), 0  ;;  %p307_p5 = scmp.eq.s32.totalorder %s987_s24, 1 }
   0xe   : > { %p1348_p4 = por %p301_p2, %p300_p1  ;;  %s285_s28 = ssub.s32 %s1239_s21, %s1542_s25 }
   0xf   : > { %p990_p6 = scmp.ge.s32.totalorder %s1243_s22, 1  ;;  %p288_p7 = scmp.eq.s32.totalorder %s285_s28, 0 }
  0x10   : > { %p1355_p8 = por %p307_p5, %p306_p3  ;;  %p373_p9 = scmp.lt.s32.totalorder %s1243_s22, 3 }
  0x11   : > { %s1361_s30 = scalar_select %p288_p7, %s1231_s19, %s290_s26  }
  0x12   : > { %p374_p10 = pnand %p990_p6, %p373_p9 }
  0x13   : > { %s1532_s1 = sld [smem:[#allocation6_spill]] (!%p374_p10)  ;;  %p423_p11 = scmp.lt.s32.totalorder (!%p374_p10), %s1235_s20, 1 }
  0x14   : > { %377 = sbr.rel (%p374_p10) target bundleno = 1272 (0x4f8), region = 64  ;;  %s1533_s0 = sld [smem:[#allocation5_spill]] (!%p374_p10) }
  0x15   : > { %s1534_s2 = sld [smem:[#allocation7_spill]] (!%p374_p10)  ;;  %s420_s12 = sand.u32 (!%p374_p10), 1, %s1227_s18  }
  0x16   : > { %s1535_s3 = sld [smem:[#allocation8_spill]] (!%p374_p10)  ;;  %s1247_s15 = smov (!%p374_p10), [#allocation2]  }
  0x19   : > { %v443_v0 = vld [vmem:[%s1532_s1 + $0x4] sm:$0xf]  ;;  %vm448_vm0 = vcmask 1043456   ;;  %v1245_v1 = vmov 0.0   ;;  %vm1246_vm1 = vmmov 0   ;;  %s1375_s16 = scalar_select %p423_p11, %s1235_s20, 1 }
  0x1a   : > { %1044 = vmatprep.subr.bf16.mxu0 %v1245_v1  ;;  %v450_v2 = vsel %vm448_vm0, %v443_v0, 0  ;;  %1046 = vmatprep.mubr.msk.bf16.mxu0 %vm1246_vm1, %v1245_v1  ;;  %v440_v3 = vld [vmem:[%s1532_s1] sm:$0xf]  ;;  %v590_v4 = vld [vmem:[%s1532_s1 + $0xc] sm:$0xf]  ;;  %vm444_vm2 = vcmask 64512  }
  0x1b   : > { %1045 = vmatpush3.bf16.msra.mxu0 %v450_v2  ;;  %1062 = vmatprep.subr.bf16.mxu1 %v1245_v1  ;;  %v595_v5 = vsel %vm448_vm0, %v590_v4, 0  ;;  %s1023_s26 = sshll.u32 %s1375_s16, 4  ;;  %v496_v6 = vsel %vm448_vm0, %v440_v3, 0  ;;  %v540_v9 = vld [vmem:[%s1532_s1 + $0x8] sm:$0xf]  ;;  %s994_s23 = sshll.u32 %s1375_s16, 3 }
  0x1c   : > { %1050 = vmatprep.subr.bf16.mxu0 %v1245_v1  ;;  %1064 = vmatprep.mubr.msk.bf16.mxu1 %vm1246_vm1, %v1245_v1  ;;  %s430_s13 = scalar_lea.vmem %s1533_s0, %s1023_s26  ;;  %v545_v11 = vsel %vm448_vm0, %v540_v9, 0  ;;  %s437_s28 = scalar_lea.vmem %s1534_s2, %s994_s23  ;;  %vm640_vm3 = vcmask 261120   ;;  %v1153_v40 = vld [vmem:[%s1519_s5 + $0x8] sm:$0xff]   ;;  %v1154_v41 = vld [vmem:[%s1519_s5] sm:$0xff]   ;;  %v1155_v42 = vld [vmem:[%s1521_s7 + $0x38] sm:$0xff]  }
  0x1d   : > { %1063 = vmatpush3.bf16.msra.mxu1 %v595_v5  ;;  %v995_v7 = vld [vmem:[%s430_s13 + $0x4] sm:$0xf]  ;;  %v1000_v8 = vld [vmem:[%s430_s13 + $0xc] sm:$0xf]  ;;  %v439_v10 = vld [vmem:[%s430_s13] sm:$0xf] }
  0x1e   : > { %1076 = vmatprep.subr.bf16.mxu1 %v1245_v1  ;;  %1047 = vmatmul.mubr.msk.bf16.vlgmr.msra.gmra.mxu0 %vm444_vm2, %v995_v7  ;;  %v998_v12 = vld [vmem:[%s430_s13 + $0x8] sm:$0xf]  ;;  %v638_v29 = vld [vmem:[%s437_s28] sm:$0xff]  ;;  %v1156_v43 = vld [vmem:[%s1521_s7 + $0x30] sm:$0xff]   ;;  %s991_s13 = sshll.u32 %s420_s12, 3  ;;  %s1020_s26 = sshll.u32 %s1235_s20, 7 }
  0x1f   : > { %1051 = vmatpush3.bf16.msra.mxu0 %v496_v6  ;;  %1052 = vmatprep.mubr.msk.bf16.mxu0 %vm1246_vm1, %v1245_v1  ;;  %v1157_v44 = vld [vmem:[%s1521_s7 + $0x28] sm:$0xff]   ;;  %v1158_v45 = vld [vmem:[%s1521_s7 + $0x20] sm:$0xff]   ;;  %v1159_v46 = vld [vmem:[%s1521_s7 + $0x18] sm:$0xff]   ;;  %s422_s28 = scalar_lea.vmem [#allocation2], %s991_s13  ;;  %s895_s2 = scalar_lea.hbm %s1525_s11, %s1020_s26 }
  0x20   : > { %1065 = vmatmul.mubr.msk.bf16.vlgmr.msra.gmra.mxu1 %vm444_vm2, %v1000_v8  ;;  %1056 = vmatprep.subr.bf16.mxu0 %v1245_v1  ;;  %v1160_v47 = vld [vmem:[%s1521_s7 + $0x10] sm:$0xff]   ;;  %v1002_v52 = vld [vmem:[%s1535_s3] ss:$0 sm:$0xff]  ;;  %v1161_v58 = vld [vmem:[%s1521_s7 + $0x8] sm:$0xff]   ;;  %s897_s16 = sshll.u32 %s422_s28, 4  ;;  %s883_s3 = scalar_lea.sflag [#allocation3], %s420_s12  ;;  %s898_s16 = int_to_ptr.vmem [resolvable:$true] %s897_s16 }
  0x21   : > { %1092 = vmatprep.mubr.msk.bf16.mxu1 %vm1246_vm1, %v1245_v1  ;;  %1077 = vmatpush3.bf16.msra.mxu1 %v1155_v42  ;;  %v1003_v54 = vld [vmem:[%s1518_s4] ss:$0 sm:$0xff]  ;;  %s1167_s14 = scalar_lea.vmem %s898_s16, 128  ;;  %s1171_s23 = sshll.u32 %s1247_s15, 4  ;;  %s1172_s23 = int_to_ptr.vmem [resolvable:$false] %s1171_s23 }
  0x22   : > { %1078 = vmatprep.subr.bf16.mxu1 %v1245_v1  ;;  %v1162_v59 = vld [vmem:[%s1521_s7] sm:$0xff]   ;;  %p1168_p12 = scmp.ne.s32.totalorder %s898_s16, %s1167_s14  ;;  %s1173_s20 = scalar_lea.vmem %s1172_s23, 256 }
  0x23   : > { %v1004_v60 = vld [vmem:[%s1520_s6] ss:$0 sm:$0xff]  ;;  %p1174_p1 = scmp.lt.s32.totalorder %s898_s16, %s1172_s23  ;;  %p1175_p2 = scmp.lt.s32.totalorder %s1173_s20, %s1167_s14 }
  0x24   : > { %p1169_p13 = pnand %p1168_p12, %p1348_p4 }
  0x25   : > { %1079 = vmatpush3.bf16.msra.mxu1 %v1156_v43  ;;  %p1176_p3 = por %p1175_p2, %p1174_p1 }
  0x26   : > { %1053 = vmatmul.mubr.msk.bf16.vlgmr.msra.gmra.mxu0 %vm444_vm2, %v439_v10  ;;  %1080 = vmatprep.subr.bf16.mxu1 %v1245_v1  ;;  %p1170_p0 = pneg %p1169_p13 }
  0x27   : > { %1057 = vmatpush3.bf16.msra.mxu0 %v545_v11  ;;  %1058 = vmatprep.mubr.msk.bf16.mxu0 %vm1246_vm1, %v1245_v1 }
  0x28   : > { %1068 = vmatprep.subr.bf16.mxu0 %v1245_v1  ;;  %p1177_p5 = pnand %p1176_p3, %p1170_p0 }
  0x29   : > { %1081 = vmatpush3.bf16.msra.mxu1 %v1157_v44 }
  0x2a   : > { %1082 = vmatprep.subr.bf16.mxu1 %v1245_v1 }
  0x2d   : > { %1083 = vmatpush3.bf16.msra.mxu1 %v1158_v45 }
  0x2e   : > { %1059 = vmatmul.mubr.msk.bf16.vlgmr.msra.gmra.mxu0 %vm444_vm2, %v998_v12  ;;  %1084 = vmatprep.subr.bf16.mxu1 %v1245_v1 }
  0x2f   : > { %1072 = vmatprep.mubr.msk.bf16.mxu0 %vm1246_vm1, %v1245_v1  ;;  %1069 = vmatpush3.bf16.msra.mxu0 %v1153_v40 }
  0x30   : > { %1070 = vmatprep.subr.bf16.mxu0 %v1245_v1 }
  0x31   : > { %1085 = vmatpush3.bf16.msra.mxu1 %v1159_v46 }
  0x32   : > { %1086 = vmatprep.subr.bf16.mxu1 %v1245_v1 }
  0x33   : > { %1071 = vmatpush3.bf16.msra.mxu0 %v1154_v41 }
  0x35   : > { %1087 = vmatpush3.bf16.msra.mxu1 %v1160_v47 }
  0x36   : > { %1088 = vmatprep.subr.bf16.mxu1 %v1245_v1 }
  0x39   : > { %1089 = vmatpush3.bf16.msra.mxu1 %v1161_v58 }
  0x3a   : > { %1090 = vmatprep.subr.bf16.mxu1 %v1245_v1  ;;  %v1008_v1 = vld [vmem:[%s1522_s8] ss:$0 sm:$0xff] }
  0x3d   : > { %1091 = vmatpush3.bf16.msra.mxu1 %v1162_v59 }
  0xde   : > { %v486_v13 = vpop.f32.mrf.mxu0 }
  0xe0   : > { %v631_v14 = vpop.f32.mrf.mxu1  ;;  %v1048_v15 = vpop.f32.mrf.mxu0 }
  0xe2   : > { %v1066_v16 = vpop.f32.mrf.mxu1  ;;  %v489_v17 = vpop.f32.mrf.mxu0 }
  0xe4   : > { %v634_v18 = vpop.f32.mrf.mxu1  ;;  %v1049_v19 = vpop.f32.mrf.mxu0 }
  0xe6   : > { %v1067_v20 = vpop.f32.mrf.mxu1  ;;  %v532_v21 = vpop.f32.mrf.mxu0 }
  0xe7   : > { %v533_v25 = vadd.f32 %v532_v21, %v486_v13  ;;  %v1017_v21 = vld [vmem:[%s1523_s9] ss:$0 sm:$0xff] }
  0xe8   : > { %v1054_v22 = vpop.f32.mrf.mxu0 }
  0xea   : > { %v535_v23 = vpop.f32.mrf.mxu0 }
  0xeb   : > { %v1018_v23 = vld [vmem:[%s1524_s10] ss:$0 sm:$0xff] }
  0xec   : > { %v1055_v24 = vpop.f32.mrf.mxu0 }
  0xee   : > { %v581_v26 = vpop.f32.mrf.mxu0 }
  0xef   : > { %v587_v27 = vadd.f32 %v581_v26, %v533_v25 }
  0xf0   : > { %v1060_v28 = vpop.f32.mrf.mxu0 }
  0xf1   : > { %v637_v30 = vadd.f32 %v631_v14, %v587_v27 }
  0xf2   : > { %v584_v31 = vpop.f32.mrf.mxu0 }
  0xf3   : > { %v639_v32 = vadd.f32 %v638_v29, %v637_v30 }
  0xf4   : > { %v1061_v33 = vpop.f32.mrf.mxu0 }
  0xf5   : > { %v641_v34 = vsel %vm640_vm3, %v639_v32, 0.0 }
  0xf6   : > { %642 = vadd.xlane.f32.xlu0 %v641_v34 }
 0x17f   : > { %v643_v35 = vpop.xlane.xlu0 %642 }
 0x180   : > { %v645_v36 = vmul.f32 0.03125, %v643_v35 }
 0x182   : > { %v646_v37 = vsub.f32 %v639_v32, %v645_v36 }
 0x184   : > { %v647_v38 = vmul.f32 %v646_v37, %v646_v37 }
 0x186   : > { %v648_v39 = vsel %vm640_vm3, %v647_v38, 0.0 }
 0x187   : > { %649 = vadd.xlane.f32.xlu0 %v648_v39 }
 0x210   : > { %v650_v48 = vpop.xlane.xlu0 %649 }
 0x211   : > { %v651_v49 = vmul.f32 0.03125, %v650_v48 }
 0x213   : > { %v652_v50 = vadd.f32 1e-05, %v651_v49 }
 0x215   : > { %1163 = vrsqrt.f32 %v652_v50 }
 0x222   : > { %v1164_v51 = vpop.eup %1163 }
 0x223   : > { %v654_v53 = vmul.f32 %v1164_v51, %v646_v37 }
 0x225   : > { %v662_v55 = vmul.f32 %v1002_v52, %v654_v53 }
 0x227   : > { %v670_v56 = vadd.f32 %v1003_v54, %v662_v55 }
 0x229   : > { %v671_v57 = vpack.c.bf16 %v670_v56, %v670_v56 }
 0x22b   : > { %1073 = vmatmul.mubr.msk.bf16.vlgmr.msra.gmra.mxu0 %vm640_vm3, %v671_v57 }
 0x2eb   : > { %v732_v61 = vpop.f32.mrf.mxu0 }
 0x2ec   : > { %v733_v62 = vadd.f32 %v1004_v60, %v732_v61 }
 0x2ed   : > { %v1074_v63 = vpop.f32.mrf.mxu0 }
 0x2ee   : > { %v738_v0 = vmax.f32 %v733_v62, 0.0 }
 0x2ef   : > { %v735_v2 = vpop.f32.mrf.mxu0 }
 0x2f0   : > { %v739_v3 = vpack.c.bf16 %v738_v0, %v738_v0 }
 0x2f1   : > { %v1075_v4 = vpop.f32.mrf.mxu0 }
 0x2f2   : > { %1093 = vmatmul.mubr.bf16.vlgmr.msra.gmra.mxu1 %v739_v3 }
 0x3b2   : > { %v845_v5 = vpop.f32.mrf.mxu1 }
 0x3b3   : > { %v846_v6 = vadd.f32 %v1008_v1, %v845_v5 }
 0x3b4   : > { %v1094_v7 = vpop.f32.mrf.mxu1 }
 0x3b5   : > { %v851_v8 = vadd.f32 %v846_v6, %v670_v56 }
 0x3b6   : > { %v848_v9 = vpop.f32.mrf.mxu1 }
 0x3b7   : > { %v852_v10 = vsel %vm640_vm3, %v851_v8, 0.0 }
 0x3b8   : > { %853 = vadd.xlane.f32.xlu1 %v852_v10  ;;  %v1095_v11 = vpop.f32.mrf.mxu1 }
 0x441   : > { %v854_v12 = vpop.xlane.xlu1 %853 }
 0x442   : > { %v855_v13 = vmul.f32 0.03125, %v854_v12 }
 0x444   : > { %v856_v14 = vsub.f32 %v851_v8, %v855_v13 }
 0x446   : > { %v857_v15 = vmul.f32 %v856_v14, %v856_v14 }
 0x448   : > { %v858_v16 = vsel %vm640_vm3, %v857_v15, 0.0 }
 0x449   : > { %859 = vadd.xlane.f32.xlu1 %v858_v16 }
 0x4d2   : > { %v860_v17 = vpop.xlane.xlu1 %859 }
 0x4d3   : > { %v861_v18 = vmul.f32 0.03125, %v860_v17 }
 0x4d5   : > { %v862_v19 = vadd.f32 1e-05, %v861_v18 }
 0x4d7   : > { %1165 = vrsqrt.f32 %v862_v19 }
 0x4e4   : > { %v1166_v20 = vpop.eup %1165 }
 0x4e5   : > { %v864_v22 = vmul.f32 %v1166_v20, %v856_v14 }
 0x4e7   : > { %v872_v24 = vmul.f32 %v1017_v21, %v864_v22 }
 0x4e9   : > { %v880_v25 = vadd.f32 %v1018_v23, %v872_v24 }
 0x4eb   : > { %881 = vst.msk [vmem:[%s422_s28] sm:$0xff] %vm640_vm3, %v880_v25 }
 0x4ec   : > { %1180 = shalt.err (!%p1177_p5)
}
 0x4ed   : > { %s1181_s0 = scalar_lea.hbm %s895_s2, 128  ;;  %s1185_s13 = scalar_lea.hbm %s1525_s11, 256 }
 0x4ee   : > { %p1182_p6 = scmp.ne.s32.totalorder %s895_s2, %s1181_s0  ;;  %p1186_p10 = scmp.lt.s32.totalorder %s895_s2, %s1525_s11 }
 0x4ef   : > { %p1187_p11 = scmp.lt.s32.totalorder %s1185_s13, %s1181_s0 }
 0x4f0   : > { %p1183_p7 = pnand %p1182_p6, %p1348_p4 }
 0x4f1   : > { %p1188_p12 = por %p1187_p11, %p1186_p10 }
 0x4f2   : > { %p1184_p9 = pneg %p1183_p7 }
 0x4f4   : > { %p1189_p13 = pnand %p1188_p12, %p1184_p9 }
 0x4f6   : > { %1192 = shalt.err (!%p1189_p13)
}
 0x4f7   : > { %1096 = dma.vmem_to_hbm [thread:$0]  (%p1348_p4), %s898_s16, 128, %s895_s2, %s883_s3  }
 0x4f8 PF: > { %p1102_p0 = scmp.ge.s32.totalorder %s1243_s22, 2  ;;  %s909_s28 = sand.u32 1, %s1223_s17  }
 0x4f9   : > { %s910_s14 = scalar_lea.sflag [#allocation3], %s909_s28 }
 0x4fa   : > { %p1099_p1 = pnand %p1102_p0, %p1355_p8 }
 0x4fc   : > { %p1100_p2 = pneg %p1099_p1 }
 0x4fe   : > { %1218 = dma.done.wait (%p1100_p2), %s910_s14, 128  }
 0x4ff   : > { %1220 = vsyncadd (%p1100_p2), %s910_s14, 4294967168  ;;  %s24_s22 = sadd.s32 1, %s1243_s22   ;;  %s1536_s17 = smov %s1227_s18 }
 0x500   : > { %p21_p3 = scmp.ge.s32.totalorder %s24_s22, 4   ;;  %s1537_s18 = smov %s1231_s19 }
 0x501   : > { %s1538_s19 = smov %s1361_s30  ;;  %s1539_s20 = smov %s1239_s21 }
 0x502   : > { %s1540_s21 = smov %s1542_s25  ;;  %23 = sbr.rel (!%p21_p3) target bundleno = 9 (0x9), region = 105 }
 0x507   :  { %915 = vsyncpa [#allocation3], 1 }
 0x508   :  { %917 = vsyncpa [#allocation3 + $0x1], 1 }

</bundles_post_ra>
